<compile_context>
chip_gen: v5e
topology: v5e:2x2
jax: 0.10.0
libtpu: 0.0.40
codegen_flags: <defaults>
</compile_context>

<pallas_src>
import functools

import jax
import jax.numpy as jnp
from jax import lax
from jax.experimental import pallas as pl
from jax.experimental.pallas import tpu as pltpu


def _matmul_t(x, w):
    # x: (M, K) f32  (cast to bf16 at the dot),  w: (N, K) bf16 (torch Linear layout)
    # -> x @ w.T accumulated in f32 : (M, N)
    return lax.dot_general(x.astype(jnp.bfloat16), w,
                           (((1,), (1,)), ((), ())),
                           preferred_element_type=jnp.float32)


def gen_enc_share_kernel(
    ids_ref, masks_ref, gumbel_ref, emb_ref,
    wih_ref, whh_ref, bih_ref, bhh_ref,
    ln_g_ref, ln_b_ref, gen_w_ref, gen_b_ref, cls_w_ref, cls_b_ref,
    z_ref, logits_ref,
    *, B, S, V, E, H, C):
    Hd = H // 2
    G = 3 * Hd                       # gates per direction (r, z, n)
    SB = S * B

    ids = ids_ref[...]               # (S*B, 1) int32, time-major (row = t*B + b)
    masks = masks_ref[...]           # (S*B, 1) f32
    gumbel = gumbel_ref[...]         # (S*B, 2) f32
    emb_table = emb_ref[...]         # (V, E) bf16
    wih = wih_ref[...]               # (2G, E) bf16   [fwd gates ; bwd gates]
    whh = whh_ref[...]               # (2G, H) bf16   block-diagonal
    bih = bih_ref[...]               # (1, 2G) f32
    bhh = bhh_ref[...]               # (1, 2G) f32
    ln_g = ln_g_ref[...]; ln_b = ln_b_ref[...]
    gen_w = gen_w_ref[...]; gen_b = gen_b_ref[...]
    cls_w = cls_w_ref[...]; cls_b = cls_b_ref[...]

    # ---- masked embedding lookup: (S*B, V) one-hot (V on lanes) @ (V, E) ----
    iota_v = lax.broadcasted_iota(jnp.int32, (SB, V), 1)
    onehot = (iota_v == ids).astype(jnp.float32)
    embedding = lax.dot_general(onehot.astype(jnp.bfloat16), emb_table,
                                (((1,), (0,)), ((), ())),
                                preferred_element_type=jnp.float32) * masks  # (S*B, E)

    # ---- fused input projection, computed ONCE and reused for both passes ----
    xg_nobias = _matmul_t(embedding, wih)                 # (S*B, 2G), no bias

    bhh_bcast = jnp.broadcast_to(bhh, (B, 2 * G))         # hoisted out of the loops

    # ---- shared bidirectional single-layer GRU (PyTorch gate order r, z, n) ----
    def bigru(xg):
        h_f = jnp.zeros((B, Hd), jnp.float32)
        h_b = jnp.zeros((B, Hd), jnp.float32)
        outs_f = [None] * S
        outs_b = [None] * S
        for s in range(S):                                # static unroll
            tf, tb = s, S - 1 - s
            h_cat = jnp.concatenate([h_f, h_b], axis=1)   # (B, H) = [h_f | h_b]
            # one block-diagonal recurrent matmul covers BOTH directions
            hg = _matmul_t(h_cat, whh) + bhh_bcast        # (B, 2G)
            hg_f = hg[:, 0:G]
            hg_b = hg[:, G:2 * G]
            xgt_f = xg[tf * B:(tf + 1) * B, 0:G]          # full-tile static slices
            xgt_b = xg[tb * B:(tb + 1) * B, G:2 * G]
            r_f = jax.nn.sigmoid(xgt_f[:, 0:Hd] + hg_f[:, 0:Hd])
            z_f = jax.nn.sigmoid(xgt_f[:, Hd:2 * Hd] + hg_f[:, Hd:2 * Hd])
            n_f = jnp.tanh(xgt_f[:, 2 * Hd:G] + r_f * hg_f[:, 2 * Hd:G])
            h_f = (1.0 - z_f) * n_f + z_f * h_f
            r_b = jax.nn.sigmoid(xgt_b[:, 0:Hd] + hg_b[:, 0:Hd])
            z_b = jax.nn.sigmoid(xgt_b[:, Hd:2 * Hd] + hg_b[:, Hd:2 * Hd])
            n_b = jnp.tanh(xgt_b[:, 2 * Hd:G] + r_b * hg_b[:, 2 * Hd:G])
            h_b = (1.0 - z_b) * n_b + z_b * h_b
            outs_f[tf] = h_f
            outs_b[tb] = h_b
        # assemble time-major (S*B, H) once; state never touches VMEM scratch
        rows = [jnp.concatenate([outs_f[t], outs_b[t]], axis=1) for t in range(S)]
        return jnp.concatenate(rows, axis=0)

    def layernorm(x):
        mu = jnp.mean(x, axis=-1, keepdims=True)
        xc = x - mu
        var = jnp.mean(xc * xc, axis=-1, keepdims=True)
        return xc * lax.rsqrt(var + 1e-5) * ln_g + ln_b

    # ---- generator path ----
    gen_out = layernorm(bigru(xg_nobias + bih))           # (S*B, H)
    gen_logits = _matmul_t(gen_out, gen_w) + gen_b        # (S*B, 2); dropout = identity

    # hard Gumbel-softmax forward value; positive tau cannot change the argmax
    y = gen_logits + gumbel
    take0 = (y[:, 0:1] >= y[:, 1:2]).astype(jnp.float32)
    z_hard = jnp.concatenate([take0, 1.0 - take0], axis=1)
    z_ref[...] = z_hard                                   # one store

    # ---- classifier path: reuse input projection, (emb*z1)@W == z1*(emb@W) ----
    z1 = z_hard[:, 1:2]
    cls_out = layernorm(bigru(z1 * xg_nobias + bih))      # (S*B, H)
    cls_out = cls_out * masks + (1.0 - masks) * (-1.0e6)

    # log2(S) tree max-pool over the sequence axis (B is a full sublane group)
    blocks = [cls_out[t * B:(t + 1) * B, :] for t in range(S)]
    while len(blocks) > 1:
        nxt = [jnp.maximum(blocks[i], blocks[i + 1])
               for i in range(0, len(blocks) - 1, 2)]
        if len(blocks) % 2:
            nxt.append(blocks[-1])
        blocks = nxt
    logits_ref[...] = _matmul_t(blocks[0], cls_w) + cls_b  # (B, C)


def gen_enc_share_forward(ids, masks, gumbel, params, *, tau=1.0, num_class=4):
    del tau  # a positive temperature cannot change the hard argmax (forward value)
    B, S = ids.shape
    V, E = params["emb"].shape
    Hd = params["whh_f"].shape[1]
    H = 2 * Hd
    G = 3 * Hd
    C = num_class

    # Pad the batch up to a full sublane group so every per-step access is full-tile.
    B_pad = max(8, ((B + 7) // 8) * 8)
    pad = B_pad - B
    ids_p = jnp.pad(ids.astype(jnp.int32), ((0, pad), (0, 0)))
    masks_p = jnp.pad(masks.astype(jnp.float32), ((0, pad), (0, 0)))
    gumbel_p = jnp.pad(gumbel.astype(jnp.float32), ((0, pad), (0, 0), (0, 0)))

    # Time-major flatten (row = t*B_pad + b): each GRU timestep is a contiguous,
    # sublane-aligned block of B_pad rows.
    ids_tm = jnp.transpose(ids_p, (1, 0)).reshape(S * B_pad, 1)
    masks_tm = jnp.transpose(masks_p, (1, 0)).reshape(S * B_pad, 1)
    gumbel_tm = jnp.transpose(gumbel_p, (1, 0, 2)).reshape(S * B_pad, 2)

    # Fuse fwd|bwd direction weights (same 96-column gate layout everywhere).
    wih = jnp.concatenate([params["wih_f"], params["wih_b"]], axis=0)        # (2G, E)
    bih = jnp.concatenate([params["bih_f"], params["bih_b"]], axis=1)        # (1, 2G)
    bhh = jnp.concatenate([params["bhh_f"], params["bhh_b"]], axis=1)        # (1, 2G)
    zero = jnp.zeros((G, Hd), jnp.float32)
    whh = jnp.concatenate(
        [jnp.concatenate([params["whh_f"], zero], axis=1),
         jnp.concatenate([zero, params["whh_b"]], axis=1)], axis=0)          # (2G, H)

    bf16 = lambda x: x.astype(jnp.bfloat16)
    args = (ids_tm, masks_tm, gumbel_tm, bf16(params["emb"]),
            bf16(wih), bf16(whh),
            bih.astype(jnp.float32), bhh.astype(jnp.float32),
            params["ln_g"], params["ln_b"],
            bf16(params["gen_w"]), params["gen_b"],
            bf16(params["cls_w"]), params["cls_b"])

    kernel = functools.partial(gen_enc_share_kernel,
                               B=B_pad, S=S, V=V, E=E, H=H, C=C)

    z_tm, cls_logits = pl.pallas_call(
        kernel,
        out_shape=(jax.ShapeDtypeStruct((S * B_pad, 2), jnp.float32),
                   jax.ShapeDtypeStruct((B_pad, C), jnp.float32)),
        in_specs=[pl.BlockSpec(memory_space=pltpu.MemorySpace.VMEM)
                  for _ in range(len(args))],
        out_specs=(pl.BlockSpec(memory_space=pltpu.MemorySpace.VMEM),
                   pl.BlockSpec(memory_space=pltpu.MemorySpace.VMEM)),
    )(*args)

    z = jnp.transpose(z_tm.reshape(S, B_pad, 2), (1, 0, 2))[:B]   # back to (B, S, 2)
    return z, cls_logits[:B]


if __name__ == "__main__":
    # args: vocab_size=20, embedding_dim=32, hidden_dim=32, num_layers=1,
    #       cell_type='GRU', num_class=4, z_dim=2 (fixed), tau=[1.0], dropout (inference)
    B, S, V, E, H, C = 2, 8, 20, 32, 32, 4
    Hd = H // 2

    key = jax.random.PRNGKey(0)
    ks = jax.random.split(key, 20)

    def w(k, shape, scale=0.1):
        return scale * jax.random.normal(k, shape, dtype=jnp.float32)

    params = dict(
        emb=w(ks[0], (V, E), 1.0),                                   # Embedding weight
        wih_f=w(ks[1], (3 * Hd, E)), whh_f=w(ks[2], (3 * Hd, Hd)),   # GRU fwd
        bih_f=w(ks[3], (1, 3 * Hd)), bhh_f=w(ks[4], (1, 3 * Hd)),
        wih_b=w(ks[5], (3 * Hd, E)), whh_b=w(ks[6], (3 * Hd, Hd)),   # GRU bwd
        bih_b=w(ks[7], (1, 3 * Hd)), bhh_b=w(ks[8], (1, 3 * Hd)),
        ln_g=jnp.ones((1, H), jnp.float32),                          # LayerNorm (tied)
        ln_b=jnp.zeros((1, H), jnp.float32),
        gen_w=w(ks[9], (2, H)), gen_b=w(ks[10], (1, 2)),             # gen_fc
        cls_w=w(ks[11], (C, H)), cls_b=w(ks[12], (1, C)),            # cls_fc
    )

    ids = jax.random.randint(ks[13], (B, S), 0, V, dtype=jnp.int32)
    masks = (jax.random.uniform(ks[14], (B, S)) > 0.2).astype(jnp.float32)
    # Gumbel noise for F.gumbel_softmax is generated (deterministically) in the
    # wrapper and passed in; the hard one-hot decision happens inside the kernel.
    gumbel = jax.random.gumbel(ks[15], (B, S, 2), dtype=jnp.float32)

    z, cls_logits = gen_enc_share_forward(ids, masks, gumbel, params,
                                          tau=1.0, num_class=C)
    z, cls_logits = jax.block_until_ready((z, cls_logits))

    assert z.shape == (B, S, 2)
    assert cls_logits.shape == (B, C)
    assert bool(jnp.all(jnp.abs(jnp.sum(z, axis=-1) - 1.0) < 1e-6))   # hard one-hot rows
    assert bool(jnp.all(jnp.isfinite(cls_logits)))
    # TODO(synk): straight-through gradient path (y_hard - y_soft.detach() + y_soft)
    # is not representable in this forward-only kernel; dropout is identity (inference).
    print("KERNEL_OK")
</pallas_src>

<mosaic_0001>
module attributes {stable_mosaic.version = 11 : i64} {
  func.func @gen_enc_share_kernel(%arg0: memref<64x1xi32, #tpu.memory_space<vmem>>, %arg1: memref<64x1xf32, #tpu.memory_space<vmem>>, %arg2: memref<64x2xf32, #tpu.memory_space<vmem>>, %arg3: memref<20x32xbf16, #tpu.memory_space<vmem>>, %arg4: memref<96x32xbf16, #tpu.memory_space<vmem>>, %arg5: memref<96x32xbf16, #tpu.memory_space<vmem>>, %arg6: memref<1x96xf32, #tpu.memory_space<vmem>>, %arg7: memref<1x96xf32, #tpu.memory_space<vmem>>, %arg8: memref<1x32xf32, #tpu.memory_space<vmem>>, %arg9: memref<1x32xf32, #tpu.memory_space<vmem>>, %arg10: memref<2x32xbf16, #tpu.memory_space<vmem>>, %arg11: memref<1x2xf32, #tpu.memory_space<vmem>>, %arg12: memref<4x32xbf16, #tpu.memory_space<vmem>>, %arg13: memref<1x4xf32, #tpu.memory_space<vmem>>, %arg14: memref<64x2xf32, #tpu.memory_space<vmem>>, %arg15: memref<8x4xf32, #tpu.memory_space<vmem>>) attributes {dimension_semantics = [], scalar_prefetch = 0 : i64, scratch_operands = 0 : i64, tpu.core_type = #tpu.core_type<tc>} {
    %c0 = arith.constant 0 : index
    %c0_0 = arith.constant 0 : index
    %0 = vector.load %arg0[%c0, %c0_0] : memref<64x1xi32, #tpu.memory_space<vmem>>, vector<64x1xi32>
    %c0_1 = arith.constant 0 : index
    %c0_2 = arith.constant 0 : index
    %1 = vector.load %arg1[%c0_1, %c0_2] : memref<64x1xf32, #tpu.memory_space<vmem>>, vector<64x1xf32>
    %c0_3 = arith.constant 0 : index
    %c0_4 = arith.constant 0 : index
    %2 = vector.load %arg2[%c0_3, %c0_4] : memref<64x2xf32, #tpu.memory_space<vmem>>, vector<64x2xf32>
    %c0_5 = arith.constant 0 : index
    %c0_6 = arith.constant 0 : index
    %3 = vector.load %arg3[%c0_5, %c0_6] : memref<20x32xbf16, #tpu.memory_space<vmem>>, vector<20x32xbf16>
    %c0_7 = arith.constant 0 : index
    %c0_8 = arith.constant 0 : index
    %4 = vector.load %arg4[%c0_7, %c0_8] : memref<96x32xbf16, #tpu.memory_space<vmem>>, vector<96x32xbf16>
    %c0_9 = arith.constant 0 : index
    %c0_10 = arith.constant 0 : index
    %5 = vector.load %arg5[%c0_9, %c0_10] : memref<96x32xbf16, #tpu.memory_space<vmem>>, vector<96x32xbf16>
    %c0_11 = arith.constant 0 : index
    %c0_12 = arith.constant 0 : index
    %6 = vector.load %arg6[%c0_11, %c0_12] : memref<1x96xf32, #tpu.memory_space<vmem>>, vector<1x96xf32>
    %c0_13 = arith.constant 0 : index
    %c0_14 = arith.constant 0 : index
    %7 = vector.load %arg7[%c0_13, %c0_14] : memref<1x96xf32, #tpu.memory_space<vmem>>, vector<1x96xf32>
    %c0_15 = arith.constant 0 : index
    %c0_16 = arith.constant 0 : index
    %8 = vector.load %arg8[%c0_15, %c0_16] : memref<1x32xf32, #tpu.memory_space<vmem>>, vector<1x32xf32>
    %c0_17 = arith.constant 0 : index
    %c0_18 = arith.constant 0 : index
    %9 = vector.load %arg9[%c0_17, %c0_18] : memref<1x32xf32, #tpu.memory_space<vmem>>, vector<1x32xf32>
    %c0_19 = arith.constant 0 : index
    %c0_20 = arith.constant 0 : index
    %10 = vector.load %arg10[%c0_19, %c0_20] : memref<2x32xbf16, #tpu.memory_space<vmem>>, vector<2x32xbf16>
    %c0_21 = arith.constant 0 : index
    %c0_22 = arith.constant 0 : index
    %11 = vector.load %arg11[%c0_21, %c0_22] : memref<1x2xf32, #tpu.memory_space<vmem>>, vector<1x2xf32>
    %c0_23 = arith.constant 0 : index
    %c0_24 = arith.constant 0 : index
    %12 = vector.load %arg12[%c0_23, %c0_24] : memref<4x32xbf16, #tpu.memory_space<vmem>>, vector<4x32xbf16>
    %c0_25 = arith.constant 0 : index
    %c0_26 = arith.constant 0 : index
    %13 = vector.load %arg13[%c0_25, %c0_26] : memref<1x4xf32, #tpu.memory_space<vmem>>, vector<1x4xf32>
    %14 = tpu.iota {dimensions = array<i32: 1>} : vector<64x20xi32>
    %15 = vector.broadcast %0 : vector<64x1xi32> to vector<64x20xi32>
    %16 = arith.cmpi eq, %14, %15 : vector<64x20xi32>
    %17 = arith.extui %16 : vector<64x20xi1> to vector<64x20xi32>
    %18 = arith.sitofp %17 : vector<64x20xi32> to vector<64x20xf32>
    %19 = arith.truncf %18 : vector<64x20xf32> to vector<64x20xbf16>
    %cst = arith.constant dense<0.000000e+00> : vector<64x32xf32>
    %20 = tpu.matmul %19, %3, %cst {dimension_numbers = #tpu.dot_dimension_numbers<[1], [0], [0], [1], [0, 0, 1, 1], [], []>} : vector<64x20xbf16>, vector<20x32xbf16>, vector<64x32xf32> -> vector<64x32xf32>
    %21 = vector.broadcast %1 : vector<64x1xf32> to vector<64x32xf32>
    %22 = arith.mulf %20, %21 : vector<64x32xf32>
    %23 = arith.truncf %22 : vector<64x32xf32> to vector<64x32xbf16>
    %cst_27 = arith.constant dense<0.000000e+00> : vector<64x96xf32>
    %24 = tpu.matmul %23, %4, %cst_27 {dimension_numbers = #tpu.dot_dimension_numbers<[1], [1], [0], [0], [0, 0, 1, 0], [], []>} : vector<64x32xbf16>, vector<96x32xbf16>, vector<64x96xf32> -> vector<64x96xf32>
    %25 = vector.shape_cast %7 : vector<1x96xf32> to vector<1x96xf32>
    %26 = vector.broadcast %25 : vector<1x96xf32> to vector<8x96xf32>
    %27 = vector.broadcast %6 : vector<1x96xf32> to vector<64x96xf32>
    %28 = arith.addf %24, %27 : vector<64x96xf32>
    %cst_28 = arith.constant 0.000000e+00 : f32
    %29 = vector.broadcast %cst_28 : f32 to vector<8x16xf32>
    %cst_29 = arith.constant 0.000000e+00 : f32
    %30 = vector.broadcast %cst_29 : f32 to vector<8x16xf32>
    %31 = tpu.concatenate %29, %30 in 1 : vector<8x16xf32>, vector<8x16xf32> -> vector<8x32xf32>
    %32 = arith.truncf %31 : vector<8x32xf32> to vector<8x32xbf16>
    %cst_30 = arith.constant dense<0.000000e+00> : vector<8x96xf32>
    %33 = tpu.matmul %32, %5, %cst_30 {dimension_numbers = #tpu.dot_dimension_numbers<[1], [1], [0], [0], [0, 0, 1, 0], [], []>} : vector<8x32xbf16>, vector<96x32xbf16>, vector<8x96xf32> -> vector<8x96xf32>
    %34 = arith.addf %33, %26 : vector<8x96xf32>
    %35 = vector.extract_strided_slice %34 {offsets = [0, 0], sizes = [8, 48], strides = [1, 1]} : vector<8x96xf32> to vector<8x48xf32>
    %36 = vector.extract_strided_slice %34 {offsets = [0, 48], sizes = [8, 48], strides = [1, 1]} : vector<8x96xf32> to vector<8x48xf32>
    %37 = vector.extract_strided_slice %28 {offsets = [0, 0], sizes = [8, 48], strides = [1, 1]} : vector<64x96xf32> to vector<8x48xf32>
    %38 = vector.extract_strided_slice %28 {offsets = [56, 48], sizes = [8, 48], strides = [1, 1]} : vector<64x96xf32> to vector<8x48xf32>
    %39 = vector.extract_strided_slice %37 {offsets = [0, 0], sizes = [8, 16], strides = [1, 1]} : vector<8x48xf32> to vector<8x16xf32>
    %40 = vector.extract_strided_slice %35 {offsets = [0, 0], sizes = [8, 16], strides = [1, 1]} : vector<8x48xf32> to vector<8x16xf32>
    %41 = arith.addf %39, %40 : vector<8x16xf32>
    %42 = arith.negf %41 : vector<8x16xf32>
    %43 = math.exp %42 : vector<8x16xf32>
    %cst_31 = arith.constant 1.000000e+00 : f32
    %44 = vector.broadcast %cst_31 : f32 to vector<8x16xf32>
    %45 = arith.addf %44, %43 : vector<8x16xf32>
    %46 = arith.divf %44, %45 : vector<8x16xf32>
    %47 = vector.extract_strided_slice %37 {offsets = [0, 16], sizes = [8, 16], strides = [1, 1]} : vector<8x48xf32> to vector<8x16xf32>
    %48 = vector.extract_strided_slice %35 {offsets = [0, 16], sizes = [8, 16], strides = [1, 1]} : vector<8x48xf32> to vector<8x16xf32>
    %49 = arith.addf %47, %48 : vector<8x16xf32>
    %50 = arith.negf %49 : vector<8x16xf32>
    %51 = math.exp %50 : vector<8x16xf32>
    %cst_32 = arith.constant 1.000000e+00 : f32
    %52 = vector.broadcast %cst_32 : f32 to vector<8x16xf32>
    %53 = arith.addf %52, %51 : vector<8x16xf32>
    %54 = arith.divf %52, %53 : vector<8x16xf32>
    %55 = vector.extract_strided_slice %37 {offsets = [0, 32], sizes = [8, 16], strides = [1, 1]} : vector<8x48xf32> to vector<8x16xf32>
    %56 = vector.extract_strided_slice %35 {offsets = [0, 32], sizes = [8, 16], strides = [1, 1]} : vector<8x48xf32> to vector<8x16xf32>
    %57 = arith.mulf %46, %56 : vector<8x16xf32>
    %58 = arith.addf %55, %57 : vector<8x16xf32>
    %59 = math.tanh %58 : vector<8x16xf32>
    %cst_33 = arith.constant 1.000000e+00 : f32
    %60 = vector.broadcast %cst_33 : f32 to vector<8x16xf32>
    %61 = arith.subf %60, %54 : vector<8x16xf32>
    %62 = arith.mulf %61, %59 : vector<8x16xf32>
    %63 = arith.mulf %54, %29 : vector<8x16xf32>
    %64 = arith.addf %62, %63 : vector<8x16xf32>
    %65 = vector.extract_strided_slice %38 {offsets = [0, 0], sizes = [8, 16], strides = [1, 1]} : vector<8x48xf32> to vector<8x16xf32>
    %66 = vector.extract_strided_slice %36 {offsets = [0, 0], sizes = [8, 16], strides = [1, 1]} : vector<8x48xf32> to vector<8x16xf32>
    %67 = arith.addf %65, %66 : vector<8x16xf32>
    %68 = arith.negf %67 : vector<8x16xf32>
    %69 = math.exp %68 : vector<8x16xf32>
    %cst_34 = arith.constant 1.000000e+00 : f32
    %70 = vector.broadcast %cst_34 : f32 to vector<8x16xf32>
    %71 = arith.addf %70, %69 : vector<8x16xf32>
    %72 = arith.divf %70, %71 : vector<8x16xf32>
    %73 = vector.extract_strided_slice %38 {offsets = [0, 16], sizes = [8, 16], strides = [1, 1]} : vector<8x48xf32> to vector<8x16xf32>
    %74 = vector.extract_strided_slice %36 {offsets = [0, 16], sizes = [8, 16], strides = [1, 1]} : vector<8x48xf32> to vector<8x16xf32>
    %75 = arith.addf %73, %74 : vector<8x16xf32>
    %76 = arith.negf %75 : vector<8x16xf32>
    %77 = math.exp %76 : vector<8x16xf32>
    %cst_35 = arith.constant 1.000000e+00 : f32
    %78 = vector.broadcast %cst_35 : f32 to vector<8x16xf32>
    %79 = arith.addf %78, %77 : vector<8x16xf32>
    %80 = arith.divf %78, %79 : vector<8x16xf32>
    %81 = vector.extract_strided_slice %38 {offsets = [0, 32], sizes = [8, 16], strides = [1, 1]} : vector<8x48xf32> to vector<8x16xf32>
    %82 = vector.extract_strided_slice %36 {offsets = [0, 32], sizes = [8, 16], strides = [1, 1]} : vector<8x48xf32> to vector<8x16xf32>
    %83 = arith.mulf %72, %82 : vector<8x16xf32>
    %84 = arith.addf %81, %83 : vector<8x16xf32>
    %85 = math.tanh %84 : vector<8x16xf32>
    %cst_36 = arith.constant 1.000000e+00 : f32
    %86 = vector.broadcast %cst_36 : f32 to vector<8x16xf32>
    %87 = arith.subf %86, %80 : vector<8x16xf32>
    %88 = arith.mulf %87, %85 : vector<8x16xf32>
    %89 = arith.mulf %80, %30 : vector<8x16xf32>
    %90 = arith.addf %88, %89 : vector<8x16xf32>
    %91 = tpu.concatenate %64, %90 in 1 : vector<8x16xf32>, vector<8x16xf32> -> vector<8x32xf32>
    %92 = arith.truncf %91 : vector<8x32xf32> to vector<8x32xbf16>
    %cst_37 = arith.constant dense<0.000000e+00> : vector<8x96xf32>
    %93 = tpu.matmul %92, %5, %cst_37 {dimension_numbers = #tpu.dot_dimension_numbers<[1], [1], [0], [0], [0, 0, 1, 0], [], []>} : vector<8x32xbf16>, vector<96x32xbf16>, vector<8x96xf32> -> vector<8x96xf32>
    %94 = arith.addf %93, %26 : vector<8x96xf32>
    %95 = vector.extract_strided_slice %94 {offsets = [0, 0], sizes = [8, 48], strides = [1, 1]} : vector<8x96xf32> to vector<8x48xf32>
    %96 = vector.extract_strided_slice %94 {offsets = [0, 48], sizes = [8, 48], strides = [1, 1]} : vector<8x96xf32> to vector<8x48xf32>
    %97 = vector.extract_strided_slice %28 {offsets = [8, 0], sizes = [8, 48], strides = [1, 1]} : vector<64x96xf32> to vector<8x48xf32>
    %98 = vector.extract_strided_slice %28 {offsets = [48, 48], sizes = [8, 48], strides = [1, 1]} : vector<64x96xf32> to vector<8x48xf32>
    %99 = vector.extract_strided_slice %97 {offsets = [0, 0], sizes = [8, 16], strides = [1, 1]} : vector<8x48xf32> to vector<8x16xf32>
    %100 = vector.extract_strided_slice %95 {offsets = [0, 0], sizes = [8, 16], strides = [1, 1]} : vector<8x48xf32> to vector<8x16xf32>
    %101 = arith.addf %99, %100 : vector<8x16xf32>
    %102 = arith.negf %101 : vector<8x16xf32>
    %103 = math.exp %102 : vector<8x16xf32>
    %cst_38 = arith.constant 1.000000e+00 : f32
    %104 = vector.broadcast %cst_38 : f32 to vector<8x16xf32>
    %105 = arith.addf %104, %103 : vector<8x16xf32>
    %106 = arith.divf %104, %105 : vector<8x16xf32>
    %107 = vector.extract_strided_slice %97 {offsets = [0, 16], sizes = [8, 16], strides = [1, 1]} : vector<8x48xf32> to vector<8x16xf32>
    %108 = vector.extract_strided_slice %95 {offsets = [0, 16], sizes = [8, 16], strides = [1, 1]} : vector<8x48xf32> to vector<8x16xf32>
    %109 = arith.addf %107, %108 : vector<8x16xf32>
    %110 = arith.negf %109 : vector<8x16xf32>
    %111 = math.exp %110 : vector<8x16xf32>
    %cst_39 = arith.constant 1.000000e+00 : f32
    %112 = vector.broadcast %cst_39 : f32 to vector<8x16xf32>
    %113 = arith.addf %112, %111 : vector<8x16xf32>
    %114 = arith.divf %112, %113 : vector<8x16xf32>
    %115 = vector.extract_strided_slice %97 {offsets = [0, 32], sizes = [8, 16], strides = [1, 1]} : vector<8x48xf32> to vector<8x16xf32>
    %116 = vector.extract_strided_slice %95 {offsets = [0, 32], sizes = [8, 16], strides = [1, 1]} : vector<8x48xf32> to vector<8x16xf32>
    %117 = arith.mulf %106, %116 : vector<8x16xf32>
    %118 = arith.addf %115, %117 : vector<8x16xf32>
    %119 = math.tanh %118 : vector<8x16xf32>
    %cst_40 = arith.constant 1.000000e+00 : f32
    %120 = vector.broadcast %cst_40 : f32 to vector<8x16xf32>
    %121 = arith.subf %120, %114 : vector<8x16xf32>
    %122 = arith.mulf %121, %119 : vector<8x16xf32>
    %123 = arith.mulf %114, %64 : vector<8x16xf32>
    %124 = arith.addf %122, %123 : vector<8x16xf32>
    %125 = vector.extract_strided_slice %98 {offsets = [0, 0], sizes = [8, 16], strides = [1, 1]} : vector<8x48xf32> to vector<8x16xf32>
    %126 = vector.extract_strided_slice %96 {offsets = [0, 0], sizes = [8, 16], strides = [1, 1]} : vector<8x48xf32> to vector<8x16xf32>
    %127 = arith.addf %125, %126 : vector<8x16xf32>
    %128 = arith.negf %127 : vector<8x16xf32>
    %129 = math.exp %128 : vector<8x16xf32>
    %cst_41 = arith.constant 1.000000e+00 : f32
    %130 = vector.broadcast %cst_41 : f32 to vector<8x16xf32>
    %131 = arith.addf %130, %129 : vector<8x16xf32>
    %132 = arith.divf %130, %131 : vector<8x16xf32>
    %133 = vector.extract_strided_slice %98 {offsets = [0, 16], sizes = [8, 16], strides = [1, 1]} : vector<8x48xf32> to vector<8x16xf32>
    %134 = vector.extract_strided_slice %96 {offsets = [0, 16], sizes = [8, 16], strides = [1, 1]} : vector<8x48xf32> to vector<8x16xf32>
    %135 = arith.addf %133, %134 : vector<8x16xf32>
    %136 = arith.negf %135 : vector<8x16xf32>
    %137 = math.exp %136 : vector<8x16xf32>
    %cst_42 = arith.constant 1.000000e+00 : f32
    %138 = vector.broadcast %cst_42 : f32 to vector<8x16xf32>
    %139 = arith.addf %138, %137 : vector<8x16xf32>
    %140 = arith.divf %138, %139 : vector<8x16xf32>
    %141 = vector.extract_strided_slice %98 {offsets = [0, 32], sizes = [8, 16], strides = [1, 1]} : vector<8x48xf32> to vector<8x16xf32>
    %142 = vector.extract_strided_slice %96 {offsets = [0, 32], sizes = [8, 16], strides = [1, 1]} : vector<8x48xf32> to vector<8x16xf32>
    %143 = arith.mulf %132, %142 : vector<8x16xf32>
    %144 = arith.addf %141, %143 : vector<8x16xf32>
    %145 = math.tanh %144 : vector<8x16xf32>
    %cst_43 = arith.constant 1.000000e+00 : f32
    %146 = vector.broadcast %cst_43 : f32 to vector<8x16xf32>
    %147 = arith.subf %146, %140 : vector<8x16xf32>
    %148 = arith.mulf %147, %145 : vector<8x16xf32>
    %149 = arith.mulf %140, %90 : vector<8x16xf32>
    %150 = arith.addf %148, %149 : vector<8x16xf32>
    %151 = tpu.concatenate %124, %150 in 1 : vector<8x16xf32>, vector<8x16xf32> -> vector<8x32xf32>
    %152 = arith.truncf %151 : vector<8x32xf32> to vector<8x32xbf16>
    %cst_44 = arith.constant dense<0.000000e+00> : vector<8x96xf32>
    %153 = tpu.matmul %152, %5, %cst_44 {dimension_numbers = #tpu.dot_dimension_numbers<[1], [1], [0], [0], [0, 0, 1, 0], [], []>} : vector<8x32xbf16>, vector<96x32xbf16>, vector<8x96xf32> -> vector<8x96xf32>
    %154 = arith.addf %153, %26 : vector<8x96xf32>
    %155 = vector.extract_strided_slice %154 {offsets = [0, 0], sizes = [8, 48], strides = [1, 1]} : vector<8x96xf32> to vector<8x48xf32>
    %156 = vector.extract_strided_slice %154 {offsets = [0, 48], sizes = [8, 48], strides = [1, 1]} : vector<8x96xf32> to vector<8x48xf32>
    %157 = vector.extract_strided_slice %28 {offsets = [16, 0], sizes = [8, 48], strides = [1, 1]} : vector<64x96xf32> to vector<8x48xf32>
    %158 = vector.extract_strided_slice %28 {offsets = [40, 48], sizes = [8, 48], strides = [1, 1]} : vector<64x96xf32> to vector<8x48xf32>
    %159 = vector.extract_strided_slice %157 {offsets = [0, 0], sizes = [8, 16], strides = [1, 1]} : vector<8x48xf32> to vector<8x16xf32>
    %160 = vector.extract_strided_slice %155 {offsets = [0, 0], sizes = [8, 16], strides = [1, 1]} : vector<8x48xf32> to vector<8x16xf32>
    %161 = arith.addf %159, %160 : vector<8x16xf32>
    %162 = arith.negf %161 : vector<8x16xf32>
    %163 = math.exp %162 : vector<8x16xf32>
    %cst_45 = arith.constant 1.000000e+00 : f32
    %164 = vector.broadcast %cst_45 : f32 to vector<8x16xf32>
    %165 = arith.addf %164, %163 : vector<8x16xf32>
    %166 = arith.divf %164, %165 : vector<8x16xf32>
    %167 = vector.extract_strided_slice %157 {offsets = [0, 16], sizes = [8, 16], strides = [1, 1]} : vector<8x48xf32> to vector<8x16xf32>
    %168 = vector.extract_strided_slice %155 {offsets = [0, 16], sizes = [8, 16], strides = [1, 1]} : vector<8x48xf32> to vector<8x16xf32>
    %169 = arith.addf %167, %168 : vector<8x16xf32>
    %170 = arith.negf %169 : vector<8x16xf32>
    %171 = math.exp %170 : vector<8x16xf32>
    %cst_46 = arith.constant 1.000000e+00 : f32
    %172 = vector.broadcast %cst_46 : f32 to vector<8x16xf32>
    %173 = arith.addf %172, %171 : vector<8x16xf32>
    %174 = arith.divf %172, %173 : vector<8x16xf32>
    %175 = vector.extract_strided_slice %157 {offsets = [0, 32], sizes = [8, 16], strides = [1, 1]} : vector<8x48xf32> to vector<8x16xf32>
    %176 = vector.extract_strided_slice %155 {offsets = [0, 32], sizes = [8, 16], strides = [1, 1]} : vector<8x48xf32> to vector<8x16xf32>
    %177 = arith.mulf %166, %176 : vector<8x16xf32>
    %178 = arith.addf %175, %177 : vector<8x16xf32>
    %179 = math.tanh %178 : vector<8x16xf32>
    %cst_47 = arith.constant 1.000000e+00 : f32
    %180 = vector.broadcast %cst_47 : f32 to vector<8x16xf32>
    %181 = arith.subf %180, %174 : vector<8x16xf32>
    %182 = arith.mulf %181, %179 : vector<8x16xf32>
    %183 = arith.mulf %174, %124 : vector<8x16xf32>
    %184 = arith.addf %182, %183 : vector<8x16xf32>
    %185 = vector.extract_strided_slice %158 {offsets = [0, 0], sizes = [8, 16], strides = [1, 1]} : vector<8x48xf32> to vector<8x16xf32>
    %186 = vector.extract_strided_slice %156 {offsets = [0, 0], sizes = [8, 16], strides = [1, 1]} : vector<8x48xf32> to vector<8x16xf32>
    %187 = arith.addf %185, %186 : vector<8x16xf32>
    %188 = arith.negf %187 : vector<8x16xf32>
    %189 = math.exp %188 : vector<8x16xf32>
    %cst_48 = arith.constant 1.000000e+00 : f32
    %190 = vector.broadcast %cst_48 : f32 to vector<8x16xf32>
    %191 = arith.addf %190, %189 : vector<8x16xf32>
    %192 = arith.divf %190, %191 : vector<8x16xf32>
    %193 = vector.extract_strided_slice %158 {offsets = [0, 16], sizes = [8, 16], strides = [1, 1]} : vector<8x48xf32> to vector<8x16xf32>
    %194 = vector.extract_strided_slice %156 {offsets = [0, 16], sizes = [8, 16], strides = [1, 1]} : vector<8x48xf32> to vector<8x16xf32>
    %195 = arith.addf %193, %194 : vector<8x16xf32>
    %196 = arith.negf %195 : vector<8x16xf32>
    %197 = math.exp %196 : vector<8x16xf32>
    %cst_49 = arith.constant 1.000000e+00 : f32
    %198 = vector.broadcast %cst_49 : f32 to vector<8x16xf32>
    %199 = arith.addf %198, %197 : vector<8x16xf32>
    %200 = arith.divf %198, %199 : vector<8x16xf32>
    %201 = vector.extract_strided_slice %158 {offsets = [0, 32], sizes = [8, 16], strides = [1, 1]} : vector<8x48xf32> to vector<8x16xf32>
    %202 = vector.extract_strided_slice %156 {offsets = [0, 32], sizes = [8, 16], strides = [1, 1]} : vector<8x48xf32> to vector<8x16xf32>
    %203 = arith.mulf %192, %202 : vector<8x16xf32>
    %204 = arith.addf %201, %203 : vector<8x16xf32>
    %205 = math.tanh %204 : vector<8x16xf32>
    %cst_50 = arith.constant 1.000000e+00 : f32
    %206 = vector.broadcast %cst_50 : f32 to vector<8x16xf32>
    %207 = arith.subf %206, %200 : vector<8x16xf32>
    %208 = arith.mulf %207, %205 : vector<8x16xf32>
    %209 = arith.mulf %200, %150 : vector<8x16xf32>
    %210 = arith.addf %208, %209 : vector<8x16xf32>
    %211 = tpu.concatenate %184, %210 in 1 : vector<8x16xf32>, vector<8x16xf32> -> vector<8x32xf32>
    %212 = arith.truncf %211 : vector<8x32xf32> to vector<8x32xbf16>
    %cst_51 = arith.constant dense<0.000000e+00> : vector<8x96xf32>
    %213 = tpu.matmul %212, %5, %cst_51 {dimension_numbers = #tpu.dot_dimension_numbers<[1], [1], [0], [0], [0, 0, 1, 0], [], []>} : vector<8x32xbf16>, vector<96x32xbf16>, vector<8x96xf32> -> vector<8x96xf32>
    %214 = arith.addf %213, %26 : vector<8x96xf32>
    %215 = vector.extract_strided_slice %214 {offsets = [0, 0], sizes = [8, 48], strides = [1, 1]} : vector<8x96xf32> to vector<8x48xf32>
    %216 = vector.extract_strided_slice %214 {offsets = [0, 48], sizes = [8, 48], strides = [1, 1]} : vector<8x96xf32> to vector<8x48xf32>
    %217 = vector.extract_strided_slice %28 {offsets = [24, 0], sizes = [8, 48], strides = [1, 1]} : vector<64x96xf32> to vector<8x48xf32>
    %218 = vector.extract_strided_slice %28 {offsets = [32, 48], sizes = [8, 48], strides = [1, 1]} : vector<64x96xf32> to vector<8x48xf32>
    %219 = vector.extract_strided_slice %217 {offsets = [0, 0], sizes = [8, 16], strides = [1, 1]} : vector<8x48xf32> to vector<8x16xf32>
    %220 = vector.extract_strided_slice %215 {offsets = [0, 0], sizes = [8, 16], strides = [1, 1]} : vector<8x48xf32> to vector<8x16xf32>
    %221 = arith.addf %219, %220 : vector<8x16xf32>
    %222 = arith.negf %221 : vector<8x16xf32>
    %223 = math.exp %222 : vector<8x16xf32>
    %cst_52 = arith.constant 1.000000e+00 : f32
    %224 = vector.broadcast %cst_52 : f32 to vector<8x16xf32>
    %225 = arith.addf %224, %223 : vector<8x16xf32>
    %226 = arith.divf %224, %225 : vector<8x16xf32>
    %227 = vector.extract_strided_slice %217 {offsets = [0, 16], sizes = [8, 16], strides = [1, 1]} : vector<8x48xf32> to vector<8x16xf32>
    %228 = vector.extract_strided_slice %215 {offsets = [0, 16], sizes = [8, 16], strides = [1, 1]} : vector<8x48xf32> to vector<8x16xf32>
    %229 = arith.addf %227, %228 : vector<8x16xf32>
    %230 = arith.negf %229 : vector<8x16xf32>
    %231 = math.exp %230 : vector<8x16xf32>
    %cst_53 = arith.constant 1.000000e+00 : f32
    %232 = vector.broadcast %cst_53 : f32 to vector<8x16xf32>
    %233 = arith.addf %232, %231 : vector<8x16xf32>
    %234 = arith.divf %232, %233 : vector<8x16xf32>
    %235 = vector.extract_strided_slice %217 {offsets = [0, 32], sizes = [8, 16], strides = [1, 1]} : vector<8x48xf32> to vector<8x16xf32>
    %236 = vector.extract_strided_slice %215 {offsets = [0, 32], sizes = [8, 16], strides = [1, 1]} : vector<8x48xf32> to vector<8x16xf32>
    %237 = arith.mulf %226, %236 : vector<8x16xf32>
    %238 = arith.addf %235, %237 : vector<8x16xf32>
    %239 = math.tanh %238 : vector<8x16xf32>
    %cst_54 = arith.constant 1.000000e+00 : f32
    %240 = vector.broadcast %cst_54 : f32 to vector<8x16xf32>
    %241 = arith.subf %240, %234 : vector<8x16xf32>
    %242 = arith.mulf %241, %239 : vector<8x16xf32>
    %243 = arith.mulf %234, %184 : vector<8x16xf32>
    %244 = arith.addf %242, %243 : vector<8x16xf32>
    %245 = vector.extract_strided_slice %218 {offsets = [0, 0], sizes = [8, 16], strides = [1, 1]} : vector<8x48xf32> to vector<8x16xf32>
    %246 = vector.extract_strided_slice %216 {offsets = [0, 0], sizes = [8, 16], strides = [1, 1]} : vector<8x48xf32> to vector<8x16xf32>
    %247 = arith.addf %245, %246 : vector<8x16xf32>
    %248 = arith.negf %247 : vector<8x16xf32>
    %249 = math.exp %248 : vector<8x16xf32>
    %cst_55 = arith.constant 1.000000e+00 : f32
    %250 = vector.broadcast %cst_55 : f32 to vector<8x16xf32>
    %251 = arith.addf %250, %249 : vector<8x16xf32>
    %252 = arith.divf %250, %251 : vector<8x16xf32>
    %253 = vector.extract_strided_slice %218 {offsets = [0, 16], sizes = [8, 16], strides = [1, 1]} : vector<8x48xf32> to vector<8x16xf32>
    %254 = vector.extract_strided_slice %216 {offsets = [0, 16], sizes = [8, 16], strides = [1, 1]} : vector<8x48xf32> to vector<8x16xf32>
    %255 = arith.addf %253, %254 : vector<8x16xf32>
    %256 = arith.negf %255 : vector<8x16xf32>
    %257 = math.exp %256 : vector<8x16xf32>
    %cst_56 = arith.constant 1.000000e+00 : f32
    %258 = vector.broadcast %cst_56 : f32 to vector<8x16xf32>
    %259 = arith.addf %258, %257 : vector<8x16xf32>
    %260 = arith.divf %258, %259 : vector<8x16xf32>
    %261 = vector.extract_strided_slice %218 {offsets = [0, 32], sizes = [8, 16], strides = [1, 1]} : vector<8x48xf32> to vector<8x16xf32>
    %262 = vector.extract_strided_slice %216 {offsets = [0, 32], sizes = [8, 16], strides = [1, 1]} : vector<8x48xf32> to vector<8x16xf32>
    %263 = arith.mulf %252, %262 : vector<8x16xf32>
    %264 = arith.addf %261, %263 : vector<8x16xf32>
    %265 = math.tanh %264 : vector<8x16xf32>
    %cst_57 = arith.constant 1.000000e+00 : f32
    %266 = vector.broadcast %cst_57 : f32 to vector<8x16xf32>
    %267 = arith.subf %266, %260 : vector<8x16xf32>
    %268 = arith.mulf %267, %265 : vector<8x16xf32>
    %269 = arith.mulf %260, %210 : vector<8x16xf32>
    %270 = arith.addf %268, %269 : vector<8x16xf32>
    %271 = tpu.concatenate %244, %270 in 1 : vector<8x16xf32>, vector<8x16xf32> -> vector<8x32xf32>
    %272 = arith.truncf %271 : vector<8x32xf32> to vector<8x32xbf16>
    %cst_58 = arith.constant dense<0.000000e+00> : vector<8x96xf32>
    %273 = tpu.matmul %272, %5, %cst_58 {dimension_numbers = #tpu.dot_dimension_numbers<[1], [1], [0], [0], [0, 0, 1, 0], [], []>} : vector<8x32xbf16>, vector<96x32xbf16>, vector<8x96xf32> -> vector<8x96xf32>
    %274 = arith.addf %273, %26 : vector<8x96xf32>
    %275 = vector.extract_strided_slice %274 {offsets = [0, 0], sizes = [8, 48], strides = [1, 1]} : vector<8x96xf32> to vector<8x48xf32>
    %276 = vector.extract_strided_slice %274 {offsets = [0, 48], sizes = [8, 48], strides = [1, 1]} : vector<8x96xf32> to vector<8x48xf32>
    %277 = vector.extract_strided_slice %28 {offsets = [32, 0], sizes = [8, 48], strides = [1, 1]} : vector<64x96xf32> to vector<8x48xf32>
    %278 = vector.extract_strided_slice %28 {offsets = [24, 48], sizes = [8, 48], strides = [1, 1]} : vector<64x96xf32> to vector<8x48xf32>
    %279 = vector.extract_strided_slice %277 {offsets = [0, 0], sizes = [8, 16], strides = [1, 1]} : vector<8x48xf32> to vector<8x16xf32>
    %280 = vector.extract_strided_slice %275 {offsets = [0, 0], sizes = [8, 16], strides = [1, 1]} : vector<8x48xf32> to vector<8x16xf32>
    %281 = arith.addf %279, %280 : vector<8x16xf32>
    %282 = arith.negf %281 : vector<8x16xf32>
    %283 = math.exp %282 : vector<8x16xf32>
    %cst_59 = arith.constant 1.000000e+00 : f32
    %284 = vector.broadcast %cst_59 : f32 to vector<8x16xf32>
    %285 = arith.addf %284, %283 : vector<8x16xf32>
    %286 = arith.divf %284, %285 : vector<8x16xf32>
    %287 = vector.extract_strided_slice %277 {offsets = [0, 16], sizes = [8, 16], strides = [1, 1]} : vector<8x48xf32> to vector<8x16xf32>
    %288 = vector.extract_strided_slice %275 {offsets = [0, 16], sizes = [8, 16], strides = [1, 1]} : vector<8x48xf32> to vector<8x16xf32>
    %289 = arith.addf %287, %288 : vector<8x16xf32>
    %290 = arith.negf %289 : vector<8x16xf32>
    %291 = math.exp %290 : vector<8x16xf32>
    %cst_60 = arith.constant 1.000000e+00 : f32
    %292 = vector.broadcast %cst_60 : f32 to vector<8x16xf32>
    %293 = arith.addf %292, %291 : vector<8x16xf32>
    %294 = arith.divf %292, %293 : vector<8x16xf32>
    %295 = vector.extract_strided_slice %277 {offsets = [0, 32], sizes = [8, 16], strides = [1, 1]} : vector<8x48xf32> to vector<8x16xf32>
    %296 = vector.extract_strided_slice %275 {offsets = [0, 32], sizes = [8, 16], strides = [1, 1]} : vector<8x48xf32> to vector<8x16xf32>
    %297 = arith.mulf %286, %296 : vector<8x16xf32>
    %298 = arith.addf %295, %297 : vector<8x16xf32>
    %299 = math.tanh %298 : vector<8x16xf32>
    %cst_61 = arith.constant 1.000000e+00 : f32
    %300 = vector.broadcast %cst_61 : f32 to vector<8x16xf32>
    %301 = arith.subf %300, %294 : vector<8x16xf32>
    %302 = arith.mulf %301, %299 : vector<8x16xf32>
    %303 = arith.mulf %294, %244 : vector<8x16xf32>
    %304 = arith.addf %302, %303 : vector<8x16xf32>
    %305 = vector.extract_strided_slice %278 {offsets = [0, 0], sizes = [8, 16], strides = [1, 1]} : vector<8x48xf32> to vector<8x16xf32>
    %306 = vector.extract_strided_slice %276 {offsets = [0, 0], sizes = [8, 16], strides = [1, 1]} : vector<8x48xf32> to vector<8x16xf32>
    %307 = arith.addf %305, %306 : vector<8x16xf32>
    %308 = arith.negf %307 : vector<8x16xf32>
    %309 = math.exp %308 : vector<8x16xf32>
    %cst_62 = arith.constant 1.000000e+00 : f32
    %310 = vector.broadcast %cst_62 : f32 to vector<8x16xf32>
    %311 = arith.addf %310, %309 : vector<8x16xf32>
    %312 = arith.divf %310, %311 : vector<8x16xf32>
    %313 = vector.extract_strided_slice %278 {offsets = [0, 16], sizes = [8, 16], strides = [1, 1]} : vector<8x48xf32> to vector<8x16xf32>
    %314 = vector.extract_strided_slice %276 {offsets = [0, 16], sizes = [8, 16], strides = [1, 1]} : vector<8x48xf32> to vector<8x16xf32>
    %315 = arith.addf %313, %314 : vector<8x16xf32>
    %316 = arith.negf %315 : vector<8x16xf32>
    %317 = math.exp %316 : vector<8x16xf32>
    %cst_63 = arith.constant 1.000000e+00 : f32
    %318 = vector.broadcast %cst_63 : f32 to vector<8x16xf32>
    %319 = arith.addf %318, %317 : vector<8x16xf32>
    %320 = arith.divf %318, %319 : vector<8x16xf32>
    %321 = vector.extract_strided_slice %278 {offsets = [0, 32], sizes = [8, 16], strides = [1, 1]} : vector<8x48xf32> to vector<8x16xf32>
    %322 = vector.extract_strided_slice %276 {offsets = [0, 32], sizes = [8, 16], strides = [1, 1]} : vector<8x48xf32> to vector<8x16xf32>
    %323 = arith.mulf %312, %322 : vector<8x16xf32>
    %324 = arith.addf %321, %323 : vector<8x16xf32>
    %325 = math.tanh %324 : vector<8x16xf32>
    %cst_64 = arith.constant 1.000000e+00 : f32
    %326 = vector.broadcast %cst_64 : f32 to vector<8x16xf32>
    %327 = arith.subf %326, %320 : vector<8x16xf32>
    %328 = arith.mulf %327, %325 : vector<8x16xf32>
    %329 = arith.mulf %320, %270 : vector<8x16xf32>
    %330 = arith.addf %328, %329 : vector<8x16xf32>
    %331 = tpu.concatenate %304, %330 in 1 : vector<8x16xf32>, vector<8x16xf32> -> vector<8x32xf32>
    %332 = arith.truncf %331 : vector<8x32xf32> to vector<8x32xbf16>
    %cst_65 = arith.constant dense<0.000000e+00> : vector<8x96xf32>
    %333 = tpu.matmul %332, %5, %cst_65 {dimension_numbers = #tpu.dot_dimension_numbers<[1], [1], [0], [0], [0, 0, 1, 0], [], []>} : vector<8x32xbf16>, vector<96x32xbf16>, vector<8x96xf32> -> vector<8x96xf32>
    %334 = arith.addf %333, %26 : vector<8x96xf32>
    %335 = vector.extract_strided_slice %334 {offsets = [0, 0], sizes = [8, 48], strides = [1, 1]} : vector<8x96xf32> to vector<8x48xf32>
    %336 = vector.extract_strided_slice %334 {offsets = [0, 48], sizes = [8, 48], strides = [1, 1]} : vector<8x96xf32> to vector<8x48xf32>
    %337 = vector.extract_strided_slice %28 {offsets = [40, 0], sizes = [8, 48], strides = [1, 1]} : vector<64x96xf32> to vector<8x48xf32>
    %338 = vector.extract_strided_slice %28 {offsets = [16, 48], sizes = [8, 48], strides = [1, 1]} : vector<64x96xf32> to vector<8x48xf32>
    %339 = vector.extract_strided_slice %337 {offsets = [0, 0], sizes = [8, 16], strides = [1, 1]} : vector<8x48xf32> to vector<8x16xf32>
    %340 = vector.extract_strided_slice %335 {offsets = [0, 0], sizes = [8, 16], strides = [1, 1]} : vector<8x48xf32> to vector<8x16xf32>
    %341 = arith.addf %339, %340 : vector<8x16xf32>
    %342 = arith.negf %341 : vector<8x16xf32>
    %343 = math.exp %342 : vector<8x16xf32>
    %cst_66 = arith.constant 1.000000e+00 : f32
    %344 = vector.broadcast %cst_66 : f32 to vector<8x16xf32>
    %345 = arith.addf %344, %343 : vector<8x16xf32>
    %346 = arith.divf %344, %345 : vector<8x16xf32>
    %347 = vector.extract_strided_slice %337 {offsets = [0, 16], sizes = [8, 16], strides = [1, 1]} : vector<8x48xf32> to vector<8x16xf32>
    %348 = vector.extract_strided_slice %335 {offsets = [0, 16], sizes = [8, 16], strides = [1, 1]} : vector<8x48xf32> to vector<8x16xf32>
    %349 = arith.addf %347, %348 : vector<8x16xf32>
    %350 = arith.negf %349 : vector<8x16xf32>
    %351 = math.exp %350 : vector<8x16xf32>
    %cst_67 = arith.constant 1.000000e+00 : f32
    %352 = vector.broadcast %cst_67 : f32 to vector<8x16xf32>
    %353 = arith.addf %352, %351 : vector<8x16xf32>
    %354 = arith.divf %352, %353 : vector<8x16xf32>
    %355 = vector.extract_strided_slice %337 {offsets = [0, 32], sizes = [8, 16], strides = [1, 1]} : vector<8x48xf32> to vector<8x16xf32>
    %356 = vector.extract_strided_slice %335 {offsets = [0, 32], sizes = [8, 16], strides = [1, 1]} : vector<8x48xf32> to vector<8x16xf32>
    %357 = arith.mulf %346, %356 : vector<8x16xf32>
    %358 = arith.addf %355, %357 : vector<8x16xf32>
    %359 = math.tanh %358 : vector<8x16xf32>
    %cst_68 = arith.constant 1.000000e+00 : f32
    %360 = vector.broadcast %cst_68 : f32 to vector<8x16xf32>
    %361 = arith.subf %360, %354 : vector<8x16xf32>
    %362 = arith.mulf %361, %359 : vector<8x16xf32>
    %363 = arith.mulf %354, %304 : vector<8x16xf32>
    %364 = arith.addf %362, %363 : vector<8x16xf32>
    %365 = vector.extract_strided_slice %338 {offsets = [0, 0], sizes = [8, 16], strides = [1, 1]} : vector<8x48xf32> to vector<8x16xf32>
    %366 = vector.extract_strided_slice %336 {offsets = [0, 0], sizes = [8, 16], strides = [1, 1]} : vector<8x48xf32> to vector<8x16xf32>
    %367 = arith.addf %365, %366 : vector<8x16xf32>
    %368 = arith.negf %367 : vector<8x16xf32>
    %369 = math.exp %368 : vector<8x16xf32>
    %cst_69 = arith.constant 1.000000e+00 : f32
    %370 = vector.broadcast %cst_69 : f32 to vector<8x16xf32>
    %371 = arith.addf %370, %369 : vector<8x16xf32>
    %372 = arith.divf %370, %371 : vector<8x16xf32>
    %373 = vector.extract_strided_slice %338 {offsets = [0, 16], sizes = [8, 16], strides = [1, 1]} : vector<8x48xf32> to vector<8x16xf32>
    %374 = vector.extract_strided_slice %336 {offsets = [0, 16], sizes = [8, 16], strides = [1, 1]} : vector<8x48xf32> to vector<8x16xf32>
    %375 = arith.addf %373, %374 : vector<8x16xf32>
    %376 = arith.negf %375 : vector<8x16xf32>
    %377 = math.exp %376 : vector<8x16xf32>
    %cst_70 = arith.constant 1.000000e+00 : f32
    %378 = vector.broadcast %cst_70 : f32 to vector<8x16xf32>
    %379 = arith.addf %378, %377 : vector<8x16xf32>
    %380 = arith.divf %378, %379 : vector<8x16xf32>
    %381 = vector.extract_strided_slice %338 {offsets = [0, 32], sizes = [8, 16], strides = [1, 1]} : vector<8x48xf32> to vector<8x16xf32>
    %382 = vector.extract_strided_slice %336 {offsets = [0, 32], sizes = [8, 16], strides = [1, 1]} : vector<8x48xf32> to vector<8x16xf32>
    %383 = arith.mulf %372, %382 : vector<8x16xf32>
    %384 = arith.addf %381, %383 : vector<8x16xf32>
    %385 = math.tanh %384 : vector<8x16xf32>
    %cst_71 = arith.constant 1.000000e+00 : f32
    %386 = vector.broadcast %cst_71 : f32 to vector<8x16xf32>
    %387 = arith.subf %386, %380 : vector<8x16xf32>
    %388 = arith.mulf %387, %385 : vector<8x16xf32>
    %389 = arith.mulf %380, %330 : vector<8x16xf32>
    %390 = arith.addf %388, %389 : vector<8x16xf32>
    %391 = tpu.concatenate %364, %390 in 1 : vector<8x16xf32>, vector<8x16xf32> -> vector<8x32xf32>
    %392 = arith.truncf %391 : vector<8x32xf32> to vector<8x32xbf16>
    %cst_72 = arith.constant dense<0.000000e+00> : vector<8x96xf32>
    %393 = tpu.matmul %392, %5, %cst_72 {dimension_numbers = #tpu.dot_dimension_numbers<[1], [1], [0], [0], [0, 0, 1, 0], [], []>} : vector<8x32xbf16>, vector<96x32xbf16>, vector<8x96xf32> -> vector<8x96xf32>
    %394 = arith.addf %393, %26 : vector<8x96xf32>
    %395 = vector.extract_strided_slice %394 {offsets = [0, 0], sizes = [8, 48], strides = [1, 1]} : vector<8x96xf32> to vector<8x48xf32>
    %396 = vector.extract_strided_slice %394 {offsets = [0, 48], sizes = [8, 48], strides = [1, 1]} : vector<8x96xf32> to vector<8x48xf32>
    %397 = vector.extract_strided_slice %28 {offsets = [48, 0], sizes = [8, 48], strides = [1, 1]} : vector<64x96xf32> to vector<8x48xf32>
    %398 = vector.extract_strided_slice %28 {offsets = [8, 48], sizes = [8, 48], strides = [1, 1]} : vector<64x96xf32> to vector<8x48xf32>
    %399 = vector.extract_strided_slice %397 {offsets = [0, 0], sizes = [8, 16], strides = [1, 1]} : vector<8x48xf32> to vector<8x16xf32>
    %400 = vector.extract_strided_slice %395 {offsets = [0, 0], sizes = [8, 16], strides = [1, 1]} : vector<8x48xf32> to vector<8x16xf32>
    %401 = arith.addf %399, %400 : vector<8x16xf32>
    %402 = arith.negf %401 : vector<8x16xf32>
    %403 = math.exp %402 : vector<8x16xf32>
    %cst_73 = arith.constant 1.000000e+00 : f32
    %404 = vector.broadcast %cst_73 : f32 to vector<8x16xf32>
    %405 = arith.addf %404, %403 : vector<8x16xf32>
    %406 = arith.divf %404, %405 : vector<8x16xf32>
    %407 = vector.extract_strided_slice %397 {offsets = [0, 16], sizes = [8, 16], strides = [1, 1]} : vector<8x48xf32> to vector<8x16xf32>
    %408 = vector.extract_strided_slice %395 {offsets = [0, 16], sizes = [8, 16], strides = [1, 1]} : vector<8x48xf32> to vector<8x16xf32>
    %409 = arith.addf %407, %408 : vector<8x16xf32>
    %410 = arith.negf %409 : vector<8x16xf32>
    %411 = math.exp %410 : vector<8x16xf32>
    %cst_74 = arith.constant 1.000000e+00 : f32
    %412 = vector.broadcast %cst_74 : f32 to vector<8x16xf32>
    %413 = arith.addf %412, %411 : vector<8x16xf32>
    %414 = arith.divf %412, %413 : vector<8x16xf32>
    %415 = vector.extract_strided_slice %397 {offsets = [0, 32], sizes = [8, 16], strides = [1, 1]} : vector<8x48xf32> to vector<8x16xf32>
    %416 = vector.extract_strided_slice %395 {offsets = [0, 32], sizes = [8, 16], strides = [1, 1]} : vector<8x48xf32> to vector<8x16xf32>
    %417 = arith.mulf %406, %416 : vector<8x16xf32>
    %418 = arith.addf %415, %417 : vector<8x16xf32>
    %419 = math.tanh %418 : vector<8x16xf32>
    %cst_75 = arith.constant 1.000000e+00 : f32
    %420 = vector.broadcast %cst_75 : f32 to vector<8x16xf32>
    %421 = arith.subf %420, %414 : vector<8x16xf32>
    %422 = arith.mulf %421, %419 : vector<8x16xf32>
    %423 = arith.mulf %414, %364 : vector<8x16xf32>
    %424 = arith.addf %422, %423 : vector<8x16xf32>
    %425 = vector.extract_strided_slice %398 {offsets = [0, 0], sizes = [8, 16], strides = [1, 1]} : vector<8x48xf32> to vector<8x16xf32>
    %426 = vector.extract_strided_slice %396 {offsets = [0, 0], sizes = [8, 16], strides = [1, 1]} : vector<8x48xf32> to vector<8x16xf32>
    %427 = arith.addf %425, %426 : vector<8x16xf32>
    %428 = arith.negf %427 : vector<8x16xf32>
    %429 = math.exp %428 : vector<8x16xf32>
    %cst_76 = arith.constant 1.000000e+00 : f32
    %430 = vector.broadcast %cst_76 : f32 to vector<8x16xf32>
    %431 = arith.addf %430, %429 : vector<8x16xf32>
    %432 = arith.divf %430, %431 : vector<8x16xf32>
    %433 = vector.extract_strided_slice %398 {offsets = [0, 16], sizes = [8, 16], strides = [1, 1]} : vector<8x48xf32> to vector<8x16xf32>
    %434 = vector.extract_strided_slice %396 {offsets = [0, 16], sizes = [8, 16], strides = [1, 1]} : vector<8x48xf32> to vector<8x16xf32>
    %435 = arith.addf %433, %434 : vector<8x16xf32>
    %436 = arith.negf %435 : vector<8x16xf32>
    %437 = math.exp %436 : vector<8x16xf32>
    %cst_77 = arith.constant 1.000000e+00 : f32
    %438 = vector.broadcast %cst_77 : f32 to vector<8x16xf32>
    %439 = arith.addf %438, %437 : vector<8x16xf32>
    %440 = arith.divf %438, %439 : vector<8x16xf32>
    %441 = vector.extract_strided_slice %398 {offsets = [0, 32], sizes = [8, 16], strides = [1, 1]} : vector<8x48xf32> to vector<8x16xf32>
    %442 = vector.extract_strided_slice %396 {offsets = [0, 32], sizes = [8, 16], strides = [1, 1]} : vector<8x48xf32> to vector<8x16xf32>
    %443 = arith.mulf %432, %442 : vector<8x16xf32>
    %444 = arith.addf %441, %443 : vector<8x16xf32>
    %445 = math.tanh %444 : vector<8x16xf32>
    %cst_78 = arith.constant 1.000000e+00 : f32
    %446 = vector.broadcast %cst_78 : f32 to vector<8x16xf32>
    %447 = arith.subf %446, %440 : vector<8x16xf32>
    %448 = arith.mulf %447, %445 : vector<8x16xf32>
    %449 = arith.mulf %440, %390 : vector<8x16xf32>
    %450 = arith.addf %448, %449 : vector<8x16xf32>
    %451 = tpu.concatenate %424, %450 in 1 : vector<8x16xf32>, vector<8x16xf32> -> vector<8x32xf32>
    %452 = arith.truncf %451 : vector<8x32xf32> to vector<8x32xbf16>
    %cst_79 = arith.constant dense<0.000000e+00> : vector<8x96xf32>
    %453 = tpu.matmul %452, %5, %cst_79 {dimension_numbers = #tpu.dot_dimension_numbers<[1], [1], [0], [0], [0, 0, 1, 0], [], []>} : vector<8x32xbf16>, vector<96x32xbf16>, vector<8x96xf32> -> vector<8x96xf32>
    %454 = arith.addf %453, %26 : vector<8x96xf32>
    %455 = vector.extract_strided_slice %454 {offsets = [0, 0], sizes = [8, 48], strides = [1, 1]} : vector<8x96xf32> to vector<8x48xf32>
    %456 = vector.extract_strided_slice %454 {offsets = [0, 48], sizes = [8, 48], strides = [1, 1]} : vector<8x96xf32> to vector<8x48xf32>
    %457 = vector.extract_strided_slice %28 {offsets = [56, 0], sizes = [8, 48], strides = [1, 1]} : vector<64x96xf32> to vector<8x48xf32>
    %458 = vector.extract_strided_slice %28 {offsets = [0, 48], sizes = [8, 48], strides = [1, 1]} : vector<64x96xf32> to vector<8x48xf32>
    %459 = vector.extract_strided_slice %457 {offsets = [0, 0], sizes = [8, 16], strides = [1, 1]} : vector<8x48xf32> to vector<8x16xf32>
    %460 = vector.extract_strided_slice %455 {offsets = [0, 0], sizes = [8, 16], strides = [1, 1]} : vector<8x48xf32> to vector<8x16xf32>
    %461 = arith.addf %459, %460 : vector<8x16xf32>
    %462 = arith.negf %461 : vector<8x16xf32>
    %463 = math.exp %462 : vector<8x16xf32>
    %cst_80 = arith.constant 1.000000e+00 : f32
    %464 = vector.broadcast %cst_80 : f32 to vector<8x16xf32>
    %465 = arith.addf %464, %463 : vector<8x16xf32>
    %466 = arith.divf %464, %465 : vector<8x16xf32>
    %467 = vector.extract_strided_slice %457 {offsets = [0, 16], sizes = [8, 16], strides = [1, 1]} : vector<8x48xf32> to vector<8x16xf32>
    %468 = vector.extract_strided_slice %455 {offsets = [0, 16], sizes = [8, 16], strides = [1, 1]} : vector<8x48xf32> to vector<8x16xf32>
    %469 = arith.addf %467, %468 : vector<8x16xf32>
    %470 = arith.negf %469 : vector<8x16xf32>
    %471 = math.exp %470 : vector<8x16xf32>
    %cst_81 = arith.constant 1.000000e+00 : f32
    %472 = vector.broadcast %cst_81 : f32 to vector<8x16xf32>
    %473 = arith.addf %472, %471 : vector<8x16xf32>
    %474 = arith.divf %472, %473 : vector<8x16xf32>
    %475 = vector.extract_strided_slice %457 {offsets = [0, 32], sizes = [8, 16], strides = [1, 1]} : vector<8x48xf32> to vector<8x16xf32>
    %476 = vector.extract_strided_slice %455 {offsets = [0, 32], sizes = [8, 16], strides = [1, 1]} : vector<8x48xf32> to vector<8x16xf32>
    %477 = arith.mulf %466, %476 : vector<8x16xf32>
    %478 = arith.addf %475, %477 : vector<8x16xf32>
    %479 = math.tanh %478 : vector<8x16xf32>
    %cst_82 = arith.constant 1.000000e+00 : f32
    %480 = vector.broadcast %cst_82 : f32 to vector<8x16xf32>
    %481 = arith.subf %480, %474 : vector<8x16xf32>
    %482 = arith.mulf %481, %479 : vector<8x16xf32>
    %483 = arith.mulf %474, %424 : vector<8x16xf32>
    %484 = arith.addf %482, %483 : vector<8x16xf32>
    %485 = vector.extract_strided_slice %458 {offsets = [0, 0], sizes = [8, 16], strides = [1, 1]} : vector<8x48xf32> to vector<8x16xf32>
    %486 = vector.extract_strided_slice %456 {offsets = [0, 0], sizes = [8, 16], strides = [1, 1]} : vector<8x48xf32> to vector<8x16xf32>
    %487 = arith.addf %485, %486 : vector<8x16xf32>
    %488 = arith.negf %487 : vector<8x16xf32>
    %489 = math.exp %488 : vector<8x16xf32>
    %cst_83 = arith.constant 1.000000e+00 : f32
    %490 = vector.broadcast %cst_83 : f32 to vector<8x16xf32>
    %491 = arith.addf %490, %489 : vector<8x16xf32>
    %492 = arith.divf %490, %491 : vector<8x16xf32>
    %493 = vector.extract_strided_slice %458 {offsets = [0, 16], sizes = [8, 16], strides = [1, 1]} : vector<8x48xf32> to vector<8x16xf32>
    %494 = vector.extract_strided_slice %456 {offsets = [0, 16], sizes = [8, 16], strides = [1, 1]} : vector<8x48xf32> to vector<8x16xf32>
    %495 = arith.addf %493, %494 : vector<8x16xf32>
    %496 = arith.negf %495 : vector<8x16xf32>
    %497 = math.exp %496 : vector<8x16xf32>
    %cst_84 = arith.constant 1.000000e+00 : f32
    %498 = vector.broadcast %cst_84 : f32 to vector<8x16xf32>
    %499 = arith.addf %498, %497 : vector<8x16xf32>
    %500 = arith.divf %498, %499 : vector<8x16xf32>
    %501 = vector.extract_strided_slice %458 {offsets = [0, 32], sizes = [8, 16], strides = [1, 1]} : vector<8x48xf32> to vector<8x16xf32>
    %502 = vector.extract_strided_slice %456 {offsets = [0, 32], sizes = [8, 16], strides = [1, 1]} : vector<8x48xf32> to vector<8x16xf32>
    %503 = arith.mulf %492, %502 : vector<8x16xf32>
    %504 = arith.addf %501, %503 : vector<8x16xf32>
    %505 = math.tanh %504 : vector<8x16xf32>
    %cst_85 = arith.constant 1.000000e+00 : f32
    %506 = vector.broadcast %cst_85 : f32 to vector<8x16xf32>
    %507 = arith.subf %506, %500 : vector<8x16xf32>
    %508 = arith.mulf %507, %505 : vector<8x16xf32>
    %509 = arith.mulf %500, %450 : vector<8x16xf32>
    %510 = arith.addf %508, %509 : vector<8x16xf32>
    %511 = tpu.concatenate %64, %510 in 1 : vector<8x16xf32>, vector<8x16xf32> -> vector<8x32xf32>
    %512 = tpu.concatenate %124, %450 in 1 : vector<8x16xf32>, vector<8x16xf32> -> vector<8x32xf32>
    %513 = tpu.concatenate %184, %390 in 1 : vector<8x16xf32>, vector<8x16xf32> -> vector<8x32xf32>
    %514 = tpu.concatenate %244, %330 in 1 : vector<8x16xf32>, vector<8x16xf32> -> vector<8x32xf32>
    %515 = tpu.concatenate %304, %270 in 1 : vector<8x16xf32>, vector<8x16xf32> -> vector<8x32xf32>
    %516 = tpu.concatenate %364, %210 in 1 : vector<8x16xf32>, vector<8x16xf32> -> vector<8x32xf32>
    %517 = tpu.concatenate %424, %150 in 1 : vector<8x16xf32>, vector<8x16xf32> -> vector<8x32xf32>
    %518 = tpu.concatenate %484, %90 in 1 : vector<8x16xf32>, vector<8x16xf32> -> vector<8x32xf32>
    %519 = tpu.concatenate %511, %512, %513, %514, %515, %516, %517, %518 in 0 : vector<8x32xf32>, vector<8x32xf32>, vector<8x32xf32>, vector<8x32xf32>, vector<8x32xf32>, vector<8x32xf32>, vector<8x32xf32>, vector<8x32xf32> -> vector<64x32xf32>
    %cst_86 = arith.constant dense<0.000000e+00> : vector<64xf32>
    %520 = vector.multi_reduction <add>, %519, %cst_86 [1] : vector<64x32xf32> to vector<64xf32>
    %521 = vector.shape_cast %520 : vector<64xf32> to vector<64x1xf32>
    %cst_87 = arith.constant 3.200000e+01 : f32
    %522 = vector.broadcast %cst_87 : f32 to vector<64x1xf32>
    %523 = arith.divf %521, %522 : vector<64x1xf32>
    %524 = vector.broadcast %523 : vector<64x1xf32> to vector<64x32xf32>
    %525 = arith.subf %519, %524 : vector<64x32xf32>
    %526 = arith.mulf %525, %525 : vector<64x32xf32>
    %cst_88 = arith.constant dense<0.000000e+00> : vector<64xf32>
    %527 = vector.multi_reduction <add>, %526, %cst_88 [1] : vector<64x32xf32> to vector<64xf32>
    %528 = vector.shape_cast %527 : vector<64xf32> to vector<64x1xf32>
    %cst_89 = arith.constant 3.200000e+01 : f32
    %529 = vector.broadcast %cst_89 : f32 to vector<64x1xf32>
    %530 = arith.divf %528, %529 : vector<64x1xf32>
    %cst_90 = arith.constant 9.99999974E-6 : f32
    %531 = vector.broadcast %cst_90 : f32 to vector<64x1xf32>
    %532 = arith.addf %530, %531 : vector<64x1xf32>
    %533 = math.rsqrt %532 : vector<64x1xf32>
    %534 = vector.broadcast %533 : vector<64x1xf32> to vector<64x32xf32>
    %535 = arith.mulf %525, %534 : vector<64x32xf32>
    %536 = vector.broadcast %8 : vector<1x32xf32> to vector<64x32xf32>
    %537 = arith.mulf %535, %536 : vector<64x32xf32>
    %538 = vector.broadcast %9 : vector<1x32xf32> to vector<64x32xf32>
    %539 = arith.addf %537, %538 : vector<64x32xf32>
    %540 = arith.truncf %539 : vector<64x32xf32> to vector<64x32xbf16>
    %cst_91 = arith.constant dense<0.000000e+00> : vector<64x2xf32>
    %541 = tpu.matmul %540, %10, %cst_91 {dimension_numbers = #tpu.dot_dimension_numbers<[1], [1], [0], [0], [0, 0, 1, 0], [], []>} : vector<64x32xbf16>, vector<2x32xbf16>, vector<64x2xf32> -> vector<64x2xf32>
    %542 = vector.broadcast %11 : vector<1x2xf32> to vector<64x2xf32>
    %543 = arith.addf %541, %542 : vector<64x2xf32>
    %544 = arith.addf %543, %2 : vector<64x2xf32>
    %545 = vector.extract_strided_slice %544 {offsets = [0, 0], sizes = [64, 1], strides = [1, 1]} : vector<64x2xf32> to vector<64x1xf32>
    %546 = vector.extract_strided_slice %544 {offsets = [0, 1], sizes = [64, 1], strides = [1, 1]} : vector<64x2xf32> to vector<64x1xf32>
    %547 = arith.cmpf oge, %545, %546 : vector<64x1xf32>
    %548 = arith.extui %547 : vector<64x1xi1> to vector<64x1xi32>
    %549 = arith.sitofp %548 : vector<64x1xi32> to vector<64x1xf32>
    %cst_92 = arith.constant 1.000000e+00 : f32
    %550 = vector.broadcast %cst_92 : f32 to vector<64x1xf32>
    %551 = arith.subf %550, %549 : vector<64x1xf32>
    %552 = tpu.concatenate %549, %551 in 1 : vector<64x1xf32>, vector<64x1xf32> -> vector<64x2xf32>
    %c0_93 = arith.constant 0 : index
    %c0_94 = arith.constant 0 : index
    %553 = vector.load %arg14[%c0_93, %c0_94] : memref<64x2xf32, #tpu.memory_space<vmem>>, vector<64x2xf32>
    tpu.vector_store %arg14[%c0_93, %c0_94], %552 {strides = array<i32>} : memref<64x2xf32, #tpu.memory_space<vmem>>, vector<64x2xf32>,
    %554 = vector.extract_strided_slice %552 {offsets = [0, 1], sizes = [64, 1], strides = [1, 1]} : vector<64x2xf32> to vector<64x1xf32>
    %555 = vector.broadcast %554 : vector<64x1xf32> to vector<64x96xf32>
    %556 = arith.mulf %555, %24 : vector<64x96xf32>
    %557 = vector.broadcast %6 : vector<1x96xf32> to vector<64x96xf32>
    %558 = arith.addf %556, %557 : vector<64x96xf32>
    %cst_95 = arith.constant 0.000000e+00 : f32
    %559 = vector.broadcast %cst_95 : f32 to vector<8x16xf32>
    %cst_96 = arith.constant 0.000000e+00 : f32
    %560 = vector.broadcast %cst_96 : f32 to vector<8x16xf32>
    %561 = tpu.concatenate %559, %560 in 1 : vector<8x16xf32>, vector<8x16xf32> -> vector<8x32xf32>
    %562 = arith.truncf %561 : vector<8x32xf32> to vector<8x32xbf16>
    %cst_97 = arith.constant dense<0.000000e+00> : vector<8x96xf32>
    %563 = tpu.matmul %562, %5, %cst_97 {dimension_numbers = #tpu.dot_dimension_numbers<[1], [1], [0], [0], [0, 0, 1, 0], [], []>} : vector<8x32xbf16>, vector<96x32xbf16>, vector<8x96xf32> -> vector<8x96xf32>
    %564 = arith.addf %563, %26 : vector<8x96xf32>
    %565 = vector.extract_strided_slice %564 {offsets = [0, 0], sizes = [8, 48], strides = [1, 1]} : vector<8x96xf32> to vector<8x48xf32>
    %566 = vector.extract_strided_slice %564 {offsets = [0, 48], sizes = [8, 48], strides = [1, 1]} : vector<8x96xf32> to vector<8x48xf32>
    %567 = vector.extract_strided_slice %558 {offsets = [0, 0], sizes = [8, 48], strides = [1, 1]} : vector<64x96xf32> to vector<8x48xf32>
    %568 = vector.extract_strided_slice %558 {offsets = [56, 48], sizes = [8, 48], strides = [1, 1]} : vector<64x96xf32> to vector<8x48xf32>
    %569 = vector.extract_strided_slice %567 {offsets = [0, 0], sizes = [8, 16], strides = [1, 1]} : vector<8x48xf32> to vector<8x16xf32>
    %570 = vector.extract_strided_slice %565 {offsets = [0, 0], sizes = [8, 16], strides = [1, 1]} : vector<8x48xf32> to vector<8x16xf32>
    %571 = arith.addf %569, %570 : vector<8x16xf32>
    %572 = arith.negf %571 : vector<8x16xf32>
    %573 = math.exp %572 : vector<8x16xf32>
    %cst_98 = arith.constant 1.000000e+00 : f32
    %574 = vector.broadcast %cst_98 : f32 to vector<8x16xf32>
    %575 = arith.addf %574, %573 : vector<8x16xf32>
    %576 = arith.divf %574, %575 : vector<8x16xf32>
    %577 = vector.extract_strided_slice %567 {offsets = [0, 16], sizes = [8, 16], strides = [1, 1]} : vector<8x48xf32> to vector<8x16xf32>
    %578 = vector.extract_strided_slice %565 {offsets = [0, 16], sizes = [8, 16], strides = [1, 1]} : vector<8x48xf32> to vector<8x16xf32>
    %579 = arith.addf %577, %578 : vector<8x16xf32>
    %580 = arith.negf %579 : vector<8x16xf32>
    %581 = math.exp %580 : vector<8x16xf32>
    %cst_99 = arith.constant 1.000000e+00 : f32
    %582 = vector.broadcast %cst_99 : f32 to vector<8x16xf32>
    %583 = arith.addf %582, %581 : vector<8x16xf32>
    %584 = arith.divf %582, %583 : vector<8x16xf32>
    %585 = vector.extract_strided_slice %567 {offsets = [0, 32], sizes = [8, 16], strides = [1, 1]} : vector<8x48xf32> to vector<8x16xf32>
    %586 = vector.extract_strided_slice %565 {offsets = [0, 32], sizes = [8, 16], strides = [1, 1]} : vector<8x48xf32> to vector<8x16xf32>
    %587 = arith.mulf %576, %586 : vector<8x16xf32>
    %588 = arith.addf %585, %587 : vector<8x16xf32>
    %589 = math.tanh %588 : vector<8x16xf32>
    %cst_100 = arith.constant 1.000000e+00 : f32
    %590 = vector.broadcast %cst_100 : f32 to vector<8x16xf32>
    %591 = arith.subf %590, %584 : vector<8x16xf32>
    %592 = arith.mulf %591, %589 : vector<8x16xf32>
    %593 = arith.mulf %584, %559 : vector<8x16xf32>
    %594 = arith.addf %592, %593 : vector<8x16xf32>
    %595 = vector.extract_strided_slice %568 {offsets = [0, 0], sizes = [8, 16], strides = [1, 1]} : vector<8x48xf32> to vector<8x16xf32>
    %596 = vector.extract_strided_slice %566 {offsets = [0, 0], sizes = [8, 16], strides = [1, 1]} : vector<8x48xf32> to vector<8x16xf32>
    %597 = arith.addf %595, %596 : vector<8x16xf32>
    %598 = arith.negf %597 : vector<8x16xf32>
    %599 = math.exp %598 : vector<8x16xf32>
    %cst_101 = arith.constant 1.000000e+00 : f32
    %600 = vector.broadcast %cst_101 : f32 to vector<8x16xf32>
    %601 = arith.addf %600, %599 : vector<8x16xf32>
    %602 = arith.divf %600, %601 : vector<8x16xf32>
    %603 = vector.extract_strided_slice %568 {offsets = [0, 16], sizes = [8, 16], strides = [1, 1]} : vector<8x48xf32> to vector<8x16xf32>
    %604 = vector.extract_strided_slice %566 {offsets = [0, 16], sizes = [8, 16], strides = [1, 1]} : vector<8x48xf32> to vector<8x16xf32>
    %605 = arith.addf %603, %604 : vector<8x16xf32>
    %606 = arith.negf %605 : vector<8x16xf32>
    %607 = math.exp %606 : vector<8x16xf32>
    %cst_102 = arith.constant 1.000000e+00 : f32
    %608 = vector.broadcast %cst_102 : f32 to vector<8x16xf32>
    %609 = arith.addf %608, %607 : vector<8x16xf32>
    %610 = arith.divf %608, %609 : vector<8x16xf32>
    %611 = vector.extract_strided_slice %568 {offsets = [0, 32], sizes = [8, 16], strides = [1, 1]} : vector<8x48xf32> to vector<8x16xf32>
    %612 = vector.extract_strided_slice %566 {offsets = [0, 32], sizes = [8, 16], strides = [1, 1]} : vector<8x48xf32> to vector<8x16xf32>
    %613 = arith.mulf %602, %612 : vector<8x16xf32>
    %614 = arith.addf %611, %613 : vector<8x16xf32>
    %615 = math.tanh %614 : vector<8x16xf32>
    %cst_103 = arith.constant 1.000000e+00 : f32
    %616 = vector.broadcast %cst_103 : f32 to vector<8x16xf32>
    %617 = arith.subf %616, %610 : vector<8x16xf32>
    %618 = arith.mulf %617, %615 : vector<8x16xf32>
    %619 = arith.mulf %610, %560 : vector<8x16xf32>
    %620 = arith.addf %618, %619 : vector<8x16xf32>
    %621 = tpu.concatenate %594, %620 in 1 : vector<8x16xf32>, vector<8x16xf32> -> vector<8x32xf32>
    %622 = arith.truncf %621 : vector<8x32xf32> to vector<8x32xbf16>
    %cst_104 = arith.constant dense<0.000000e+00> : vector<8x96xf32>
    %623 = tpu.matmul %622, %5, %cst_104 {dimension_numbers = #tpu.dot_dimension_numbers<[1], [1], [0], [0], [0, 0, 1, 0], [], []>} : vector<8x32xbf16>, vector<96x32xbf16>, vector<8x96xf32> -> vector<8x96xf32>
    %624 = arith.addf %623, %26 : vector<8x96xf32>
    %625 = vector.extract_strided_slice %624 {offsets = [0, 0], sizes = [8, 48], strides = [1, 1]} : vector<8x96xf32> to vector<8x48xf32>
    %626 = vector.extract_strided_slice %624 {offsets = [0, 48], sizes = [8, 48], strides = [1, 1]} : vector<8x96xf32> to vector<8x48xf32>
    %627 = vector.extract_strided_slice %558 {offsets = [8, 0], sizes = [8, 48], strides = [1, 1]} : vector<64x96xf32> to vector<8x48xf32>
    %628 = vector.extract_strided_slice %558 {offsets = [48, 48], sizes = [8, 48], strides = [1, 1]} : vector<64x96xf32> to vector<8x48xf32>
    %629 = vector.extract_strided_slice %627 {offsets = [0, 0], sizes = [8, 16], strides = [1, 1]} : vector<8x48xf32> to vector<8x16xf32>
    %630 = vector.extract_strided_slice %625 {offsets = [0, 0], sizes = [8, 16], strides = [1, 1]} : vector<8x48xf32> to vector<8x16xf32>
    %631 = arith.addf %629, %630 : vector<8x16xf32>
    %632 = arith.negf %631 : vector<8x16xf32>
    %633 = math.exp %632 : vector<8x16xf32>
    %cst_105 = arith.constant 1.000000e+00 : f32
    %634 = vector.broadcast %cst_105 : f32 to vector<8x16xf32>
    %635 = arith.addf %634, %633 : vector<8x16xf32>
    %636 = arith.divf %634, %635 : vector<8x16xf32>
    %637 = vector.extract_strided_slice %627 {offsets = [0, 16], sizes = [8, 16], strides = [1, 1]} : vector<8x48xf32> to vector<8x16xf32>
    %638 = vector.extract_strided_slice %625 {offsets = [0, 16], sizes = [8, 16], strides = [1, 1]} : vector<8x48xf32> to vector<8x16xf32>
    %639 = arith.addf %637, %638 : vector<8x16xf32>
    %640 = arith.negf %639 : vector<8x16xf32>
    %641 = math.exp %640 : vector<8x16xf32>
    %cst_106 = arith.constant 1.000000e+00 : f32
    %642 = vector.broadcast %cst_106 : f32 to vector<8x16xf32>
    %643 = arith.addf %642, %641 : vector<8x16xf32>
    %644 = arith.divf %642, %643 : vector<8x16xf32>
    %645 = vector.extract_strided_slice %627 {offsets = [0, 32], sizes = [8, 16], strides = [1, 1]} : vector<8x48xf32> to vector<8x16xf32>
    %646 = vector.extract_strided_slice %625 {offsets = [0, 32], sizes = [8, 16], strides = [1, 1]} : vector<8x48xf32> to vector<8x16xf32>
    %647 = arith.mulf %636, %646 : vector<8x16xf32>
    %648 = arith.addf %645, %647 : vector<8x16xf32>
    %649 = math.tanh %648 : vector<8x16xf32>
    %cst_107 = arith.constant 1.000000e+00 : f32
    %650 = vector.broadcast %cst_107 : f32 to vector<8x16xf32>
    %651 = arith.subf %650, %644 : vector<8x16xf32>
    %652 = arith.mulf %651, %649 : vector<8x16xf32>
    %653 = arith.mulf %644, %594 : vector<8x16xf32>
    %654 = arith.addf %652, %653 : vector<8x16xf32>
    %655 = vector.extract_strided_slice %628 {offsets = [0, 0], sizes = [8, 16], strides = [1, 1]} : vector<8x48xf32> to vector<8x16xf32>
    %656 = vector.extract_strided_slice %626 {offsets = [0, 0], sizes = [8, 16], strides = [1, 1]} : vector<8x48xf32> to vector<8x16xf32>
    %657 = arith.addf %655, %656 : vector<8x16xf32>
    %658 = arith.negf %657 : vector<8x16xf32>
    %659 = math.exp %658 : vector<8x16xf32>
    %cst_108 = arith.constant 1.000000e+00 : f32
    %660 = vector.broadcast %cst_108 : f32 to vector<8x16xf32>
    %661 = arith.addf %660, %659 : vector<8x16xf32>
    %662 = arith.divf %660, %661 : vector<8x16xf32>
    %663 = vector.extract_strided_slice %628 {offsets = [0, 16], sizes = [8, 16], strides = [1, 1]} : vector<8x48xf32> to vector<8x16xf32>
    %664 = vector.extract_strided_slice %626 {offsets = [0, 16], sizes = [8, 16], strides = [1, 1]} : vector<8x48xf32> to vector<8x16xf32>
    %665 = arith.addf %663, %664 : vector<8x16xf32>
    %666 = arith.negf %665 : vector<8x16xf32>
    %667 = math.exp %666 : vector<8x16xf32>
    %cst_109 = arith.constant 1.000000e+00 : f32
    %668 = vector.broadcast %cst_109 : f32 to vector<8x16xf32>
    %669 = arith.addf %668, %667 : vector<8x16xf32>
    %670 = arith.divf %668, %669 : vector<8x16xf32>
    %671 = vector.extract_strided_slice %628 {offsets = [0, 32], sizes = [8, 16], strides = [1, 1]} : vector<8x48xf32> to vector<8x16xf32>
    %672 = vector.extract_strided_slice %626 {offsets = [0, 32], sizes = [8, 16], strides = [1, 1]} : vector<8x48xf32> to vector<8x16xf32>
    %673 = arith.mulf %662, %672 : vector<8x16xf32>
    %674 = arith.addf %671, %673 : vector<8x16xf32>
    %675 = math.tanh %674 : vector<8x16xf32>
    %cst_110 = arith.constant 1.000000e+00 : f32
    %676 = vector.broadcast %cst_110 : f32 to vector<8x16xf32>
    %677 = arith.subf %676, %670 : vector<8x16xf32>
    %678 = arith.mulf %677, %675 : vector<8x16xf32>
    %679 = arith.mulf %670, %620 : vector<8x16xf32>
    %680 = arith.addf %678, %679 : vector<8x16xf32>
    %681 = tpu.concatenate %654, %680 in 1 : vector<8x16xf32>, vector<8x16xf32> -> vector<8x32xf32>
    %682 = arith.truncf %681 : vector<8x32xf32> to vector<8x32xbf16>
    %cst_111 = arith.constant dense<0.000000e+00> : vector<8x96xf32>
    %683 = tpu.matmul %682, %5, %cst_111 {dimension_numbers = #tpu.dot_dimension_numbers<[1], [1], [0], [0], [0, 0, 1, 0], [], []>} : vector<8x32xbf16>, vector<96x32xbf16>, vector<8x96xf32> -> vector<8x96xf32>
    %684 = arith.addf %683, %26 : vector<8x96xf32>
    %685 = vector.extract_strided_slice %684 {offsets = [0, 0], sizes = [8, 48], strides = [1, 1]} : vector<8x96xf32> to vector<8x48xf32>
    %686 = vector.extract_strided_slice %684 {offsets = [0, 48], sizes = [8, 48], strides = [1, 1]} : vector<8x96xf32> to vector<8x48xf32>
    %687 = vector.extract_strided_slice %558 {offsets = [16, 0], sizes = [8, 48], strides = [1, 1]} : vector<64x96xf32> to vector<8x48xf32>
    %688 = vector.extract_strided_slice %558 {offsets = [40, 48], sizes = [8, 48], strides = [1, 1]} : vector<64x96xf32> to vector<8x48xf32>
    %689 = vector.extract_strided_slice %687 {offsets = [0, 0], sizes = [8, 16], strides = [1, 1]} : vector<8x48xf32> to vector<8x16xf32>
    %690 = vector.extract_strided_slice %685 {offsets = [0, 0], sizes = [8, 16], strides = [1, 1]} : vector<8x48xf32> to vector<8x16xf32>
    %691 = arith.addf %689, %690 : vector<8x16xf32>
    %692 = arith.negf %691 : vector<8x16xf32>
    %693 = math.exp %692 : vector<8x16xf32>
    %cst_112 = arith.constant 1.000000e+00 : f32
    %694 = vector.broadcast %cst_112 : f32 to vector<8x16xf32>
    %695 = arith.addf %694, %693 : vector<8x16xf32>
    %696 = arith.divf %694, %695 : vector<8x16xf32>
    %697 = vector.extract_strided_slice %687 {offsets = [0, 16], sizes = [8, 16], strides = [1, 1]} : vector<8x48xf32> to vector<8x16xf32>
    %698 = vector.extract_strided_slice %685 {offsets = [0, 16], sizes = [8, 16], strides = [1, 1]} : vector<8x48xf32> to vector<8x16xf32>
    %699 = arith.addf %697, %698 : vector<8x16xf32>
    %700 = arith.negf %699 : vector<8x16xf32>
    %701 = math.exp %700 : vector<8x16xf32>
    %cst_113 = arith.constant 1.000000e+00 : f32
    %702 = vector.broadcast %cst_113 : f32 to vector<8x16xf32>
    %703 = arith.addf %702, %701 : vector<8x16xf32>
    %704 = arith.divf %702, %703 : vector<8x16xf32>
    %705 = vector.extract_strided_slice %687 {offsets = [0, 32], sizes = [8, 16], strides = [1, 1]} : vector<8x48xf32> to vector<8x16xf32>
    %706 = vector.extract_strided_slice %685 {offsets = [0, 32], sizes = [8, 16], strides = [1, 1]} : vector<8x48xf32> to vector<8x16xf32>
    %707 = arith.mulf %696, %706 : vector<8x16xf32>
    %708 = arith.addf %705, %707 : vector<8x16xf32>
    %709 = math.tanh %708 : vector<8x16xf32>
    %cst_114 = arith.constant 1.000000e+00 : f32
    %710 = vector.broadcast %cst_114 : f32 to vector<8x16xf32>
    %711 = arith.subf %710, %704 : vector<8x16xf32>
    %712 = arith.mulf %711, %709 : vector<8x16xf32>
    %713 = arith.mulf %704, %654 : vector<8x16xf32>
    %714 = arith.addf %712, %713 : vector<8x16xf32>
    %715 = vector.extract_strided_slice %688 {offsets = [0, 0], sizes = [8, 16], strides = [1, 1]} : vector<8x48xf32> to vector<8x16xf32>
    %716 = vector.extract_strided_slice %686 {offsets = [0, 0], sizes = [8, 16], strides = [1, 1]} : vector<8x48xf32> to vector<8x16xf32>
    %717 = arith.addf %715, %716 : vector<8x16xf32>
    %718 = arith.negf %717 : vector<8x16xf32>
    %719 = math.exp %718 : vector<8x16xf32>
    %cst_115 = arith.constant 1.000000e+00 : f32
    %720 = vector.broadcast %cst_115 : f32 to vector<8x16xf32>
    %721 = arith.addf %720, %719 : vector<8x16xf32>
    %722 = arith.divf %720, %721 : vector<8x16xf32>
    %723 = vector.extract_strided_slice %688 {offsets = [0, 16], sizes = [8, 16], strides = [1, 1]} : vector<8x48xf32> to vector<8x16xf32>
    %724 = vector.extract_strided_slice %686 {offsets = [0, 16], sizes = [8, 16], strides = [1, 1]} : vector<8x48xf32> to vector<8x16xf32>
    %725 = arith.addf %723, %724 : vector<8x16xf32>
    %726 = arith.negf %725 : vector<8x16xf32>
    %727 = math.exp %726 : vector<8x16xf32>
    %cst_116 = arith.constant 1.000000e+00 : f32
    %728 = vector.broadcast %cst_116 : f32 to vector<8x16xf32>
    %729 = arith.addf %728, %727 : vector<8x16xf32>
    %730 = arith.divf %728, %729 : vector<8x16xf32>
    %731 = vector.extract_strided_slice %688 {offsets = [0, 32], sizes = [8, 16], strides = [1, 1]} : vector<8x48xf32> to vector<8x16xf32>
    %732 = vector.extract_strided_slice %686 {offsets = [0, 32], sizes = [8, 16], strides = [1, 1]} : vector<8x48xf32> to vector<8x16xf32>
    %733 = arith.mulf %722, %732 : vector<8x16xf32>
    %734 = arith.addf %731, %733 : vector<8x16xf32>
    %735 = math.tanh %734 : vector<8x16xf32>
    %cst_117 = arith.constant 1.000000e+00 : f32
    %736 = vector.broadcast %cst_117 : f32 to vector<8x16xf32>
    %737 = arith.subf %736, %730 : vector<8x16xf32>
    %738 = arith.mulf %737, %735 : vector<8x16xf32>
    %739 = arith.mulf %730, %680 : vector<8x16xf32>
    %740 = arith.addf %738, %739 : vector<8x16xf32>
    %741 = tpu.concatenate %714, %740 in 1 : vector<8x16xf32>, vector<8x16xf32> -> vector<8x32xf32>
    %742 = arith.truncf %741 : vector<8x32xf32> to vector<8x32xbf16>
    %cst_118 = arith.constant dense<0.000000e+00> : vector<8x96xf32>
    %743 = tpu.matmul %742, %5, %cst_118 {dimension_numbers = #tpu.dot_dimension_numbers<[1], [1], [0], [0], [0, 0, 1, 0], [], []>} : vector<8x32xbf16>, vector<96x32xbf16>, vector<8x96xf32> -> vector<8x96xf32>
    %744 = arith.addf %743, %26 : vector<8x96xf32>
    %745 = vector.extract_strided_slice %744 {offsets = [0, 0], sizes = [8, 48], strides = [1, 1]} : vector<8x96xf32> to vector<8x48xf32>
    %746 = vector.extract_strided_slice %744 {offsets = [0, 48], sizes = [8, 48], strides = [1, 1]} : vector<8x96xf32> to vector<8x48xf32>
    %747 = vector.extract_strided_slice %558 {offsets = [24, 0], sizes = [8, 48], strides = [1, 1]} : vector<64x96xf32> to vector<8x48xf32>
    %748 = vector.extract_strided_slice %558 {offsets = [32, 48], sizes = [8, 48], strides = [1, 1]} : vector<64x96xf32> to vector<8x48xf32>
    %749 = vector.extract_strided_slice %747 {offsets = [0, 0], sizes = [8, 16], strides = [1, 1]} : vector<8x48xf32> to vector<8x16xf32>
    %750 = vector.extract_strided_slice %745 {offsets = [0, 0], sizes = [8, 16], strides = [1, 1]} : vector<8x48xf32> to vector<8x16xf32>
    %751 = arith.addf %749, %750 : vector<8x16xf32>
    %752 = arith.negf %751 : vector<8x16xf32>
    %753 = math.exp %752 : vector<8x16xf32>
    %cst_119 = arith.constant 1.000000e+00 : f32
    %754 = vector.broadcast %cst_119 : f32 to vector<8x16xf32>
    %755 = arith.addf %754, %753 : vector<8x16xf32>
    %756 = arith.divf %754, %755 : vector<8x16xf32>
    %757 = vector.extract_strided_slice %747 {offsets = [0, 16], sizes = [8, 16], strides = [1, 1]} : vector<8x48xf32> to vector<8x16xf32>
    %758 = vector.extract_strided_slice %745 {offsets = [0, 16], sizes = [8, 16], strides = [1, 1]} : vector<8x48xf32> to vector<8x16xf32>
    %759 = arith.addf %757, %758 : vector<8x16xf32>
    %760 = arith.negf %759 : vector<8x16xf32>
    %761 = math.exp %760 : vector<8x16xf32>
    %cst_120 = arith.constant 1.000000e+00 : f32
    %762 = vector.broadcast %cst_120 : f32 to vector<8x16xf32>
    %763 = arith.addf %762, %761 : vector<8x16xf32>
    %764 = arith.divf %762, %763 : vector<8x16xf32>
    %765 = vector.extract_strided_slice %747 {offsets = [0, 32], sizes = [8, 16], strides = [1, 1]} : vector<8x48xf32> to vector<8x16xf32>
    %766 = vector.extract_strided_slice %745 {offsets = [0, 32], sizes = [8, 16], strides = [1, 1]} : vector<8x48xf32> to vector<8x16xf32>
    %767 = arith.mulf %756, %766 : vector<8x16xf32>
    %768 = arith.addf %765, %767 : vector<8x16xf32>
    %769 = math.tanh %768 : vector<8x16xf32>
    %cst_121 = arith.constant 1.000000e+00 : f32
    %770 = vector.broadcast %cst_121 : f32 to vector<8x16xf32>
    %771 = arith.subf %770, %764 : vector<8x16xf32>
    %772 = arith.mulf %771, %769 : vector<8x16xf32>
    %773 = arith.mulf %764, %714 : vector<8x16xf32>
    %774 = arith.addf %772, %773 : vector<8x16xf32>
    %775 = vector.extract_strided_slice %748 {offsets = [0, 0], sizes = [8, 16], strides = [1, 1]} : vector<8x48xf32> to vector<8x16xf32>
    %776 = vector.extract_strided_slice %746 {offsets = [0, 0], sizes = [8, 16], strides = [1, 1]} : vector<8x48xf32> to vector<8x16xf32>
    %777 = arith.addf %775, %776 : vector<8x16xf32>
    %778 = arith.negf %777 : vector<8x16xf32>
    %779 = math.exp %778 : vector<8x16xf32>
    %cst_122 = arith.constant 1.000000e+00 : f32
    %780 = vector.broadcast %cst_122 : f32 to vector<8x16xf32>
    %781 = arith.addf %780, %779 : vector<8x16xf32>
    %782 = arith.divf %780, %781 : vector<8x16xf32>
    %783 = vector.extract_strided_slice %748 {offsets = [0, 16], sizes = [8, 16], strides = [1, 1]} : vector<8x48xf32> to vector<8x16xf32>
    %784 = vector.extract_strided_slice %746 {offsets = [0, 16], sizes = [8, 16], strides = [1, 1]} : vector<8x48xf32> to vector<8x16xf32>
    %785 = arith.addf %783, %784 : vector<8x16xf32>
    %786 = arith.negf %785 : vector<8x16xf32>
    %787 = math.exp %786 : vector<8x16xf32>
    %cst_123 = arith.constant 1.000000e+00 : f32
    %788 = vector.broadcast %cst_123 : f32 to vector<8x16xf32>
    %789 = arith.addf %788, %787 : vector<8x16xf32>
    %790 = arith.divf %788, %789 : vector<8x16xf32>
    %791 = vector.extract_strided_slice %748 {offsets = [0, 32], sizes = [8, 16], strides = [1, 1]} : vector<8x48xf32> to vector<8x16xf32>
    %792 = vector.extract_strided_slice %746 {offsets = [0, 32], sizes = [8, 16], strides = [1, 1]} : vector<8x48xf32> to vector<8x16xf32>
    %793 = arith.mulf %782, %792 : vector<8x16xf32>
    %794 = arith.addf %791, %793 : vector<8x16xf32>
    %795 = math.tanh %794 : vector<8x16xf32>
    %cst_124 = arith.constant 1.000000e+00 : f32
    %796 = vector.broadcast %cst_124 : f32 to vector<8x16xf32>
    %797 = arith.subf %796, %790 : vector<8x16xf32>
    %798 = arith.mulf %797, %795 : vector<8x16xf32>
    %799 = arith.mulf %790, %740 : vector<8x16xf32>
    %800 = arith.addf %798, %799 : vector<8x16xf32>
    %801 = tpu.concatenate %774, %800 in 1 : vector<8x16xf32>, vector<8x16xf32> -> vector<8x32xf32>
    %802 = arith.truncf %801 : vector<8x32xf32> to vector<8x32xbf16>
    %cst_125 = arith.constant dense<0.000000e+00> : vector<8x96xf32>
    %803 = tpu.matmul %802, %5, %cst_125 {dimension_numbers = #tpu.dot_dimension_numbers<[1], [1], [0], [0], [0, 0, 1, 0], [], []>} : vector<8x32xbf16>, vector<96x32xbf16>, vector<8x96xf32> -> vector<8x96xf32>
    %804 = arith.addf %803, %26 : vector<8x96xf32>
    %805 = vector.extract_strided_slice %804 {offsets = [0, 0], sizes = [8, 48], strides = [1, 1]} : vector<8x96xf32> to vector<8x48xf32>
    %806 = vector.extract_strided_slice %804 {offsets = [0, 48], sizes = [8, 48], strides = [1, 1]} : vector<8x96xf32> to vector<8x48xf32>
    %807 = vector.extract_strided_slice %558 {offsets = [32, 0], sizes = [8, 48], strides = [1, 1]} : vector<64x96xf32> to vector<8x48xf32>
    %808 = vector.extract_strided_slice %558 {offsets = [24, 48], sizes = [8, 48], strides = [1, 1]} : vector<64x96xf32> to vector<8x48xf32>
    %809 = vector.extract_strided_slice %807 {offsets = [0, 0], sizes = [8, 16], strides = [1, 1]} : vector<8x48xf32> to vector<8x16xf32>
    %810 = vector.extract_strided_slice %805 {offsets = [0, 0], sizes = [8, 16], strides = [1, 1]} : vector<8x48xf32> to vector<8x16xf32>
    %811 = arith.addf %809, %810 : vector<8x16xf32>
    %812 = arith.negf %811 : vector<8x16xf32>
    %813 = math.exp %812 : vector<8x16xf32>
    %cst_126 = arith.constant 1.000000e+00 : f32
    %814 = vector.broadcast %cst_126 : f32 to vector<8x16xf32>
    %815 = arith.addf %814, %813 : vector<8x16xf32>
    %816 = arith.divf %814, %815 : vector<8x16xf32>
    %817 = vector.extract_strided_slice %807 {offsets = [0, 16], sizes = [8, 16], strides = [1, 1]} : vector<8x48xf32> to vector<8x16xf32>
    %818 = vector.extract_strided_slice %805 {offsets = [0, 16], sizes = [8, 16], strides = [1, 1]} : vector<8x48xf32> to vector<8x16xf32>
    %819 = arith.addf %817, %818 : vector<8x16xf32>
    %820 = arith.negf %819 : vector<8x16xf32>
    %821 = math.exp %820 : vector<8x16xf32>
    %cst_127 = arith.constant 1.000000e+00 : f32
    %822 = vector.broadcast %cst_127 : f32 to vector<8x16xf32>
    %823 = arith.addf %822, %821 : vector<8x16xf32>
    %824 = arith.divf %822, %823 : vector<8x16xf32>
    %825 = vector.extract_strided_slice %807 {offsets = [0, 32], sizes = [8, 16], strides = [1, 1]} : vector<8x48xf32> to vector<8x16xf32>
    %826 = vector.extract_strided_slice %805 {offsets = [0, 32], sizes = [8, 16], strides = [1, 1]} : vector<8x48xf32> to vector<8x16xf32>
    %827 = arith.mulf %816, %826 : vector<8x16xf32>
    %828 = arith.addf %825, %827 : vector<8x16xf32>
    %829 = math.tanh %828 : vector<8x16xf32>
    %cst_128 = arith.constant 1.000000e+00 : f32
    %830 = vector.broadcast %cst_128 : f32 to vector<8x16xf32>
    %831 = arith.subf %830, %824 : vector<8x16xf32>
    %832 = arith.mulf %831, %829 : vector<8x16xf32>
    %833 = arith.mulf %824, %774 : vector<8x16xf32>
    %834 = arith.addf %832, %833 : vector<8x16xf32>
    %835 = vector.extract_strided_slice %808 {offsets = [0, 0], sizes = [8, 16], strides = [1, 1]} : vector<8x48xf32> to vector<8x16xf32>
    %836 = vector.extract_strided_slice %806 {offsets = [0, 0], sizes = [8, 16], strides = [1, 1]} : vector<8x48xf32> to vector<8x16xf32>
    %837 = arith.addf %835, %836 : vector<8x16xf32>
    %838 = arith.negf %837 : vector<8x16xf32>
    %839 = math.exp %838 : vector<8x16xf32>
    %cst_129 = arith.constant 1.000000e+00 : f32
    %840 = vector.broadcast %cst_129 : f32 to vector<8x16xf32>
    %841 = arith.addf %840, %839 : vector<8x16xf32>
    %842 = arith.divf %840, %841 : vector<8x16xf32>
    %843 = vector.extract_strided_slice %808 {offsets = [0, 16], sizes = [8, 16], strides = [1, 1]} : vector<8x48xf32> to vector<8x16xf32>
    %844 = vector.extract_strided_slice %806 {offsets = [0, 16], sizes = [8, 16], strides = [1, 1]} : vector<8x48xf32> to vector<8x16xf32>
    %845 = arith.addf %843, %844 : vector<8x16xf32>
    %846 = arith.negf %845 : vector<8x16xf32>
    %847 = math.exp %846 : vector<8x16xf32>
    %cst_130 = arith.constant 1.000000e+00 : f32
    %848 = vector.broadcast %cst_130 : f32 to vector<8x16xf32>
    %849 = arith.addf %848, %847 : vector<8x16xf32>
    %850 = arith.divf %848, %849 : vector<8x16xf32>
    %851 = vector.extract_strided_slice %808 {offsets = [0, 32], sizes = [8, 16], strides = [1, 1]} : vector<8x48xf32> to vector<8x16xf32>
    %852 = vector.extract_strided_slice %806 {offsets = [0, 32], sizes = [8, 16], strides = [1, 1]} : vector<8x48xf32> to vector<8x16xf32>
    %853 = arith.mulf %842, %852 : vector<8x16xf32>
    %854 = arith.addf %851, %853 : vector<8x16xf32>
    %855 = math.tanh %854 : vector<8x16xf32>
    %cst_131 = arith.constant 1.000000e+00 : f32
    %856 = vector.broadcast %cst_131 : f32 to vector<8x16xf32>
    %857 = arith.subf %856, %850 : vector<8x16xf32>
    %858 = arith.mulf %857, %855 : vector<8x16xf32>
    %859 = arith.mulf %850, %800 : vector<8x16xf32>
    %860 = arith.addf %858, %859 : vector<8x16xf32>
    %861 = tpu.concatenate %834, %860 in 1 : vector<8x16xf32>, vector<8x16xf32> -> vector<8x32xf32>
    %862 = arith.truncf %861 : vector<8x32xf32> to vector<8x32xbf16>
    %cst_132 = arith.constant dense<0.000000e+00> : vector<8x96xf32>
    %863 = tpu.matmul %862, %5, %cst_132 {dimension_numbers = #tpu.dot_dimension_numbers<[1], [1], [0], [0], [0, 0, 1, 0], [], []>} : vector<8x32xbf16>, vector<96x32xbf16>, vector<8x96xf32> -> vector<8x96xf32>
    %864 = arith.addf %863, %26 : vector<8x96xf32>
    %865 = vector.extract_strided_slice %864 {offsets = [0, 0], sizes = [8, 48], strides = [1, 1]} : vector<8x96xf32> to vector<8x48xf32>
    %866 = vector.extract_strided_slice %864 {offsets = [0, 48], sizes = [8, 48], strides = [1, 1]} : vector<8x96xf32> to vector<8x48xf32>
    %867 = vector.extract_strided_slice %558 {offsets = [40, 0], sizes = [8, 48], strides = [1, 1]} : vector<64x96xf32> to vector<8x48xf32>
    %868 = vector.extract_strided_slice %558 {offsets = [16, 48], sizes = [8, 48], strides = [1, 1]} : vector<64x96xf32> to vector<8x48xf32>
    %869 = vector.extract_strided_slice %867 {offsets = [0, 0], sizes = [8, 16], strides = [1, 1]} : vector<8x48xf32> to vector<8x16xf32>
    %870 = vector.extract_strided_slice %865 {offsets = [0, 0], sizes = [8, 16], strides = [1, 1]} : vector<8x48xf32> to vector<8x16xf32>
    %871 = arith.addf %869, %870 : vector<8x16xf32>
    %872 = arith.negf %871 : vector<8x16xf32>
    %873 = math.exp %872 : vector<8x16xf32>
    %cst_133 = arith.constant 1.000000e+00 : f32
    %874 = vector.broadcast %cst_133 : f32 to vector<8x16xf32>
    %875 = arith.addf %874, %873 : vector<8x16xf32>
    %876 = arith.divf %874, %875 : vector<8x16xf32>
    %877 = vector.extract_strided_slice %867 {offsets = [0, 16], sizes = [8, 16], strides = [1, 1]} : vector<8x48xf32> to vector<8x16xf32>
    %878 = vector.extract_strided_slice %865 {offsets = [0, 16], sizes = [8, 16], strides = [1, 1]} : vector<8x48xf32> to vector<8x16xf32>
    %879 = arith.addf %877, %878 : vector<8x16xf32>
    %880 = arith.negf %879 : vector<8x16xf32>
    %881 = math.exp %880 : vector<8x16xf32>
    %cst_134 = arith.constant 1.000000e+00 : f32
    %882 = vector.broadcast %cst_134 : f32 to vector<8x16xf32>
    %883 = arith.addf %882, %881 : vector<8x16xf32>
    %884 = arith.divf %882, %883 : vector<8x16xf32>
    %885 = vector.extract_strided_slice %867 {offsets = [0, 32], sizes = [8, 16], strides = [1, 1]} : vector<8x48xf32> to vector<8x16xf32>
    %886 = vector.extract_strided_slice %865 {offsets = [0, 32], sizes = [8, 16], strides = [1, 1]} : vector<8x48xf32> to vector<8x16xf32>
    %887 = arith.mulf %876, %886 : vector<8x16xf32>
    %888 = arith.addf %885, %887 : vector<8x16xf32>
    %889 = math.tanh %888 : vector<8x16xf32>
    %cst_135 = arith.constant 1.000000e+00 : f32
    %890 = vector.broadcast %cst_135 : f32 to vector<8x16xf32>
    %891 = arith.subf %890, %884 : vector<8x16xf32>
    %892 = arith.mulf %891, %889 : vector<8x16xf32>
    %893 = arith.mulf %884, %834 : vector<8x16xf32>
    %894 = arith.addf %892, %893 : vector<8x16xf32>
    %895 = vector.extract_strided_slice %868 {offsets = [0, 0], sizes = [8, 16], strides = [1, 1]} : vector<8x48xf32> to vector<8x16xf32>
    %896 = vector.extract_strided_slice %866 {offsets = [0, 0], sizes = [8, 16], strides = [1, 1]} : vector<8x48xf32> to vector<8x16xf32>
    %897 = arith.addf %895, %896 : vector<8x16xf32>
    %898 = arith.negf %897 : vector<8x16xf32>
    %899 = math.exp %898 : vector<8x16xf32>
    %cst_136 = arith.constant 1.000000e+00 : f32
    %900 = vector.broadcast %cst_136 : f32 to vector<8x16xf32>
    %901 = arith.addf %900, %899 : vector<8x16xf32>
    %902 = arith.divf %900, %901 : vector<8x16xf32>
    %903 = vector.extract_strided_slice %868 {offsets = [0, 16], sizes = [8, 16], strides = [1, 1]} : vector<8x48xf32> to vector<8x16xf32>
    %904 = vector.extract_strided_slice %866 {offsets = [0, 16], sizes = [8, 16], strides = [1, 1]} : vector<8x48xf32> to vector<8x16xf32>
    %905 = arith.addf %903, %904 : vector<8x16xf32>
    %906 = arith.negf %905 : vector<8x16xf32>
    %907 = math.exp %906 : vector<8x16xf32>
    %cst_137 = arith.constant 1.000000e+00 : f32
    %908 = vector.broadcast %cst_137 : f32 to vector<8x16xf32>
    %909 = arith.addf %908, %907 : vector<8x16xf32>
    %910 = arith.divf %908, %909 : vector<8x16xf32>
    %911 = vector.extract_strided_slice %868 {offsets = [0, 32], sizes = [8, 16], strides = [1, 1]} : vector<8x48xf32> to vector<8x16xf32>
    %912 = vector.extract_strided_slice %866 {offsets = [0, 32], sizes = [8, 16], strides = [1, 1]} : vector<8x48xf32> to vector<8x16xf32>
    %913 = arith.mulf %902, %912 : vector<8x16xf32>
    %914 = arith.addf %911, %913 : vector<8x16xf32>
    %915 = math.tanh %914 : vector<8x16xf32>
    %cst_138 = arith.constant 1.000000e+00 : f32
    %916 = vector.broadcast %cst_138 : f32 to vector<8x16xf32>
    %917 = arith.subf %916, %910 : vector<8x16xf32>
    %918 = arith.mulf %917, %915 : vector<8x16xf32>
    %919 = arith.mulf %910, %860 : vector<8x16xf32>
    %920 = arith.addf %918, %919 : vector<8x16xf32>
    %921 = tpu.concatenate %894, %920 in 1 : vector<8x16xf32>, vector<8x16xf32> -> vector<8x32xf32>
    %922 = arith.truncf %921 : vector<8x32xf32> to vector<8x32xbf16>
    %cst_139 = arith.constant dense<0.000000e+00> : vector<8x96xf32>
    %923 = tpu.matmul %922, %5, %cst_139 {dimension_numbers = #tpu.dot_dimension_numbers<[1], [1], [0], [0], [0, 0, 1, 0], [], []>} : vector<8x32xbf16>, vector<96x32xbf16>, vector<8x96xf32> -> vector<8x96xf32>
    %924 = arith.addf %923, %26 : vector<8x96xf32>
    %925 = vector.extract_strided_slice %924 {offsets = [0, 0], sizes = [8, 48], strides = [1, 1]} : vector<8x96xf32> to vector<8x48xf32>
    %926 = vector.extract_strided_slice %924 {offsets = [0, 48], sizes = [8, 48], strides = [1, 1]} : vector<8x96xf32> to vector<8x48xf32>
    %927 = vector.extract_strided_slice %558 {offsets = [48, 0], sizes = [8, 48], strides = [1, 1]} : vector<64x96xf32> to vector<8x48xf32>
    %928 = vector.extract_strided_slice %558 {offsets = [8, 48], sizes = [8, 48], strides = [1, 1]} : vector<64x96xf32> to vector<8x48xf32>
    %929 = vector.extract_strided_slice %927 {offsets = [0, 0], sizes = [8, 16], strides = [1, 1]} : vector<8x48xf32> to vector<8x16xf32>
    %930 = vector.extract_strided_slice %925 {offsets = [0, 0], sizes = [8, 16], strides = [1, 1]} : vector<8x48xf32> to vector<8x16xf32>
    %931 = arith.addf %929, %930 : vector<8x16xf32>
    %932 = arith.negf %931 : vector<8x16xf32>
    %933 = math.exp %932 : vector<8x16xf32>
    %cst_140 = arith.constant 1.000000e+00 : f32
    %934 = vector.broadcast %cst_140 : f32 to vector<8x16xf32>
    %935 = arith.addf %934, %933 : vector<8x16xf32>
    %936 = arith.divf %934, %935 : vector<8x16xf32>
    %937 = vector.extract_strided_slice %927 {offsets = [0, 16], sizes = [8, 16], strides = [1, 1]} : vector<8x48xf32> to vector<8x16xf32>
    %938 = vector.extract_strided_slice %925 {offsets = [0, 16], sizes = [8, 16], strides = [1, 1]} : vector<8x48xf32> to vector<8x16xf32>
    %939 = arith.addf %937, %938 : vector<8x16xf32>
    %940 = arith.negf %939 : vector<8x16xf32>
    %941 = math.exp %940 : vector<8x16xf32>
    %cst_141 = arith.constant 1.000000e+00 : f32
    %942 = vector.broadcast %cst_141 : f32 to vector<8x16xf32>
    %943 = arith.addf %942, %941 : vector<8x16xf32>
    %944 = arith.divf %942, %943 : vector<8x16xf32>
    %945 = vector.extract_strided_slice %927 {offsets = [0, 32], sizes = [8, 16], strides = [1, 1]} : vector<8x48xf32> to vector<8x16xf32>
    %946 = vector.extract_strided_slice %925 {offsets = [0, 32], sizes = [8, 16], strides = [1, 1]} : vector<8x48xf32> to vector<8x16xf32>
    %947 = arith.mulf %936, %946 : vector<8x16xf32>
    %948 = arith.addf %945, %947 : vector<8x16xf32>
    %949 = math.tanh %948 : vector<8x16xf32>
    %cst_142 = arith.constant 1.000000e+00 : f32
    %950 = vector.broadcast %cst_142 : f32 to vector<8x16xf32>
    %951 = arith.subf %950, %944 : vector<8x16xf32>
    %952 = arith.mulf %951, %949 : vector<8x16xf32>
    %953 = arith.mulf %944, %894 : vector<8x16xf32>
    %954 = arith.addf %952, %953 : vector<8x16xf32>
    %955 = vector.extract_strided_slice %928 {offsets = [0, 0], sizes = [8, 16], strides = [1, 1]} : vector<8x48xf32> to vector<8x16xf32>
    %956 = vector.extract_strided_slice %926 {offsets = [0, 0], sizes = [8, 16], strides = [1, 1]} : vector<8x48xf32> to vector<8x16xf32>
    %957 = arith.addf %955, %956 : vector<8x16xf32>
    %958 = arith.negf %957 : vector<8x16xf32>
    %959 = math.exp %958 : vector<8x16xf32>
    %cst_143 = arith.constant 1.000000e+00 : f32
    %960 = vector.broadcast %cst_143 : f32 to vector<8x16xf32>
    %961 = arith.addf %960, %959 : vector<8x16xf32>
    %962 = arith.divf %960, %961 : vector<8x16xf32>
    %963 = vector.extract_strided_slice %928 {offsets = [0, 16], sizes = [8, 16], strides = [1, 1]} : vector<8x48xf32> to vector<8x16xf32>
    %964 = vector.extract_strided_slice %926 {offsets = [0, 16], sizes = [8, 16], strides = [1, 1]} : vector<8x48xf32> to vector<8x16xf32>
    %965 = arith.addf %963, %964 : vector<8x16xf32>
    %966 = arith.negf %965 : vector<8x16xf32>
    %967 = math.exp %966 : vector<8x16xf32>
    %cst_144 = arith.constant 1.000000e+00 : f32
    %968 = vector.broadcast %cst_144 : f32 to vector<8x16xf32>
    %969 = arith.addf %968, %967 : vector<8x16xf32>
    %970 = arith.divf %968, %969 : vector<8x16xf32>
    %971 = vector.extract_strided_slice %928 {offsets = [0, 32], sizes = [8, 16], strides = [1, 1]} : vector<8x48xf32> to vector<8x16xf32>
    %972 = vector.extract_strided_slice %926 {offsets = [0, 32], sizes = [8, 16], strides = [1, 1]} : vector<8x48xf32> to vector<8x16xf32>
    %973 = arith.mulf %962, %972 : vector<8x16xf32>
    %974 = arith.addf %971, %973 : vector<8x16xf32>
    %975 = math.tanh %974 : vector<8x16xf32>
    %cst_145 = arith.constant 1.000000e+00 : f32
    %976 = vector.broadcast %cst_145 : f32 to vector<8x16xf32>
    %977 = arith.subf %976, %970 : vector<8x16xf32>
    %978 = arith.mulf %977, %975 : vector<8x16xf32>
    %979 = arith.mulf %970, %920 : vector<8x16xf32>
    %980 = arith.addf %978, %979 : vector<8x16xf32>
    %981 = tpu.concatenate %954, %980 in 1 : vector<8x16xf32>, vector<8x16xf32> -> vector<8x32xf32>
    %982 = arith.truncf %981 : vector<8x32xf32> to vector<8x32xbf16>
    %cst_146 = arith.constant dense<0.000000e+00> : vector<8x96xf32>
    %983 = tpu.matmul %982, %5, %cst_146 {dimension_numbers = #tpu.dot_dimension_numbers<[1], [1], [0], [0], [0, 0, 1, 0], [], []>} : vector<8x32xbf16>, vector<96x32xbf16>, vector<8x96xf32> -> vector<8x96xf32>
    %984 = arith.addf %983, %26 : vector<8x96xf32>
    %985 = vector.extract_strided_slice %984 {offsets = [0, 0], sizes = [8, 48], strides = [1, 1]} : vector<8x96xf32> to vector<8x48xf32>
    %986 = vector.extract_strided_slice %984 {offsets = [0, 48], sizes = [8, 48], strides = [1, 1]} : vector<8x96xf32> to vector<8x48xf32>
    %987 = vector.extract_strided_slice %558 {offsets = [56, 0], sizes = [8, 48], strides = [1, 1]} : vector<64x96xf32> to vector<8x48xf32>
    %988 = vector.extract_strided_slice %558 {offsets = [0, 48], sizes = [8, 48], strides = [1, 1]} : vector<64x96xf32> to vector<8x48xf32>
    %989 = vector.extract_strided_slice %987 {offsets = [0, 0], sizes = [8, 16], strides = [1, 1]} : vector<8x48xf32> to vector<8x16xf32>
    %990 = vector.extract_strided_slice %985 {offsets = [0, 0], sizes = [8, 16], strides = [1, 1]} : vector<8x48xf32> to vector<8x16xf32>
    %991 = arith.addf %989, %990 : vector<8x16xf32>
    %992 = arith.negf %991 : vector<8x16xf32>
    %993 = math.exp %992 : vector<8x16xf32>
    %cst_147 = arith.constant 1.000000e+00 : f32
    %994 = vector.broadcast %cst_147 : f32 to vector<8x16xf32>
    %995 = arith.addf %994, %993 : vector<8x16xf32>
    %996 = arith.divf %994, %995 : vector<8x16xf32>
    %997 = vector.extract_strided_slice %987 {offsets = [0, 16], sizes = [8, 16], strides = [1, 1]} : vector<8x48xf32> to vector<8x16xf32>
    %998 = vector.extract_strided_slice %985 {offsets = [0, 16], sizes = [8, 16], strides = [1, 1]} : vector<8x48xf32> to vector<8x16xf32>
    %999 = arith.addf %997, %998 : vector<8x16xf32>
    %1000 = arith.negf %999 : vector<8x16xf32>
    %1001 = math.exp %1000 : vector<8x16xf32>
    %cst_148 = arith.constant 1.000000e+00 : f32
    %1002 = vector.broadcast %cst_148 : f32 to vector<8x16xf32>
    %1003 = arith.addf %1002, %1001 : vector<8x16xf32>
    %1004 = arith.divf %1002, %1003 : vector<8x16xf32>
    %1005 = vector.extract_strided_slice %987 {offsets = [0, 32], sizes = [8, 16], strides = [1, 1]} : vector<8x48xf32> to vector<8x16xf32>
    %1006 = vector.extract_strided_slice %985 {offsets = [0, 32], sizes = [8, 16], strides = [1, 1]} : vector<8x48xf32> to vector<8x16xf32>
    %1007 = arith.mulf %996, %1006 : vector<8x16xf32>
    %1008 = arith.addf %1005, %1007 : vector<8x16xf32>
    %1009 = math.tanh %1008 : vector<8x16xf32>
    %cst_149 = arith.constant 1.000000e+00 : f32
    %1010 = vector.broadcast %cst_149 : f32 to vector<8x16xf32>
    %1011 = arith.subf %1010, %1004 : vector<8x16xf32>
    %1012 = arith.mulf %1011, %1009 : vector<8x16xf32>
    %1013 = arith.mulf %1004, %954 : vector<8x16xf32>
    %1014 = arith.addf %1012, %1013 : vector<8x16xf32>
    %1015 = vector.extract_strided_slice %988 {offsets = [0, 0], sizes = [8, 16], strides = [1, 1]} : vector<8x48xf32> to vector<8x16xf32>
    %1016 = vector.extract_strided_slice %986 {offsets = [0, 0], sizes = [8, 16], strides = [1, 1]} : vector<8x48xf32> to vector<8x16xf32>
    %1017 = arith.addf %1015, %1016 : vector<8x16xf32>
    %1018 = arith.negf %1017 : vector<8x16xf32>
    %1019 = math.exp %1018 : vector<8x16xf32>
    %cst_150 = arith.constant 1.000000e+00 : f32
    %1020 = vector.broadcast %cst_150 : f32 to vector<8x16xf32>
    %1021 = arith.addf %1020, %1019 : vector<8x16xf32>
    %1022 = arith.divf %1020, %1021 : vector<8x16xf32>
    %1023 = vector.extract_strided_slice %988 {offsets = [0, 16], sizes = [8, 16], strides = [1, 1]} : vector<8x48xf32> to vector<8x16xf32>
    %1024 = vector.extract_strided_slice %986 {offsets = [0, 16], sizes = [8, 16], strides = [1, 1]} : vector<8x48xf32> to vector<8x16xf32>
    %1025 = arith.addf %1023, %1024 : vector<8x16xf32>
    %1026 = arith.negf %1025 : vector<8x16xf32>
    %1027 = math.exp %1026 : vector<8x16xf32>
    %cst_151 = arith.constant 1.000000e+00 : f32
    %1028 = vector.broadcast %cst_151 : f32 to vector<8x16xf32>
    %1029 = arith.addf %1028, %1027 : vector<8x16xf32>
    %1030 = arith.divf %1028, %1029 : vector<8x16xf32>
    %1031 = vector.extract_strided_slice %988 {offsets = [0, 32], sizes = [8, 16], strides = [1, 1]} : vector<8x48xf32> to vector<8x16xf32>
    %1032 = vector.extract_strided_slice %986 {offsets = [0, 32], sizes = [8, 16], strides = [1, 1]} : vector<8x48xf32> to vector<8x16xf32>
    %1033 = arith.mulf %1022, %1032 : vector<8x16xf32>
    %1034 = arith.addf %1031, %1033 : vector<8x16xf32>
    %1035 = math.tanh %1034 : vector<8x16xf32>
    %cst_152 = arith.constant 1.000000e+00 : f32
    %1036 = vector.broadcast %cst_152 : f32 to vector<8x16xf32>
    %1037 = arith.subf %1036, %1030 : vector<8x16xf32>
    %1038 = arith.mulf %1037, %1035 : vector<8x16xf32>
    %1039 = arith.mulf %1030, %980 : vector<8x16xf32>
    %1040 = arith.addf %1038, %1039 : vector<8x16xf32>
    %1041 = tpu.concatenate %594, %1040 in 1 : vector<8x16xf32>, vector<8x16xf32> -> vector<8x32xf32>
    %1042 = tpu.concatenate %654, %980 in 1 : vector<8x16xf32>, vector<8x16xf32> -> vector<8x32xf32>
    %1043 = tpu.concatenate %714, %920 in 1 : vector<8x16xf32>, vector<8x16xf32> -> vector<8x32xf32>
    %1044 = tpu.concatenate %774, %860 in 1 : vector<8x16xf32>, vector<8x16xf32> -> vector<8x32xf32>
    %1045 = tpu.concatenate %834, %800 in 1 : vector<8x16xf32>, vector<8x16xf32> -> vector<8x32xf32>
    %1046 = tpu.concatenate %894, %740 in 1 : vector<8x16xf32>, vector<8x16xf32> -> vector<8x32xf32>
    %1047 = tpu.concatenate %954, %680 in 1 : vector<8x16xf32>, vector<8x16xf32> -> vector<8x32xf32>
    %1048 = tpu.concatenate %1014, %620 in 1 : vector<8x16xf32>, vector<8x16xf32> -> vector<8x32xf32>
    %1049 = tpu.concatenate %1041, %1042, %1043, %1044, %1045, %1046, %1047, %1048 in 0 : vector<8x32xf32>, vector<8x32xf32>, vector<8x32xf32>, vector<8x32xf32>, vector<8x32xf32>, vector<8x32xf32>, vector<8x32xf32>, vector<8x32xf32> -> vector<64x32xf32>
    %cst_153 = arith.constant dense<0.000000e+00> : vector<64xf32>
    %1050 = vector.multi_reduction <add>, %1049, %cst_153 [1] : vector<64x32xf32> to vector<64xf32>
    %1051 = vector.shape_cast %1050 : vector<64xf32> to vector<64x1xf32>
    %cst_154 = arith.constant 3.200000e+01 : f32
    %1052 = vector.broadcast %cst_154 : f32 to vector<64x1xf32>
    %1053 = arith.divf %1051, %1052 : vector<64x1xf32>
    %1054 = vector.broadcast %1053 : vector<64x1xf32> to vector<64x32xf32>
    %1055 = arith.subf %1049, %1054 : vector<64x32xf32>
    %1056 = arith.mulf %1055, %1055 : vector<64x32xf32>
    %cst_155 = arith.constant dense<0.000000e+00> : vector<64xf32>
    %1057 = vector.multi_reduction <add>, %1056, %cst_155 [1] : vector<64x32xf32> to vector<64xf32>
    %1058 = vector.shape_cast %1057 : vector<64xf32> to vector<64x1xf32>
    %cst_156 = arith.constant 3.200000e+01 : f32
    %1059 = vector.broadcast %cst_156 : f32 to vector<64x1xf32>
    %1060 = arith.divf %1058, %1059 : vector<64x1xf32>
    %cst_157 = arith.constant 9.99999974E-6 : f32
    %1061 = vector.broadcast %cst_157 : f32 to vector<64x1xf32>
    %1062 = arith.addf %1060, %1061 : vector<64x1xf32>
    %1063 = math.rsqrt %1062 : vector<64x1xf32>
    %1064 = vector.broadcast %1063 : vector<64x1xf32> to vector<64x32xf32>
    %1065 = arith.mulf %1055, %1064 : vector<64x32xf32>
    %1066 = vector.broadcast %8 : vector<1x32xf32> to vector<64x32xf32>
    %1067 = arith.mulf %1065, %1066 : vector<64x32xf32>
    %1068 = vector.broadcast %9 : vector<1x32xf32> to vector<64x32xf32>
    %1069 = arith.addf %1067, %1068 : vector<64x32xf32>
    %1070 = vector.broadcast %1 : vector<64x1xf32> to vector<64x32xf32>
    %1071 = arith.mulf %1069, %1070 : vector<64x32xf32>
    %cst_158 = arith.constant 1.000000e+00 : f32
    %1072 = vector.broadcast %cst_158 : f32 to vector<64x1xf32>
    %1073 = arith.subf %1072, %1 : vector<64x1xf32>
    %cst_159 = arith.constant -1.000000e+06 : f32
    %1074 = vector.broadcast %cst_159 : f32 to vector<64x1xf32>
    %1075 = arith.mulf %1073, %1074 : vector<64x1xf32>
    %1076 = vector.broadcast %1075 : vector<64x1xf32> to vector<64x32xf32>
    %1077 = arith.addf %1071, %1076 : vector<64x32xf32>
    %1078 = vector.extract_strided_slice %1077 {offsets = [0, 0], sizes = [8, 32], strides = [1, 1]} : vector<64x32xf32> to vector<8x32xf32>
    %1079 = vector.extract_strided_slice %1077 {offsets = [8, 0], sizes = [8, 32], strides = [1, 1]} : vector<64x32xf32> to vector<8x32xf32>
    %1080 = vector.extract_strided_slice %1077 {offsets = [16, 0], sizes = [8, 32], strides = [1, 1]} : vector<64x32xf32> to vector<8x32xf32>
    %1081 = vector.extract_strided_slice %1077 {offsets = [24, 0], sizes = [8, 32], strides = [1, 1]} : vector<64x32xf32> to vector<8x32xf32>
    %1082 = vector.extract_strided_slice %1077 {offsets = [32, 0], sizes = [8, 32], strides = [1, 1]} : vector<64x32xf32> to vector<8x32xf32>
    %1083 = vector.extract_strided_slice %1077 {offsets = [40, 0], sizes = [8, 32], strides = [1, 1]} : vector<64x32xf32> to vector<8x32xf32>
    %1084 = vector.extract_strided_slice %1077 {offsets = [48, 0], sizes = [8, 32], strides = [1, 1]} : vector<64x32xf32> to vector<8x32xf32>
    %1085 = vector.extract_strided_slice %1077 {offsets = [56, 0], sizes = [8, 32], strides = [1, 1]} : vector<64x32xf32> to vector<8x32xf32>
    %1086 = arith.maximumf %1078, %1079 : vector<8x32xf32>
    %1087 = arith.maximumf %1080, %1081 : vector<8x32xf32>
    %1088 = arith.maximumf %1082, %1083 : vector<8x32xf32>
    %1089 = arith.maximumf %1084, %1085 : vector<8x32xf32>
    %1090 = arith.maximumf %1086, %1087 : vector<8x32xf32>
    %1091 = arith.maximumf %1088, %1089 : vector<8x32xf32>
    %1092 = arith.maximumf %1090, %1091 : vector<8x32xf32>
    %1093 = arith.truncf %1092 : vector<8x32xf32> to vector<8x32xbf16>
    %cst_160 = arith.constant dense<0.000000e+00> : vector<8x4xf32>
    %1094 = tpu.matmul %1093, %12, %cst_160 {dimension_numbers = #tpu.dot_dimension_numbers<[1], [1], [0], [0], [0, 0, 1, 0], [], []>} : vector<8x32xbf16>, vector<4x32xbf16>, vector<8x4xf32> -> vector<8x4xf32>
    %1095 = vector.broadcast %13 : vector<1x4xf32> to vector<8x4xf32>
    %1096 = arith.addf %1094, %1095 : vector<8x4xf32>
    %c0_161 = arith.constant 0 : index
    %c0_162 = arith.constant 0 : index
    %1097 = vector.load %arg15[%c0_161, %c0_162] : memref<8x4xf32, #tpu.memory_space<vmem>>, vector<8x4xf32>
    tpu.vector_store %arg15[%c0_161, %c0_162], %1096 {strides = array<i32>} : memref<8x4xf32, #tpu.memory_space<vmem>>, vector<8x4xf32>,
    return
  }
}

</mosaic_0001>

<bundles_post_ra>
// kernel: tpu_custom_call.1
= control target key start
LH: loop header
LB: loop body
LE: loop exit
PB: predicated region body
PF: predicated region fallthrough
CT: control target
= control target key end

     0   :  { %v4599_v0 = vmov 0   ;;  %vm185_vm0 = vcmask 1041408   ;;  %vm300_vm1 = vcmask 261120   ;;  %v109_v28 = vlaneseq  ;;  %s3163_s28 = smov 96   ;;  %s3164_s16 = smov 32   ;;  %s4583_s0 = inlined_call_operand.vmem [shape: s32[64,1], index: 0, kind: input, shape index: {}]   ;;  %s4584_s1 = inlined_call_operand.vmem [shape: f32[64,1], index: 1, kind: input, shape index: {}]   ;;  %s4585_s3 = inlined_call_operand.vmem [shape: bf16[20,32], index: 3, kind: input, shape index: {}]   ;;  %s4586_s5 = inlined_call_operand.vmem [shape: bf16[96,32], index: 5, kind: input, shape index: {}]   ;;  %s4587_s4 = inlined_call_operand.vmem [shape: bf16[96,32], index: 4, kind: input, shape index: {}]   ;;  %s4588_s7 = inlined_call_operand.vmem [shape: f32[1,96], index: 7, kind: input, shape index: {}]   ;;  %s4589_s6 = inlined_call_operand.vmem [shape: f32[1,96], index: 6, kind: input, shape index: {}]   ;;  %s4590_s8 = inlined_call_operand.vmem [shape: f32[1,32], index: 8, kind: input, shape index: {}]   ;;  %s4591_s9 = inlined_call_operand.vmem [shape: f32[1,32], index: 9, kind: input, shape index: {}]   ;;  %s4592_s10 = inlined_call_operand.vmem [shape: bf16[2,32], index: 10, kind: input, shape index: {}]   ;;  %s4593_s11 = inlined_call_operand.vmem [shape: f32[1,2], index: 11, kind: input, shape index: {}]   ;;  %s4594_s2 = inlined_call_operand.vmem [shape: f32[64,2], index: 2, kind: input, shape index: {}]   ;;  %s4595_s14 = inlined_call_operand.vmem [shape: f32[64,2], index: 14, kind: output, shape index: {0}]   ;;  %s4596_s13 = inlined_call_operand.vmem [shape: f32[1,4], index: 13, kind: input, shape index: {}]   ;;  %s4597_s12 = inlined_call_operand.vmem [shape: bf16[4,32], index: 12, kind: input, shape index: {}]   ;;  %s4598_s15 = inlined_call_operand.vmem [shape: f32[8,4], index: 15, kind: output, shape index: {1}]  }
   0x1   :  { %2906 = vset.pattern.permute.xlu1 %v4599_v0  ;;  %2905 = vset.pattern.permute.xlu0 %v4599_v0  ;;  %v52_v1 = vld [vmem:[%s4583_s0 + $0x10] sm:$0xff]  ;;  %v50_v2 = vld [vmem:[%s4583_s0] sm:$0xff]  ;;  %v53_v4 = vld [vmem:[%s4583_s0 + $0x18] sm:$0xff]  ;;  %v3161_v35 = vmov 0.0   ;;  %vm172_vm4 = vcmask 162816   ;;  %v3162_v48 = vmov 0.0|0.0  }
   0x2   :  { %118 = vperm.xlu1 %2906, %v52_v1   ;;  %112 = vperm.xlu0 %2905, %v50_v2   ;;  %v54_v3 = vld [vmem:[%s4583_s0 + $0x20] sm:$0xff]  ;;  %v51_v5 = vld [vmem:[%s4583_s0 + $0x8] sm:$0xff]  ;;  %v57_v7 = vld [vmem:[%s4583_s0 + $0x38] sm:$0xff]  ;;  %v3341_v32 = vand.u32 127, %v109_v28  ;;  %s3165_s17 = smov 112  }
   0x3   :  { %2907 = vset.pattern.permute.xlu2 %v4599_v0  ;;  %v55_v6 = vld [vmem:[%s4583_s0 + $0x28] sm:$0xff]  ;;  %v56_v8 = vld [vmem:[%s4583_s0 + $0x30] sm:$0xff]  ;;  %v58_v9 = vld [vmem:[%s4584_s1] sm:$0xff] }
   0x4   :  { %124 = vperm.xlu2 %2907, %v54_v3   ;;  %v60_v10 = vld [vmem:[%s4584_s1 + $0x10] sm:$0xff]  ;;  %v59_v11 = vld [vmem:[%s4584_s1 + $0x8] sm:$0xff]  ;;  %v61_v12 = vld [vmem:[%s4584_s1 + $0x18] sm:$0xff] }
   0x5   :  { %v63_v13 = vld [vmem:[%s4584_s1 + $0x28] sm:$0xff]  ;;  %v62_v14 = vld [vmem:[%s4584_s1 + $0x20] sm:$0xff]  ;;  %v64_v15 = vld [vmem:[%s4584_s1 + $0x30] sm:$0xff] }
   0x6   :  { %v65_v16 = vld [vmem:[%s4584_s1 + $0x38] sm:$0xff]  ;;  %v76_v17 = vld [vmem:[%s4585_s3 + $0x8] sm:$0x3]  ;;  %v2881_v21 = vld [vmem:[%s4585_s3] sm:$0xff] }
   0x7   :  { %v168_v18 = vunpack.c.l.b16 %v76_v17  ;;  %v2893_v22 = vld [vmem:[%s4586_s5 + $0x28] sm:$0xff]  ;;  %v2892_v24 = vld [vmem:[%s4586_s5 + $0x20] sm:$0xff]  ;;  %v2891_v26 = vld [vmem:[%s4586_s5 + $0x18] sm:$0xff] }
   0x8   :  { %v3312_v23 = vsel %vm300_vm1, %v2893_v22, 0  ;;  %v3321_v25 = vsel %vm300_vm1, %v2892_v24, 0  ;;  %v3330_v27 = vsel %vm300_vm1, %v2891_v26, 0  ;;  %v2890_v30 = vld [vmem:[%s4586_s5 + $0x10] sm:$0xff]  ;;  %v2889_v38 = vld [vmem:[%s4586_s5 + $0x8] sm:$0xff]  ;;  %v2888_v41 = vld [vmem:[%s4586_s5] sm:$0xff] }
   0x9   :  { %v170_v19 = vpack.c.b16 %v168_v18, %v168_v18  ;;  %428 = vmatpush.bf16.xpose.msra.mxu2 %v3312_v23  ;;  %529 = vmatpush.bf16.xpose.msra.mxu3 %v3312_v23  ;;  %v3339_v31 = vsel %vm300_vm1, %v2890_v30, 0  ;;  %v3354_v40 = vsel %vm300_vm1, %v2889_v38, 0  ;;  %v3364_v42 = vsel %vm300_vm1, %v2888_v41, 0  ;;  %v2887_v49 = vld [vmem:[%s4587_s4 + $0x28] sm:$0xff]  ;;  %v2886_v51 = vld [vmem:[%s4587_s4 + $0x20] sm:$0xff]  ;;  %v2885_v56 = vld [vmem:[%s4587_s4 + $0x18] sm:$0xff] }
   0xa   :  { %121 = vperm.xlu1 %2906, %v53_v4   ;;  %115 = vperm.xlu0 %2905, %v51_v5   ;;  %v329_v50 = vsel %vm300_vm1, %v2887_v49, 0  ;;  %v326_v53 = vsel %vm300_vm1, %v2886_v51, 0  ;;  %v323_v58 = vsel %vm300_vm1, %v2885_v56, 0  ;;  %v2884_v59 = vld [vmem:[%s4587_s4 + $0x10] sm:$0xff]  ;;  %v2883_v2 = vld [vmem:[%s4587_s4 + $0x8] sm:$0xff]  ;;  %v2882_v5 = vld [vmem:[%s4587_s4] sm:$0xff] }
   0xb   :  { %v187_v20 = vsel %vm185_vm0, %v170_v19, 0  ;;  %333 = vmatpush.bf16.xpose.msra.mxu1 %v329_v50  ;;  %v320_v62 = vsel %vm300_vm1, %v2884_v59, 0  ;;  %v317_v4 = vsel %vm300_vm1, %v2883_v2, 0  ;;  %s3166_s5 = smov 80   ;;  %s3168_s4 = smov 127  }
   0xc   :  { %127 = vperm.xlu2 %2907, %v55_v6   ;;  %195 = vmatpush.bf16.msra.mxu0 %v187_v20  ;;  %v314_v6 = vsel %vm300_vm1, %v2882_v5, 0 }
  0x10   :  { %196 = vmatpush.bf16.msra.mxu0 %v2881_v21 }
  0x11   :  { %429 = vmatpush.bf16.xpose.msra.mxu2 %v3321_v25  ;;  %530 = vmatpush.bf16.xpose.msra.mxu3 %v3321_v25 }
  0x12   :  { %133 = vperm.xlu1 %2906, %v57_v7   ;;  %130 = vperm.xlu0 %2905, %v56_v8  }
  0x13   :  { %334 = vmatpush.bf16.xpose.msra.mxu1 %v326_v53 }
  0x14   :  { %220 = vperm.xlu2 %2907, %v58_v9   ;;  %629 = vmatpush.bf16.xpose.msrb.mxu0 %v3312_v23 }
  0x19   :  { %430 = vmatpush.bf16.xpose.msra.mxu2 %v3330_v27  ;;  %531 = vmatpush.bf16.xpose.msra.mxu3 %v3330_v27 }
  0x1a   :  { %230 = vperm.xlu1 %2906, %v60_v10   ;;  %225 = vperm.xlu0 %2905, %v59_v11  }
  0x1b   :  { %335 = vmatpush.bf16.xpose.msra.mxu1 %v323_v58 }
  0x1c   :  { %235 = vperm.xlu2 %2907, %v61_v12   ;;  %630 = vmatpush.bf16.xpose.msrb.mxu0 %v3321_v25 }
  0x21   :  { %431 = vmatpush.bf16.xpose.msra.mxu2 %v3339_v31  ;;  %532 = vmatpush.bf16.xpose.msra.mxu3 %v3339_v31 }
  0x22   :  { %245 = vperm.xlu1 %2906, %v63_v13   ;;  %240 = vperm.xlu0 %2905, %v62_v14  }
  0x23   :  { %336 = vmatpush.bf16.xpose.msra.mxu1 %v320_v62 }
  0x24   :  { %250 = vperm.xlu2 %2907, %v64_v15   ;;  %631 = vmatpush.bf16.xpose.msrb.mxu0 %v3330_v27  ;;  %v3449_v15 = vld [vmem:[%s4588_s7] ss:$0 sm:$0xff] }
  0x29   :  { %432 = vmatpush.bf16.xpose.msra.mxu2 %v3354_v40  ;;  %533 = vmatpush.bf16.xpose.msra.mxu3 %v3354_v40 }
  0x2a   :  { %255 = vperm.xlu0 %2905, %v65_v16  }
  0x2b   :  { %337 = vmatpush.bf16.xpose.msra.mxu1 %v317_v4 }
  0x2c   :  { %632 = vmatpush.bf16.xpose.msrb.mxu0 %v3339_v31 }
  0x31   :  { %433 = vmatpush.bf16.xpose.msra.mxu2 %v3364_v42  ;;  %534 = vmatpush.bf16.xpose.msra.mxu3 %v3364_v42 }
  0x33   :  { %338 = vmatpush.bf16.xpose.msra.mxu1 %v314_v6 }
  0x34   :  { %633 = vmatpush.bf16.xpose.msrb.mxu0 %v3354_v40 }
  0x38   :  { %434 = vmatmul.bf16.vlgmr.msra.gmra.mxu2 %v3162_v48 }
  0x39   :  { %729 = vmatpush.bf16.xpose.msrb.mxu2 %v3312_v23  ;;  %829 = vmatpush.bf16.xpose.msrb.mxu3 %v3312_v23 }
  0x3b   :  { %929 = vmatpush.bf16.xpose.msrb.mxu1 %v3312_v23 }
  0x3c   :  { %634 = vmatpush.bf16.xpose.msrb.mxu0 %v3364_v42 }
  0x41   :  { %730 = vmatpush.bf16.xpose.msrb.mxu2 %v3321_v25  ;;  %830 = vmatpush.bf16.xpose.msrb.mxu3 %v3321_v25 }
  0x43   :  { %930 = vmatpush.bf16.xpose.msrb.mxu1 %v3321_v25 }
  0x49   :  { %731 = vmatpush.bf16.xpose.msrb.mxu2 %v3330_v27  ;;  %831 = vmatpush.bf16.xpose.msrb.mxu3 %v3330_v27 }
  0x4b   :  { %931 = vmatpush.bf16.xpose.msrb.mxu1 %v3330_v27 }
  0x51   :  { %732 = vmatpush.bf16.xpose.msrb.mxu2 %v3339_v31  ;;  %832 = vmatpush.bf16.xpose.msrb.mxu3 %v3339_v31 }
  0x53   :  { %932 = vmatpush.bf16.xpose.msrb.mxu1 %v3339_v31 }
  0x59   :  { %733 = vmatpush.bf16.xpose.msrb.mxu2 %v3354_v40  ;;  %833 = vmatpush.bf16.xpose.msrb.mxu3 %v3354_v40 }
  0x5b   :  { %933 = vmatpush.bf16.xpose.msrb.mxu1 %v3354_v40 }
  0x5e   :  { %v125_v46 = vpop.permute.xlu2 %124 }
  0x5f   :  { %vm139_vm7 = vcmp.eq.s32.totalorder %v3341_v32, %v125_v46  ;;  %v3485_v46 = vld [vmem:[%s4589_s6] ss:$0 sm:$0xff] }
  0x60   :  { %v2758_v54 = vsel %vm139_vm7, 1.0, %v3161_v35 }
  0x61   :  { %734 = vmatpush.bf16.xpose.msrb.mxu2 %v3364_v42  ;;  %834 = vmatpush.bf16.xpose.msrb.mxu3 %v3364_v42 }
  0x63   :  { %934 = vmatpush.bf16.xpose.msrb.mxu1 %v3364_v42 }
  0x66   :  { %v128_v52 = vpop.permute.xlu2 %127 }
  0x67   :  { %vm140_vm8 = vcmp.eq.s32.totalorder %v3341_v32, %v128_v52 }
  0x68   :  { %v2759_v55 = vsel %vm140_vm8, 1.0, %v3161_v35 }
  0x69   :  { %v161_v57 = vpack.c.bf16 %v2759_v55, %v2758_v54  ;;  %1129 = vmatpush.bf16.xpose.msra.mxu2 %v3312_v23 }
  0x6e   :  { %v3437_v8 = vpop.permute.xlu2 %220 }
  0x71   :  { %1130 = vmatpush.bf16.xpose.msra.mxu2 %v3321_v25 }
  0x74   :  { %v113_v29 = vpop.permute.xlu0 %112  ;;  %v119_v34 = vpop.permute.xlu1 %118 }
  0x75   :  { %vm135_vm2 = vcmp.eq.s32.totalorder %v3341_v32, %v113_v29  ;;  %vm137_vm5 = vcmp.eq.s32.totalorder %v3341_v32, %v119_v34 }
  0x76   :  { %v2754_v36 = vsel %vm135_vm2, 1.0, %v3161_v35  ;;  %v2756_v44 = vsel %vm137_vm5, 1.0, %v3161_v35  ;;  %v3454_v18 = vpop.permute.xlu2 %235 }
  0x79   :  { %1131 = vmatpush.bf16.xpose.msra.mxu2 %v3330_v27 }
  0x7c   :  { %v116_v33 = vpop.permute.xlu0 %115  ;;  %v122_v43 = vpop.permute.xlu1 %121 }
  0x7d   :  { %vm136_vm3 = vcmp.eq.s32.totalorder %v3341_v32, %v116_v33  ;;  %vm138_vm6 = vcmp.eq.s32.totalorder %v3341_v32, %v122_v43 }
  0x7e   :  { %v2755_v37 = vsel %vm136_vm3, 1.0, %v3161_v35  ;;  %v2757_v45 = vsel %vm138_vm6, 1.0, %v3161_v35  ;;  %v3474_v38 = vpop.permute.xlu2 %250 }
  0x7f   :  { %v159_v39 = vpack.c.bf16 %v2755_v37, %v2754_v36  ;;  %v160_v47 = vpack.c.bf16 %v2757_v45, %v2756_v44 }
  0x81   :  { %2766 = vmatmul.msk.bf16.vlgmr.msra.gmra.mxu0 %vm172_vm4, %v159_v39  ;;  %1132 = vmatpush.bf16.xpose.msra.mxu2 %v3339_v31 }
  0x82   :  { %1029 = vmatpush.bf16.xpose.msra.mxu0 %v3312_v23 }
  0x84   :  { %v134_v60 = vpop.permute.xlu1 %133  ;;  %v131_v61 = vpop.permute.xlu0 %130 }
  0x85   :  { %vm142_vm9 = vcmp.eq.s32.totalorder %v3341_v32, %v134_v60  ;;  %vm141_vm10 = vcmp.eq.s32.totalorder %v3341_v32, %v131_v61 }
  0x86   :  { %v2761_v63 = vsel %vm142_vm9, 1.0, %v3161_v35  ;;  %v2760_v1 = vsel %vm141_vm10, 1.0, %v3161_v35 }
  0x87   :  { %v162_v3 = vpack.c.bf16 %v2761_v63, %v2760_v1 }
  0x89   :  { %1133 = vmatpush.bf16.xpose.msra.mxu2 %v3354_v40 }
  0x8a   :  { %1030 = vmatpush.bf16.xpose.msra.mxu0 %v3321_v25 }
  0x8c   :  { %v3439_v9 = vpop.permute.xlu0 %225  ;;  %v3457_v19 = vpop.permute.xlu1 %230 }
  0x91   :  { %2767 = vmatmul.msk.bf16.gmra.mxu0 %vm172_vm4, %v160_v47  ;;  %1134 = vmatpush.bf16.xpose.msra.mxu2 %v3364_v42 }
  0x92   :  { %1031 = vmatpush.bf16.xpose.msra.mxu0 %v3330_v27 }
  0x94   :  { %v3465_v29 = vpop.permute.xlu1 %245  ;;  %v3468_v30 = vpop.permute.xlu0 %240 }
  0x9a   :  { %1032 = vmatpush.bf16.xpose.msra.mxu0 %v3339_v31 }
  0x9c   :  { %v3477_v39 = vpop.permute.xlu0 %255 }
  0xa1   :  { %2768 = vmatmul.msk.bf16.gmra.mxu0 %vm172_vm4, %v161_v57 }
  0xa2   :  { %1033 = vmatpush.bf16.xpose.msra.mxu0 %v3354_v40 }
  0xaa   :  { %1034 = vmatpush.bf16.xpose.msra.mxu0 %v3364_v42 }
  0xb1   :  { %2769 = vmatmul.msk.bf16.gmra.mxu0 %vm172_vm4, %v162_v3  ;;  %vm521_vm4 = vcmask 130048  }
  0xbb   :  { %v435_v16 = vpop.f32.mrf.mxu2 }
  0xbc   :  { %v3452_v17 = vadd.f32 %v3449_v15, %v435_v16 }
  0xbe   :  { %460 = vrot.lane.b32.xlu1 %v3452_v17, %s3163_s28 }
  0xc3   :  { %v437_v26 = vpop.f32.mrf.mxu2 }
  0xfe   :  { %v198_v7 = vpop.f32.mrf.mxu0 }
  0xff   :  { %v258_v11 = vmul.f32 %v3437_v8, %v198_v7 }
 0x106   :  { %v200_v10 = vpop.f32.mrf.mxu0 }
 0x107   :  { %v259_v12 = vmul.f32 %v3439_v9, %v200_v10 }
 0x109   :  { %v266_v13 = vpack.c.bf16 %v259_v12, %v258_v11 }
 0x10b   :  { %2794 = vmatmul.msk.bf16.vlgmr.msra.gmra.mxu1 %vm300_vm1, %v266_v13 }
 0x10c   :  { %1749 = vmatpush.bf16.xpose.msra.mxu1 %v3312_v23 }
 0x10e   :  { %v203_v14 = vpop.f32.mrf.mxu0 }
 0x10f   :  { %v260_v21 = vmul.f32 %v3457_v19, %v203_v14 }
 0x114   :  { %1750 = vmatpush.bf16.xpose.msra.mxu1 %v3321_v25 }
 0x116   :  { %v205_v20 = vpop.f32.mrf.mxu0 }
 0x117   :  { %v261_v22 = vmul.f32 %v3454_v18, %v205_v20 }
 0x119   :  { %v267_v24 = vpack.c.bf16 %v261_v22, %v260_v21 }
 0x11b   :  { %2795 = vmatmul.msk.bf16.gmra.mxu1 %vm300_vm1, %v267_v24 }
 0x11c   :  { %1751 = vmatpush.bf16.xpose.msra.mxu1 %v3330_v27 }
 0x11e   :  { %v208_v28 = vpop.f32.mrf.mxu0 }
 0x11f   :  { %v262_v33 = vmul.f32 %v3468_v30, %v208_v28 }
 0x124   :  { %1752 = vmatpush.bf16.xpose.msra.mxu1 %v3339_v31 }
 0x126   :  { %v210_v32 = vpop.f32.mrf.mxu0 }
 0x127   :  { %v263_v34 = vmul.f32 %v3465_v29, %v210_v32 }
 0x129   :  { %v268_v36 = vpack.c.bf16 %v263_v34, %v262_v33 }
 0x12b   :  { %2796 = vmatmul.msk.bf16.gmra.mxu1 %vm300_vm1, %v268_v36 }
 0x12c   :  { %1753 = vmatpush.bf16.xpose.msra.mxu1 %v3354_v40 }
 0x12e   :  { %v213_v37 = vpop.f32.mrf.mxu0 }
 0x12f   :  { %v264_v43 = vmul.f32 %v3474_v38, %v213_v37 }
 0x130   :  { %v3501_v63 = vpop.permute.xlu1 %460 }
 0x134   :  { %1754 = vmatpush.bf16.xpose.msra.mxu1 %v3364_v42 }
 0x136   :  { %v215_v41 = vpop.f32.mrf.mxu0 }
 0x137   :  { %v265_v44 = vmul.f32 %v3477_v39, %v215_v41 }
 0x139   :  { %v269_v45 = vpack.c.bf16 %v265_v44, %v264_v43 }
 0x13b   :  { %2797 = vmatmul.msk.bf16.gmra.mxu1 %vm300_vm1, %v269_v45 }
 0x188   :  { %v3487_v47 = vpop.f32.mrf.mxu1 }
 0x189   :  { %v3491_v48 = vadd.f32 %v3485_v46, %v3487_v47 }
 0x18b   :  { %v439_v49 = vadd.f32 %v3452_v17, %v3491_v48 }
 0x18d   :  { %v2822_v50 = vmul.f32 -1.442695, %v439_v49 }
 0x18f   :  { %2920 = vpow2.f32 %v2822_v50 }
 0x190   :  { %v3495_v51 = vpop.f32.mrf.mxu1 }
 0x195   :  { %v2921_v52 = vpop.eup %2920 }
 0x196   :  { %v443_v53 = vadd.f32 1.0, %v2921_v52 }
 0x198   :  { %2922 = vrcp.f32 %v443_v53  ;;  %v3497_v54 = vpop.f32.mrf.mxu1  ;;  %v455_v59 = vand.u32 2147483648, %v443_v53  ;;  %v453_v61 = vand.u32 2147483647, %v443_v53  ;;  %vm449_vm12 = vweird.f32 %v443_v53 }
 0x19a   :  { %v456_v1 = vor.u32 1.1754944e-38, %v455_v59  ;;  %vm454_vm14 = vcmp.eq.f32.partialorder %v453_v61, 8.507059e+37 }
 0x19e   :  { %v2923_v55 = vpop.eup %2922 }
 0x19f   :  { %v445_v56 = vmul.f32 %v2923_v55, %v443_v53  ;;  %vm450_vm11 = vweird.f32 %v2923_v55 }
 0x1a0   :  { %v3499_v57 = vpop.f32.mrf.mxu1  ;;  %vm451_vm13 = vmor %vm449_vm12, %vm450_vm11 }
 0x1a1   :  { %v446_v58 = vsub.f32 1.0, %v445_v56 }
 0x1a3   :  { %v447_v60 = vmul.f32 %v2923_v55, %v446_v58 }
 0x1a5   :  { %v448_v62 = vadd.f32 %v2923_v55, %v447_v60 }
 0x1a7   :  { %v452_v2 = vsel %vm451_vm13, %v2923_v55, %v448_v62 }
 0x1a8   :  { %v3503_v3 = vpop.f32.mrf.mxu1  ;;  %v457_v4 = vsel %vm454_vm14, %v456_v1, %v452_v2 }
 0x1a9   :  { %v463_v5 = vmul.f32 %v3501_v63, %v457_v4  ;;  %v470_v52 = vsub.f32 1.0, %v457_v4  ;;  %v476_v55 = vmul.f32 0.0, %v457_v4 }
 0x1ab   :  { %465 = vrot.lane.b32.xlu2 %v463_v5, %s3164_s16 }
 0x1b0   :  { %v3507_v6 = vpop.f32.mrf.mxu1 }
 0x1b8   :  { %v3509_v7 = vpop.f32.mrf.mxu1 }
 0x1c0   :  { %v3511_v10 = vpop.f32.mrf.mxu1 }
 0x1c1   :  { %v3515_v11 = vadd.f32 %v3485_v46, %v3511_v10 }
 0x1c3   :  { %v478_v12 = vadd.f32 %v3452_v17, %v3515_v11 }
 0x1c5   :  { %v2823_v13 = vmul.f32 -1.442695, %v478_v12 }
 0x1c7   :  { %2924 = vpow2.f32 %v2823_v13 }
 0x1cd   :  { %v2925_v14 = vpop.eup %2924 }
 0x1ce   :  { %v482_v16 = vadd.f32 1.0, %v2925_v14 }
 0x1d0   :  { %2926 = vrcp.f32 %v482_v16  ;;  %v494_v24 = vand.u32 2147483648, %v482_v16  ;;  %v492_v28 = vand.u32 2147483647, %v482_v16  ;;  %vm488_vm0 = vweird.f32 %v482_v16 }
 0x1d2   :  { %v495_v33 = vor.u32 1.1754944e-38, %v494_v24  ;;  %vm493_vm3 = vcmp.eq.f32.partialorder %v492_v28, 8.507059e+37 }
 0x1d6   :  { %v2927_v20 = vpop.eup %2926 }
 0x1d7   :  { %v484_v21 = vmul.f32 %v2927_v20, %v482_v16  ;;  %vm489_vm15 = vweird.f32 %v2927_v20 }
 0x1d8   :  { %vm490_vm2 = vmor %vm488_vm0, %vm489_vm15 }
 0x1d9   :  { %v485_v22 = vsub.f32 1.0, %v484_v21  ;;  %v3549_v21 = vadd.f32 %v3485_v46, %v3509_v7 }
 0x1db   :  { %v486_v26 = vmul.f32 %v2927_v20, %v485_v22 }
 0x1dd   :  { %v487_v32 = vadd.f32 %v2927_v20, %v486_v26 }
 0x1df   :  { %v491_v34 = vsel %vm490_vm2, %v2927_v20, %v487_v32  ;;  %v3545_v20 = vadd.f32 %v3485_v46, %v3495_v51 }
 0x1e0   :  { %v496_v36 = vsel %vm493_vm3, %v495_v33, %v491_v34 }
 0x1e1   :  { %v498_v37 = vmul.f32 %v496_v36, %v3501_v63  ;;  %v505_v59 = vsub.f32 1.0, %v496_v36  ;;  %v511_v61 = vmul.f32 0.0, %v496_v36 }
 0x1e3   :  { %500 = vrot.lane.b32.xlu0 %v498_v37, %s3164_s16 }
 0x205   :  { %v466_v41 = vpop.permute.xlu2 %465 }
 0x206   :  { %v468_v43 = vadd.f32 %v466_v41, %v3491_v48 }
 0x208   :  { %2928 = vtanh.f32 %v468_v43 }
 0x20e   :  { %v2929_v44 = vpop.eup %2928 }
 0x20f   :  { %472 = vrot.lane.b32.xlu1 %v2929_v44, %s3165_s17 }
 0x255   :  { %v501_v45 = vpop.permute.xlu0 %500 }
 0x256   :  { %v503_v49 = vadd.f32 %v501_v45, %v3515_v11 }
 0x258   :  { %2930 = vtanh.f32 %v503_v49 }
 0x25e   :  { %v2931_v50 = vpop.eup %2930 }
 0x25f   :  { %507 = vrot.lane.b32.xlu2 %v2931_v50, %s3165_s17 }
 0x281   :  { %v473_v53 = vpop.permute.xlu1 %472 }
 0x282   :  { %v475_v56 = vmul.f32 %v473_v53, %v470_v52 }
 0x284   :  { %v3525_v58 = vadd.f32 %v476_v55, %v475_v56 }
 0x286   :  { %514 = vrot.lane.b32.xlu0 %v3525_v58, %s3165_s17 }
 0x2b9   :  { %v508_v60 = vpop.permute.xlu2 %507 }
 0x2ba   :  { %v510_v62 = vmul.f32 %v508_v60, %v505_v59 }
 0x2bc   :  { %v3529_v1 = vadd.f32 %v511_v61, %v510_v62 }
 0x2be   :  { %518 = vrot.lane.b32.xlu1 %v3529_v1, %s3166_s5 }
 0x2f8   :  { %v3533_v2 = vpop.permute.xlu0 %514 }
 0x330   :  { %v3535_v4 = vpop.permute.xlu1 %518 }
 0x331   :  { %v522_v5 = vsel %vm521_vm4, %v3533_v2, %v3535_v4 }
 0x332   :  { %v523_v12 = vpack.c.bf16 %v522_v5, %v522_v5 }
 0x334   :  { %2824 = vmatmul.msk.bf16.vlgmr.msra.gmra.mxu3 %vm300_vm1, %v523_v12 }
 0x3b7   :  { %v536_v13 = vpop.f32.mrf.mxu3 }
 0x3b8   :  { %v537_v14 = vadd.f32 %v3449_v15, %v536_v13 }
 0x3ba   :  { %561 = vrot.lane.b32.xlu2 %v537_v14, %s3163_s28  ;;  %v540_v22 = vadd.f32 %v537_v14, %v3545_v20  ;;  %v579_v24 = vadd.f32 %v537_v14, %v3549_v21 }
 0x3bc   :  { %v2825_v26 = vmul.f32 -1.442695, %v540_v22  ;;  %v2826_v28 = vmul.f32 -1.442695, %v579_v24 }
 0x3be   :  { %2932 = vpow2.f32 %v2825_v26 }
 0x3bf   :  { %v538_v16 = vpop.f32.mrf.mxu3  ;;  %2934 = vpow2.f32 %v2826_v28 }
 0x3c4   :  { %v2933_v32 = vpop.eup %2932 }
 0x3c5   :  { %v2935_v33 = vpop.eup %2934  ;;  %v544_v34 = vadd.f32 1.0, %v2933_v32 }
 0x3c6   :  { %v583_v36 = vadd.f32 1.0, %v2935_v33 }
 0x3c7   :  { %2936 = vrcp.f32 %v544_v34  ;;  %vm550_vm7 = vweird.f32 %v544_v34  ;;  %v556_v56 = vand.u32 2147483648, %v544_v34  ;;  %v554_v60 = vand.u32 2147483647, %v544_v34 }
 0x3c8   :  { %2938 = vrcp.f32 %v583_v36  ;;  %v595_v59 = vand.u32 2147483648, %v583_v36  ;;  %vm589_vm9 = vweird.f32 %v583_v36  ;;  %v593_v61 = vand.u32 2147483647, %v583_v36 }
 0x3c9   :  { %v557_v12 = vor.u32 1.1754944e-38, %v556_v56  ;;  %vm555_vm11 = vcmp.eq.f32.partialorder %v554_v60, 8.507059e+37 }
 0x3ca   :  { %v596_v13 = vor.u32 1.1754944e-38, %v595_v59  ;;  %vm594_vm12 = vcmp.eq.f32.partialorder %v593_v61, 8.507059e+37 }
 0x3cd   :  { %v2937_v37 = vpop.eup %2936 }
 0x3ce   :  { %v2939_v41 = vpop.eup %2938  ;;  %v546_v43 = vmul.f32 %v2937_v37, %v544_v34  ;;  %vm551_vm5 = vweird.f32 %v2937_v37 }
 0x3cf   :  { %v585_v44 = vmul.f32 %v2939_v41, %v583_v36  ;;  %vm590_vm6 = vweird.f32 %v2939_v41  ;;  %vm552_vm8 = vmor %vm550_vm7, %vm551_vm5 }
 0x3d0   :  { %v547_v45 = vsub.f32 1.0, %v546_v43  ;;  %vm591_vm10 = vmor %vm589_vm9, %vm590_vm6 }
 0x3d1   :  { %v586_v49 = vsub.f32 1.0, %v585_v44 }
 0x3d2   :  { %v548_v50 = vmul.f32 %v2937_v37, %v547_v45 }
 0x3d3   :  { %v587_v52 = vmul.f32 %v2939_v41, %v586_v49 }
 0x3d4   :  { %v549_v53 = vadd.f32 %v2937_v37, %v548_v50 }
 0x3d5   :  { %v588_v55 = vadd.f32 %v2939_v41, %v587_v52 }
 0x3d6   :  { %v553_v62 = vsel %vm552_vm8, %v2937_v37, %v549_v53 }
 0x3d7   :  { %v592_v5 = vsel %vm591_vm10, %v2939_v41, %v588_v55  ;;  %v558_v16 = vsel %vm555_vm11, %v557_v12, %v553_v62  ;;  %v3587_v12 = vadd.f32 %v3485_v46, %v3497_v54 }
 0x3d8   :  { %v597_v22 = vsel %vm594_vm12, %v596_v13, %v592_v5  ;;  %v571_v41 = vsub.f32 1.0, %v558_v16  ;;  %v577_v44 = vmul.f32 %v558_v16, %v3525_v58  ;;  %v3591_v13 = vadd.f32 %v3485_v46, %v3507_v6 }
 0x3d9   :  { %v606_v50 = vsub.f32 1.0, %v597_v22  ;;  %v612_v53 = vmul.f32 %v597_v22, %v3529_v1 }
 0x414   :  { %v562_v14 = vpop.permute.xlu2 %561 }
 0x415   :  { %v564_v24 = vmul.f32 %v562_v14, %v558_v16  ;;  %v599_v26 = vmul.f32 %v597_v22, %v562_v14 }
 0x417   :  { %601 = vrot.lane.b32.xlu1 %v599_v26, %s3164_s16  ;;  %566 = vrot.lane.b32.xlu0 %v564_v24, %s3164_s16 }
 0x489   :  { %v602_v28 = vpop.permute.xlu1 %601  ;;  %v567_v32 = vpop.permute.xlu0 %566 }
 0x48a   :  { %v604_v33 = vadd.f32 %v602_v28, %v3549_v21  ;;  %v569_v34 = vadd.f32 %v567_v32, %v3545_v20 }
 0x48c   :  { %2940 = vtanh.f32 %v604_v33 }
 0x48d   :  { %2942 = vtanh.f32 %v569_v34 }
 0x492   :  { %v2941_v36 = vpop.eup %2940 }
 0x493   :  { %v2943_v37 = vpop.eup %2942  ;;  %608 = vrot.lane.b32.xlu0 %v2941_v36, %s3165_s17 }
 0x494   :  { %573 = vrot.lane.b32.xlu2 %v2943_v37, %s3165_s17 }
 0x4ee   :  { %v574_v43 = vpop.permute.xlu2 %573 }
 0x4ef   :  { %v576_v45 = vmul.f32 %v574_v43, %v571_v41 }
 0x4f1   :  { %v3560_v49 = vadd.f32 %v577_v44, %v576_v45 }
 0x4f3   :  { %615 = vrot.lane.b32.xlu1 %v3560_v49, %s3165_s17 }
 0x505   :  { %v609_v52 = vpop.permute.xlu0 %608 }
 0x506   :  { %v611_v55 = vmul.f32 %v609_v52, %v606_v50 }
 0x508   :  { %v3565_v56 = vadd.f32 %v612_v53, %v611_v55 }
 0x50a   :  { %619 = vrot.lane.b32.xlu2 %v3565_v56, %s3166_s5 }
 0x564   :  { %v3569_v59 = vpop.permute.xlu2 %619 }
 0x565   :  { %v3571_v60 = vpop.permute.xlu1 %615 }
 0x566   :  { %v622_v58 = vsel %vm521_vm4, %v3571_v60, %v3569_v59 }
 0x567   :  { %v623_v61 = vpack.c.bf16 %v622_v58, %v622_v58 }
 0x569   :  { %2827 = vmatmul.msk.bf16.vlgmr.msrb.gmra.mxu0 %vm300_vm1, %v623_v61 }
 0x56a   :  { %1849 = vmatpush.bf16.xpose.msrb.mxu0 %v3312_v23 }
 0x572   :  { %1850 = vmatpush.bf16.xpose.msrb.mxu0 %v3321_v25 }
 0x57a   :  { %1851 = vmatpush.bf16.xpose.msrb.mxu0 %v3330_v27 }
 0x582   :  { %1852 = vmatpush.bf16.xpose.msrb.mxu0 %v3339_v31 }
 0x58a   :  { %1853 = vmatpush.bf16.xpose.msrb.mxu0 %v3354_v40 }
 0x592   :  { %1854 = vmatpush.bf16.xpose.msrb.mxu0 %v3364_v42 }
 0x5e6   :  { %v636_v1 = vpop.f32.mrf.mxu0 }
 0x5e7   :  { %v637_v62 = vadd.f32 %v3449_v15, %v636_v1 }
 0x5e9   :  { %661 = vrot.lane.b32.xlu0 %v637_v62, %s3163_s28  ;;  %v640_v14 = vadd.f32 %v637_v62, %v3587_v12  ;;  %v679_v16 = vadd.f32 %v637_v62, %v3591_v13 }
 0x5eb   :  { %v2828_v22 = vmul.f32 -1.442695, %v640_v14  ;;  %v2829_v24 = vmul.f32 -1.442695, %v679_v16 }
 0x5ed   :  { %2944 = vpow2.f32 %v2828_v22 }
 0x5ee   :  { %v638_v5 = vpop.f32.mrf.mxu0  ;;  %2946 = vpow2.f32 %v2829_v24 }
 0x5f3   :  { %v2945_v26 = vpop.eup %2944 }
 0x5f4   :  { %v2947_v28 = vpop.eup %2946  ;;  %v644_v32 = vadd.f32 1.0, %v2945_v26 }
 0x5f5   :  { %v683_v33 = vadd.f32 1.0, %v2947_v28 }
 0x5f6   :  { %2948 = vrcp.f32 %v644_v32  ;;  %vm650_vm15 = vweird.f32 %v644_v32  ;;  %v656_v55 = vand.u32 2147483648, %v644_v32  ;;  %v654_v61 = vand.u32 2147483647, %v644_v32 }
 0x5f7   :  { %2950 = vrcp.f32 %v683_v33  ;;  %v695_v58 = vand.u32 2147483648, %v683_v33  ;;  %vm689_vm2 = vweird.f32 %v683_v33  ;;  %v693_v1 = vand.u32 2147483647, %v683_v33 }
 0x5f8   :  { %v657_v14 = vor.u32 1.1754944e-38, %v656_v55  ;;  %vm655_vm5 = vcmp.eq.f32.partialorder %v654_v61, 8.507059e+37 }
 0x5f9   :  { %v696_v16 = vor.u32 1.1754944e-38, %v695_v58  ;;  %vm694_vm6 = vcmp.eq.f32.partialorder %v693_v1, 8.507059e+37 }
 0x5fc   :  { %v2949_v34 = vpop.eup %2948 }
 0x5fd   :  { %v2951_v36 = vpop.eup %2950  ;;  %v646_v37 = vmul.f32 %v2949_v34, %v644_v32  ;;  %vm651_vm13 = vweird.f32 %v2949_v34 }
 0x5fe   :  { %v685_v41 = vmul.f32 %v2951_v36, %v683_v33  ;;  %vm690_vm14 = vweird.f32 %v2951_v36  ;;  %vm652_vm0 = vmor %vm650_vm15, %vm651_vm13 }
 0x5ff   :  { %v647_v43 = vsub.f32 1.0, %v646_v37  ;;  %vm691_vm3 = vmor %vm689_vm2, %vm690_vm14 }
 0x600   :  { %v686_v44 = vsub.f32 1.0, %v685_v41 }
 0x601   :  { %v648_v45 = vmul.f32 %v2949_v34, %v647_v43 }
 0x602   :  { %v687_v50 = vmul.f32 %v2951_v36, %v686_v44 }
 0x603   :  { %v649_v52 = vadd.f32 %v2949_v34, %v648_v45 }
 0x604   :  { %v688_v53 = vadd.f32 %v2951_v36, %v687_v50 }
 0x605   :  { %v653_v62 = vsel %vm652_vm0, %v2949_v34, %v649_v52 }
 0x606   :  { %v692_v5 = vsel %vm691_vm3, %v2951_v36, %v688_v53  ;;  %v658_v24 = vsel %vm655_vm5, %v657_v14, %v653_v62 }
 0x607   :  { %v697_v26 = vsel %vm694_vm6, %v696_v16, %v692_v5  ;;  %v671_v55 = vsub.f32 1.0, %v658_v24  ;;  %v677_v61 = vmul.f32 %v658_v24, %v3560_v49 }
 0x608   :  { %v706_v44 = vsub.f32 1.0, %v697_v26  ;;  %v712_v50 = vmul.f32 %v697_v26, %v3565_v56 }
 0x65b   :  { %v662_v22 = vpop.permute.xlu0 %661 }
 0x65c   :  { %v664_v28 = vmul.f32 %v662_v22, %v658_v24  ;;  %v699_v37 = vmul.f32 %v697_v26, %v662_v22  ;;  %v3629_v26 = vadd.f32 %v3485_v46, %v3499_v57 }
 0x65e   :  { %701 = vrot.lane.b32.xlu2 %v699_v37, %s3164_s16  ;;  %666 = vrot.lane.b32.xlu1 %v664_v28, %s3164_s16  ;;  %v3633_v28 = vadd.f32 %v3485_v46, %v3503_v3 }
 0x6b8   :  { %v702_v41 = vpop.permute.xlu2 %701 }
 0x6b9   :  { %v704_v32 = vadd.f32 %v702_v41, %v3591_v13 }
 0x6bb   :  { %2952 = vtanh.f32 %v704_v32 }
 0x6c1   :  { %v2953_v33 = vpop.eup %2952 }
 0x6c2   :  { %708 = vrot.lane.b32.xlu1 %v2953_v33, %s3165_s17 }
 0x6d0   :  { %v667_v34 = vpop.permute.xlu1 %666 }
 0x6d1   :  { %v669_v36 = vadd.f32 %v667_v34, %v3587_v12 }
 0x6d3   :  { %2954 = vtanh.f32 %v669_v36 }
 0x6d9   :  { %v2955_v43 = vpop.eup %2954 }
 0x6da   :  { %673 = vrot.lane.b32.xlu0 %v2955_v43, %s3165_s17 }
 0x734   :  { %v709_v45 = vpop.permute.xlu1 %708 }
 0x735   :  { %v711_v52 = vmul.f32 %v709_v45, %v706_v44 }
 0x737   :  { %v3602_v53 = vadd.f32 %v712_v50, %v711_v52 }
 0x739   :  { %719 = vrot.lane.b32.xlu0 %v3602_v53, %s3166_s5 }
 0x74c   :  { %v674_v58 = vpop.permute.xlu0 %673 }
 0x74d   :  { %v676_v1 = vmul.f32 %v674_v58, %v671_v55 }
 0x74f   :  { %v3607_v62 = vadd.f32 %v677_v61, %v676_v1 }
 0x751   :  { %715 = vrot.lane.b32.xlu2 %v3607_v62, %s3165_s17 }
 0x7ab   :  { %v3611_v5 = vpop.permute.xlu2 %715  ;;  %v3613_v14 = vpop.permute.xlu0 %719 }
 0x7ac   :  { %v722_v56 = vsel %vm521_vm4, %v3611_v5, %v3613_v14 }
 0x7ad   :  { %v723_v16 = vpack.c.bf16 %v722_v56, %v722_v56 }
 0x7af   :  { %2830 = vmatmul.msk.bf16.vlgmr.msrb.gmra.mxu2 %vm300_vm1, %v723_v16 }
 0x7b0   :  { %2049 = vmatpush.bf16.xpose.msrb.mxu2 %v3312_v23 }
 0x7b8   :  { %2050 = vmatpush.bf16.xpose.msrb.mxu2 %v3321_v25 }
 0x7c0   :  { %2051 = vmatpush.bf16.xpose.msrb.mxu2 %v3330_v27 }
 0x7c8   :  { %2052 = vmatpush.bf16.xpose.msrb.mxu2 %v3339_v31 }
 0x7d0   :  { %2053 = vmatpush.bf16.xpose.msrb.mxu2 %v3354_v40 }
 0x7d8   :  { %2054 = vmatpush.bf16.xpose.msrb.mxu2 %v3364_v42 }
 0x832   :  { %v736_v49 = vpop.f32.mrf.mxu2 }
 0x833   :  { %v737_v22 = vadd.f32 %v3449_v15, %v736_v49 }
 0x835   :  { %761 = vrot.lane.b32.xlu1 %v737_v22, %s3163_s28  ;;  %v740_v37 = vadd.f32 %v737_v22, %v3629_v26  ;;  %v779_v41 = vadd.f32 %v737_v22, %v3633_v28 }
 0x837   :  { %v2831_v32 = vmul.f32 -1.442695, %v740_v37  ;;  %v2832_v33 = vmul.f32 -1.442695, %v779_v41 }
 0x839   :  { %2956 = vpow2.f32 %v2831_v32 }
 0x83a   :  { %v738_v24 = vpop.f32.mrf.mxu2  ;;  %2958 = vpow2.f32 %v2832_v33 }
 0x83f   :  { %v2957_v34 = vpop.eup %2956 }
 0x840   :  { %v2959_v36 = vpop.eup %2958  ;;  %v744_v43 = vadd.f32 1.0, %v2957_v34 }
 0x841   :  { %v783_v44 = vadd.f32 1.0, %v2959_v36 }
 0x842   :  { %2960 = vrcp.f32 %v744_v43  ;;  %vm750_vm9 = vweird.f32 %v744_v43  ;;  %v756_v49 = vand.u32 2147483648, %v744_v43  ;;  %v754_v24 = vand.u32 2147483647, %v744_v43 }
 0x843   :  { %2962 = vrcp.f32 %v783_v44  ;;  %v795_v22 = vand.u32 2147483648, %v783_v44  ;;  %vm789_vm11 = vweird.f32 %v783_v44  ;;  %v793_v37 = vand.u32 2147483647, %v783_v44 }
 0x844   :  { %v757_v33 = vor.u32 1.1754944e-38, %v756_v49  ;;  %vm755_vm13 = vcmp.eq.f32.partialorder %v754_v24, 8.507059e+37 }
 0x845   :  { %v796_v34 = vor.u32 1.1754944e-38, %v795_v22  ;;  %vm794_vm14 = vcmp.eq.f32.partialorder %v793_v37, 8.507059e+37 }
 0x848   :  { %v2961_v45 = vpop.eup %2960 }
 0x849   :  { %v2963_v50 = vpop.eup %2962  ;;  %v746_v52 = vmul.f32 %v2961_v45, %v744_v43  ;;  %vm751_vm7 = vweird.f32 %v2961_v45 }
 0x84a   :  { %v785_v55 = vmul.f32 %v2963_v50, %v783_v44  ;;  %vm790_vm8 = vweird.f32 %v2963_v50  ;;  %vm752_vm10 = vmor %vm750_vm9, %vm751_vm7 }
 0x84b   :  { %v747_v46 = vsub.f32 1.0, %v746_v52  ;;  %vm791_vm12 = vmor %vm789_vm11, %vm790_vm8 }
 0x84c   :  { %v786_v58 = vsub.f32 1.0, %v785_v55 }
 0x84d   :  { %v748_v61 = vmul.f32 %v2961_v45, %v747_v46 }
 0x84e   :  { %v787_v1 = vmul.f32 %v2963_v50, %v786_v58 }
 0x84f   :  { %v749_v56 = vadd.f32 %v2961_v45, %v748_v61 }
 0x850   :  { %v788_v16 = vadd.f32 %v2963_v50, %v787_v1 }
 0x851   :  { %v753_v41 = vsel %vm752_vm10, %v2961_v45, %v749_v56 }
 0x852   :  { %v792_v32 = vsel %vm791_vm12, %v2963_v50, %v788_v16  ;;  %v758_v52 = vsel %vm755_vm13, %v757_v33, %v753_v41 }
 0x853   :  { %v797_v55 = vsel %vm794_vm14, %v796_v34, %v792_v32  ;;  %v771_v56 = vsub.f32 1.0, %v758_v52  ;;  %v777_v24 = vmul.f32 %v758_v52, %v3607_v62 }
 0x854   :  { %v806_v16 = vsub.f32 1.0, %v797_v55  ;;  %v812_v41 = vmul.f32 %v797_v55, %v3602_v53 }
 0x8a7   :  { %v762_v36 = vpop.permute.xlu1 %761 }
 0x8a8   :  { %v764_v46 = vmul.f32 %v762_v36, %v758_v52  ;;  %v799_v58 = vmul.f32 %v797_v55, %v762_v36 }
 0x8aa   :  { %801 = vrot.lane.b32.xlu0 %v799_v58, %s3164_s16  ;;  %766 = vrot.lane.b32.xlu2 %v764_v46, %s3164_s16 }
 0x904   :  { %v767_v61 = vpop.permute.xlu2 %766 }
 0x905   :  { %v769_v43 = vadd.f32 %v767_v61, %v3629_v26 }
 0x907   :  { %2964 = vtanh.f32 %v769_v43 }
 0x90d   :  { %v2965_v44 = vpop.eup %2964 }
 0x90e   :  { %773 = vrot.lane.b32.xlu1 %v2965_v44, %s3165_s17 }
 0x91c   :  { %v802_v45 = vpop.permute.xlu0 %801 }
 0x91d   :  { %v804_v50 = vadd.f32 %v802_v45, %v3633_v28 }
 0x91f   :  { %2966 = vtanh.f32 %v804_v50 }
 0x925   :  { %v2967_v1 = vpop.eup %2966 }
 0x926   :  { %808 = vrot.lane.b32.xlu2 %v2967_v1, %s3165_s17 }
 0x980   :  { %v774_v49 = vpop.permute.xlu1 %773  ;;  %v809_v22 = vpop.permute.xlu2 %808 }
 0x981   :  { %v776_v37 = vmul.f32 %v774_v49, %v771_v56  ;;  %v811_v32 = vmul.f32 %v809_v22, %v806_v16 }
 0x983   :  { %v3645_v33 = vadd.f32 %v777_v24, %v776_v37  ;;  %v3647_v34 = vadd.f32 %v812_v41, %v811_v32 }
 0x985   :  { %815 = vrot.lane.b32.xlu0 %v3645_v33, %s3165_s17  ;;  %819 = vrot.lane.b32.xlu1 %v3647_v34, %s3166_s5 }
 0x9f7   :  { %v3653_v36 = vpop.permute.xlu0 %815  ;;  %v3655_v46 = vpop.permute.xlu1 %819 }
 0x9f8   :  { %v822_v62 = vsel %vm521_vm4, %v3653_v36, %v3655_v46 }
 0x9f9   :  { %v823_v53 = vpack.c.bf16 %v822_v62, %v822_v62 }
 0x9fb   :  { %2833 = vmatmul.msk.bf16.vlgmr.msrb.gmra.mxu3 %vm300_vm1, %v823_v53 }
 0xa7e   :  { %v836_v52 = vpop.f32.mrf.mxu3 }
 0xa7f   :  { %v837_v55 = vadd.f32 %v3449_v15, %v836_v52 }
 0xa81   :  { %861 = vrot.lane.b32.xlu2 %v837_v55, %s3163_s28  ;;  %v840_v61 = vadd.f32 %v837_v55, %v3633_v28  ;;  %v879_v43 = vadd.f32 %v837_v55, %v3629_v26 }
 0xa83   :  { %v2834_v44 = vmul.f32 -1.442695, %v840_v61  ;;  %v2835_v45 = vmul.f32 -1.442695, %v879_v43 }
 0xa85   :  { %2968 = vpow2.f32 %v2834_v44 }
 0xa86   :  { %v838_v58 = vpop.f32.mrf.mxu3  ;;  %2970 = vpow2.f32 %v2835_v45 }
 0xa8b   :  { %v2969_v50 = vpop.eup %2968 }
 0xa8c   :  { %v2971_v1 = vpop.eup %2970  ;;  %v844_v56 = vadd.f32 1.0, %v2969_v50 }
 0xa8d   :  { %v883_v16 = vadd.f32 1.0, %v2971_v1 }
 0xa8e   :  { %2972 = vrcp.f32 %v844_v56  ;;  %vm850_vm2 = vweird.f32 %v844_v56  ;;  %v856_v58 = vand.u32 2147483648, %v844_v56  ;;  %v854_v43 = vand.u32 2147483647, %v844_v56 }
 0xa8f   :  { %2974 = vrcp.f32 %v883_v16  ;;  %v895_v61 = vand.u32 2147483648, %v883_v16  ;;  %vm889_vm5 = vweird.f32 %v883_v16  ;;  %v893_v44 = vand.u32 2147483647, %v883_v16 }
 0xa90   :  { %v857_v1 = vor.u32 1.1754944e-38, %v856_v58  ;;  %vm855_vm7 = vcmp.eq.f32.partialorder %v854_v43, 8.507059e+37 }
 0xa91   :  { %v896_v0 = vor.u32 1.1754944e-38, %v895_v61  ;;  %vm894_vm8 = vcmp.eq.f32.partialorder %v893_v44, 8.507059e+37 }
 0xa94   :  { %v2973_v49 = vpop.eup %2972 }
 0xa95   :  { %v2975_v22 = vpop.eup %2974  ;;  %v846_v24 = vmul.f32 %v2973_v49, %v844_v56  ;;  %vm851_vm15 = vweird.f32 %v2973_v49 }
 0xa96   :  { %v885_v37 = vmul.f32 %v2975_v22, %v883_v16  ;;  %vm890_vm0 = vweird.f32 %v2975_v22  ;;  %vm852_vm3 = vmor %vm850_vm2, %vm851_vm15 }
 0xa97   :  { %v847_v41 = vsub.f32 1.0, %v846_v24  ;;  %vm891_vm6 = vmor %vm889_vm5, %vm890_vm0 }
 0xa98   :  { %v886_v32 = vsub.f32 1.0, %v885_v37 }
 0xa99   :  { %v848_v62 = vmul.f32 %v2973_v49, %v847_v41 }
 0xa9a   :  { %v887_v53 = vmul.f32 %v2975_v22, %v886_v32 }
 0xa9b   :  { %v849_v52 = vadd.f32 %v2973_v49, %v848_v62 }
 0xa9c   :  { %v888_v55 = vadd.f32 %v2975_v22, %v887_v53 }
 0xa9d   :  { %v853_v45 = vsel %vm852_vm3, %v2973_v49, %v849_v52 }
 0xa9e   :  { %v892_v50 = vsel %vm891_vm6, %v2975_v22, %v888_v55  ;;  %v858_v37 = vsel %vm855_vm7, %v857_v1, %v853_v45 }
 0xa9f   :  { %v897_v41 = vsel %vm894_vm8, %v896_v0, %v892_v50  ;;  %v871_v0 = vsub.f32 1.0, %v858_v37  ;;  %v877_v58 = vmul.f32 %v858_v37, %v3645_v33 }
 0xaa0   :  { %v912_v44 = vmul.f32 %v897_v41, %v3647_v34 }
 0xadb   :  { %v862_v24 = vpop.permute.xlu2 %861 }
 0xadc   :  { %v864_v32 = vmul.f32 %v862_v24, %v858_v37  ;;  %v899_v62 = vmul.f32 %v897_v41, %v862_v24 }
 0xade   :  { %901 = vrot.lane.b32.xlu1 %v899_v62, %s3164_s16  ;;  %866 = vrot.lane.b32.xlu0 %v864_v32, %s3164_s16 }
 0xb50   :  { %v902_v53 = vpop.permute.xlu1 %901  ;;  %v867_v56 = vpop.permute.xlu0 %866 }
 0xb51   :  { %v904_v16 = vadd.f32 %v902_v53, %v3629_v26  ;;  %v869_v49 = vadd.f32 %v867_v56, %v3633_v28  ;;  %v906_v26 = vsub.f32 1.0, %v897_v41 }
 0xb53   :  { %2976 = vtanh.f32 %v904_v16 }
 0xb54   :  { %2978 = vtanh.f32 %v869_v49 }
 0xb59   :  { %v2977_v22 = vpop.eup %2976 }
 0xb5a   :  { %v2979_v52 = vpop.eup %2978  ;;  %908 = vrot.lane.b32.xlu0 %v2977_v22, %s3165_s17 }
 0xb5b   :  { %873 = vrot.lane.b32.xlu2 %v2979_v52, %s3165_s17 }
 0xbb5   :  { %v874_v55 = vpop.permute.xlu2 %873 }
 0xbb6   :  { %v876_v61 = vmul.f32 %v874_v55, %v871_v0 }
 0xbb8   :  { %v3672_v43 = vadd.f32 %v877_v58, %v876_v61 }
 0xbba   :  { %915 = vrot.lane.b32.xlu1 %v3672_v43, %s3165_s17 }
 0xbcc   :  { %v909_v28 = vpop.permute.xlu0 %908 }
 0xbcd   :  { %v911_v45 = vmul.f32 %v909_v28, %v906_v26 }
 0xbcf   :  { %v3677_v50 = vadd.f32 %v912_v44, %v911_v45 }
 0xbd1   :  { %919 = vrot.lane.b32.xlu2 %v3677_v50, %s3166_s5 }
 0xc2b   :  { %v3681_v1 = vpop.permute.xlu2 %919 }
 0xc2c   :  { %v3683_v24 = vpop.permute.xlu1 %915 }
 0xc2d   :  { %v922_v33 = vsel %vm521_vm4, %v3683_v24, %v3681_v1 }
 0xc2e   :  { %v923_v37 = vpack.c.bf16 %v922_v33, %v922_v33 }
 0xc30   :  { %2836 = vmatmul.msk.bf16.vlgmr.msrb.gmra.mxu1 %vm300_vm1, %v923_v37 }
 0xc31   :  { %2149 = vmatpush.bf16.xpose.msrb.mxu1 %v3312_v23 }
 0xc39   :  { %2150 = vmatpush.bf16.xpose.msrb.mxu1 %v3321_v25 }
 0xc41   :  { %2151 = vmatpush.bf16.xpose.msrb.mxu1 %v3330_v27 }
 0xc49   :  { %2152 = vmatpush.bf16.xpose.msrb.mxu1 %v3339_v31 }
 0xc51   :  { %2153 = vmatpush.bf16.xpose.msrb.mxu1 %v3354_v40 }
 0xc59   :  { %2154 = vmatpush.bf16.xpose.msrb.mxu1 %v3364_v42 }
 0xcad   :  { %v936_v34 = vpop.f32.mrf.mxu1 }
 0xcae   :  { %v937_v41 = vadd.f32 %v3449_v15, %v936_v34 }
 0xcb0   :  { %961 = vrot.lane.b32.xlu0 %v937_v41, %s3163_s28  ;;  %v940_v62 = vadd.f32 %v937_v41, %v3591_v13  ;;  %v979_v53 = vadd.f32 %v937_v41, %v3587_v12 }
 0xcb2   :  { %v2837_v56 = vmul.f32 -1.442695, %v940_v62  ;;  %v2838_v16 = vmul.f32 -1.442695, %v979_v53 }
 0xcb4   :  { %2980 = vpow2.f32 %v2837_v56 }
 0xcb5   :  { %v938_v32 = vpop.f32.mrf.mxu1  ;;  %2982 = vpow2.f32 %v2838_v16 }
 0xcba   :  { %v2981_v49 = vpop.eup %2980 }
 0xcbb   :  { %v2983_v22 = vpop.eup %2982  ;;  %v944_v52 = vadd.f32 1.0, %v2981_v49 }
 0xcbc   :  { %v983_v0 = vadd.f32 1.0, %v2983_v22 }
 0xcbd   :  { %2984 = vrcp.f32 %v944_v52  ;;  %vm950_vm11 = vweird.f32 %v944_v52  ;;  %v956_v34 = vand.u32 2147483648, %v944_v52  ;;  %v954_v32 = vand.u32 2147483647, %v944_v52 }
 0xcbe   :  { %2986 = vrcp.f32 %v983_v0  ;;  %v995_v41 = vand.u32 2147483648, %v983_v0  ;;  %vm989_vm13 = vweird.f32 %v983_v0  ;;  %v993_v62 = vand.u32 2147483647, %v983_v0 }
 0xcbf   :  { %v957_v16 = vor.u32 1.1754944e-38, %v956_v34  ;;  %vm955_vm15 = vcmp.eq.f32.partialorder %v954_v32, 8.507059e+37 }
 0xcc0   :  { %v996_v49 = vor.u32 1.1754944e-38, %v995_v41  ;;  %vm994_vm0 = vcmp.eq.f32.partialorder %v993_v62, 8.507059e+37 }
 0xcc3   :  { %v2985_v55 = vpop.eup %2984 }
 0xcc4   :  { %v2987_v58 = vpop.eup %2986  ;;  %v946_v15 = vmul.f32 %v2985_v55, %v944_v52  ;;  %vm951_vm9 = vweird.f32 %v2985_v55 }
 0xcc5   :  { %v985_v61 = vmul.f32 %v2987_v58, %v983_v0  ;;  %vm990_vm10 = vweird.f32 %v2987_v58  ;;  %vm952_vm12 = vmor %vm950_vm11, %vm951_vm9 }
 0xcc6   :  { %v947_v26 = vsub.f32 1.0, %v946_v15  ;;  %vm991_vm14 = vmor %vm989_vm13, %vm990_vm10 }
 0xcc7   :  { %v986_v28 = vsub.f32 1.0, %v985_v61 }
 0xcc8   :  { %v948_v44 = vmul.f32 %v2985_v55, %v947_v26 }
 0xcc9   :  { %v987_v45 = vmul.f32 %v2987_v58, %v986_v28 }
 0xcca   :  { %v949_v33 = vadd.f32 %v2985_v55, %v948_v44 }
 0xccb   :  { %v988_v37 = vadd.f32 %v2987_v58, %v987_v45 }
 0xccc   :  { %v953_v53 = vsel %vm952_vm12, %v2985_v55, %v949_v33 }
 0xccd   :  { %v992_v56 = vsel %vm991_vm14, %v2987_v58, %v988_v37  ;;  %v958_v15 = vsel %vm955_vm15, %v957_v16, %v953_v53 }
 0xcce   :  { %v997_v61 = vsel %vm994_vm0, %v996_v49, %v992_v56  ;;  %v977_v53 = vmul.f32 %v958_v15, %v3672_v43 }
 0xccf   :  { %v1006_v33 = vsub.f32 1.0, %v997_v61  ;;  %v1012_v34 = vmul.f32 %v997_v61, %v3677_v50 }
 0xd22   :  { %v962_v22 = vpop.permute.xlu0 %961 }
 0xd23   :  { %v964_v26 = vmul.f32 %v962_v22, %v958_v15  ;;  %v999_v28 = vmul.f32 %v997_v61, %v962_v22 }
 0xd25   :  { %1001 = vrot.lane.b32.xlu2 %v999_v28, %s3164_s16  ;;  %966 = vrot.lane.b32.xlu1 %v964_v26, %s3164_s16 }
 0xd7f   :  { %v1002_v44 = vpop.permute.xlu2 %1001 }
 0xd80   :  { %v1004_v52 = vadd.f32 %v1002_v44, %v3587_v12  ;;  %v971_v12 = vsub.f32 1.0, %v958_v15  ;;  %v3732_v15 = vld [vmem:[%s4588_s7] ss:$0 sm:$0xff] }
 0xd82   :  { %2988 = vtanh.f32 %v1004_v52 }
 0xd88   :  { %v2989_v0 = vpop.eup %2988 }
 0xd89   :  { %1008 = vrot.lane.b32.xlu1 %v2989_v0, %s3165_s17 }
 0xd97   :  { %v967_v55 = vpop.permute.xlu1 %966 }
 0xd98   :  { %v969_v58 = vadd.f32 %v967_v55, %v3591_v13 }
 0xd9a   :  { %2990 = vtanh.f32 %v969_v58 }
 0xda0   :  { %v2991_v45 = vpop.eup %2990 }
 0xda1   :  { %973 = vrot.lane.b32.xlu0 %v2991_v45, %s3165_s17 }
 0xdfb   :  { %v1009_v37 = vpop.permute.xlu1 %1008 }
 0xdfc   :  { %v1011_v41 = vmul.f32 %v1009_v37, %v1006_v33 }
 0xdfe   :  { %v3706_v32 = vadd.f32 %v1012_v34, %v1011_v41 }
 0xe00   :  { %1019 = vrot.lane.b32.xlu0 %v3706_v32, %s3166_s5 }
 0xe13   :  { %v974_v62 = vpop.permute.xlu0 %973 }
 0xe14   :  { %v976_v56 = vmul.f32 %v974_v62, %v971_v12 }
 0xe16   :  { %v3711_v13 = vadd.f32 %v977_v53, %v976_v56 }
 0xe18   :  { %1015 = vrot.lane.b32.xlu2 %v3711_v13, %s3165_s17 }
 0xe72   :  { %v3715_v16 = vpop.permute.xlu2 %1015  ;;  %v3717_v49 = vpop.permute.xlu0 %1019 }
 0xe73   :  { %v1022_v50 = vsel %vm521_vm4, %v3715_v16, %v3717_v49 }
 0xe74   :  { %v1023_v22 = vpack.c.bf16 %v1022_v50, %v1022_v50 }
 0xe76   :  { %2839 = vmatmul.msk.bf16.vlgmr.msra.gmra.mxu0 %vm300_vm1, %v1023_v22 }
 0xe77   :  { %2249 = vmatpush.bf16.xpose.msra.mxu0 %v3312_v23 }
 0xe7f   :  { %2250 = vmatpush.bf16.xpose.msra.mxu0 %v3321_v25 }
 0xe87   :  { %2251 = vmatpush.bf16.xpose.msra.mxu0 %v3330_v27 }
 0xe8f   :  { %2252 = vmatpush.bf16.xpose.msra.mxu0 %v3339_v31 }
 0xe97   :  { %2253 = vmatpush.bf16.xpose.msra.mxu0 %v3354_v40 }
 0xe9f   :  { %2254 = vmatpush.bf16.xpose.msra.mxu0 %v3364_v42 }
 0xef3   :  { %v1036_v43 = vpop.f32.mrf.mxu0 }
 0xef4   :  { %v1037_v61 = vadd.f32 %v3732_v15, %v1036_v43 }
 0xef6   :  { %1061 = vrot.lane.b32.xlu1 %v1037_v61, %s3163_s28  ;;  %v1040_v28 = vadd.f32 %v1037_v61, %v3549_v21  ;;  %v1079_v44 = vadd.f32 %v1037_v61, %v3545_v20 }
 0xef8   :  { %v2840_v52 = vmul.f32 -1.442695, %v1040_v28  ;;  %v2841_v0 = vmul.f32 -1.442695, %v1079_v44 }
 0xefa   :  { %2992 = vpow2.f32 %v2840_v52 }
 0xefb   :  { %v1038_v26 = vpop.f32.mrf.mxu0  ;;  %2994 = vpow2.f32 %v2841_v0 }
 0xf00   :  { %v2993_v55 = vpop.eup %2992 }
 0xf01   :  { %v2995_v58 = vpop.eup %2994  ;;  %v1044_v45 = vadd.f32 1.0, %v2993_v55 }
 0xf02   :  { %v1083_v33 = vadd.f32 1.0, %v2995_v58 }
 0xf03   :  { %2996 = vrcp.f32 %v1044_v45  ;;  %vm1050_vm5 = vweird.f32 %v1044_v45  ;;  %v1056_v61 = vand.u32 2147483648, %v1044_v45  ;;  %v1054_v28 = vand.u32 2147483647, %v1044_v45 }
 0xf04   :  { %2998 = vrcp.f32 %v1083_v33  ;;  %v1095_v26 = vand.u32 2147483648, %v1083_v33  ;;  %vm1089_vm7 = vweird.f32 %v1083_v33  ;;  %v1093_v44 = vand.u32 2147483647, %v1083_v33 }
 0xf05   :  { %v1057_v55 = vor.u32 1.1754944e-38, %v1056_v61  ;;  %vm1055_vm9 = vcmp.eq.f32.partialorder %v1054_v28, 8.507059e+37 }
 0xf06   :  { %v1096_v58 = vor.u32 1.1754944e-38, %v1095_v26  ;;  %vm1094_vm10 = vcmp.eq.f32.partialorder %v1093_v44, 8.507059e+37 }
 0xf09   :  { %v2997_v37 = vpop.eup %2996 }
 0xf0a   :  { %v2999_v34 = vpop.eup %2998  ;;  %v1046_v41 = vmul.f32 %v2997_v37, %v1044_v45  ;;  %vm1051_vm2 = vweird.f32 %v2997_v37 }
 0xf0b   :  { %v1085_v12 = vmul.f32 %v2999_v34, %v1083_v33  ;;  %vm1090_vm3 = vweird.f32 %v2999_v34  ;;  %vm1052_vm6 = vmor %vm1050_vm5, %vm1051_vm2 }
 0xf0c   :  { %v1047_v62 = vsub.f32 1.0, %v1046_v41  ;;  %vm1091_vm8 = vmor %vm1089_vm7, %vm1090_vm3 }
 0xf0d   :  { %v1086_v53 = vsub.f32 1.0, %v1085_v12 }
 0xf0e   :  { %v1048_v56 = vmul.f32 %v2997_v37, %v1047_v62 }
 0xf0f   :  { %v1087_v50 = vmul.f32 %v2999_v34, %v1086_v53 }
 0xf10   :  { %v1049_v22 = vadd.f32 %v2997_v37, %v1048_v56 }
 0xf11   :  { %v1088_v43 = vadd.f32 %v2999_v34, %v1087_v50 }
 0xf12   :  { %v1053_v52 = vsel %vm1052_vm6, %v2997_v37, %v1049_v22 }
 0xf13   :  { %v1092_v0 = vsel %vm1091_vm8, %v2999_v34, %v1088_v43  ;;  %v1058_v12 = vsel %vm1055_vm9, %v1057_v55, %v1053_v52 }
 0xf14   :  { %v1097_v62 = vsel %vm1094_vm10, %v1096_v58, %v1092_v0  ;;  %v1071_v43 = vsub.f32 1.0, %v1058_v12  ;;  %v1077_v44 = vmul.f32 %v1058_v12, %v3711_v13 }
 0xf15   :  { %v1106_v61 = vsub.f32 1.0, %v1097_v62 }
 0xf68   :  { %v1062_v41 = vpop.permute.xlu1 %1061 }
 0xf69   :  { %v1064_v53 = vmul.f32 %v1062_v41, %v1058_v12  ;;  %v1099_v56 = vmul.f32 %v1097_v62, %v1062_v41 }
 0xf6b   :  { %1101 = vrot.lane.b32.xlu0 %v1099_v56, %s3164_s16  ;;  %1066 = vrot.lane.b32.xlu2 %v1064_v53, %s3164_s16 }
 0xfc5   :  { %v1067_v50 = vpop.permute.xlu2 %1066 }
 0xfc6   :  { %v1069_v45 = vadd.f32 %v1067_v50, %v3549_v21  ;;  %v1112_v21 = vmul.f32 %v1097_v62, %v3706_v32 }
 0xfc8   :  { %3000 = vtanh.f32 %v1069_v45 }
 0xfce   :  { %v3001_v33 = vpop.eup %3000 }
 0xfcf   :  { %1073 = vrot.lane.b32.xlu1 %v3001_v33, %s3165_s17 }
 0xfdd   :  { %v1102_v37 = vpop.permute.xlu0 %1101 }
 0xfde   :  { %v1104_v34 = vadd.f32 %v1102_v37, %v3545_v20 }
 0xfe0   :  { %3002 = vtanh.f32 %v1104_v34 }
 0xfe6   :  { %v3003_v22 = vpop.eup %3002 }
 0xfe7   :  { %1108 = vrot.lane.b32.xlu2 %v3003_v22, %s3165_s17 }
0x1041   :  { %v1074_v26 = vpop.permute.xlu1 %1073  ;;  %v1109_v28 = vpop.permute.xlu2 %1108 }
0x1042   :  { %v1076_v52 = vmul.f32 %v1074_v26, %v1071_v43  ;;  %v1111_v0 = vmul.f32 %v1109_v28, %v1106_v61 }
0x1044   :  { %v3746_v55 = vadd.f32 %v1077_v44, %v1076_v52  ;;  %v3748_v58 = vadd.f32 %v1112_v21, %v1111_v0 }
0x1046   :  { %1115 = vrot.lane.b32.xlu0 %v3746_v55, %s3165_s17  ;;  %1119 = vrot.lane.b32.xlu1 %v3748_v58, %s3166_s5 }
0x10b8   :  { %v3754_v20 = vpop.permute.xlu0 %1115  ;;  %v3756_v41 = vpop.permute.xlu1 %1119 }
0x10b9   :  { %v1122_v13 = vsel %vm521_vm4, %v3754_v20, %v3756_v41 }
0x10ba   :  { %v1123_v32 = vpack.c.bf16 %v1122_v13, %v1122_v13 }
0x10bc   :  { %2842 = vmatmul.msk.bf16.vlgmr.msra.gmra.mxu2 %vm300_vm1, %v1123_v32 }
0x113f   :  { %v1136_v12 = vpop.f32.mrf.mxu2 }
0x1140   :  { %v1137_v62 = vadd.f32 %v3732_v15, %v1136_v12 }
0x1142   :  { %1161 = vrot.lane.b32.xlu2 %v1137_v62, %s3163_s28  ;;  %v1140_v56 = vadd.f32 %v1137_v62, %v3515_v11  ;;  %v1179_v50 = vadd.f32 %v1137_v62, %v3491_v48 }
0x1144   :  { %v2843_v45 = vmul.f32 -1.442695, %v1140_v56  ;;  %v2844_v33 = vmul.f32 -1.442695, %v1179_v50 }
0x1146   :  { %3004 = vpow2.f32 %v2843_v45 }
0x1147   :  { %v1138_v53 = vpop.f32.mrf.mxu2  ;;  %3006 = vpow2.f32 %v2844_v33 }
0x114c   :  { %v3005_v37 = vpop.eup %3004 }
0x114d   :  { %v3007_v34 = vpop.eup %3006  ;;  %v1144_v22 = vadd.f32 1.0, %v3005_v37 }
0x114e   :  { %v1183_v43 = vadd.f32 1.0, %v3007_v34 }
0x114f   :  { %3008 = vrcp.f32 %v1144_v22  ;;  %vm1150_vm13 = vweird.f32 %v1144_v22  ;;  %v1156_v12 = vand.u32 2147483648, %v1144_v22  ;;  %v1154_v53 = vand.u32 2147483647, %v1144_v22 }
0x1150   :  { %3010 = vrcp.f32 %v1183_v43  ;;  %v1195_v62 = vand.u32 2147483648, %v1183_v43  ;;  %vm1189_vm15 = vweird.f32 %v1183_v43  ;;  %v1193_v56 = vand.u32 2147483647, %v1183_v43 }
0x1151   :  { %v1157_v33 = vor.u32 1.1754944e-38, %v1156_v12  ;;  %vm1155_vm2 = vcmp.eq.f32.partialorder %v1154_v53, 8.507059e+37 }
0x1152   :  { %v1196_v37 = vor.u32 1.1754944e-38, %v1195_v62  ;;  %vm1194_vm3 = vcmp.eq.f32.partialorder %v1193_v56, 8.507059e+37 }
0x1155   :  { %v3009_v61 = vpop.eup %3008 }
0x1156   :  { %v3011_v26 = vpop.eup %3010  ;;  %v1146_v15 = vmul.f32 %v3009_v61, %v1144_v22  ;;  %vm1151_vm11 = vweird.f32 %v3009_v61 }
0x1157   :  { %v1185_v28 = vmul.f32 %v3011_v26, %v1183_v43  ;;  %vm1190_vm12 = vweird.f32 %v3011_v26  ;;  %vm1152_vm14 = vmor %vm1150_vm13, %vm1151_vm11 }
0x1158   :  { %v1147_v44 = vsub.f32 1.0, %v1146_v15  ;;  %vm1191_vm0 = vmor %vm1189_vm15, %vm1190_vm12 }
0x1159   :  { %v1186_v52 = vsub.f32 1.0, %v1185_v28 }
0x115a   :  { %v1148_v21 = vmul.f32 %v3009_v61, %v1147_v44 }
0x115b   :  { %v1187_v0 = vmul.f32 %v3011_v26, %v1186_v52 }
0x115c   :  { %v1149_v13 = vadd.f32 %v3009_v61, %v1148_v21 }
0x115d   :  { %v1188_v32 = vadd.f32 %v3011_v26, %v1187_v0 }
0x115e   :  { %v1153_v50 = vsel %vm1152_vm14, %v3009_v61, %v1149_v13 }
0x115f   :  { %v1192_v45 = vsel %vm1191_vm0, %v3011_v26, %v1188_v32  ;;  %v1158_v15 = vsel %vm1155_vm2, %v1157_v33, %v1153_v50  ;;  %v1219_v33 = vsel %vm521_vm4, %v3571_v60, %v3756_v41  ;;  %v1224_v60 = vsel %vm521_vm4, %v3754_v20, %v3569_v59 }
0x1160   :  { %v1197_v28 = vsel %vm1194_vm3, %v1196_v37, %v1192_v45  ;;  %v1171_v56 = vsub.f32 1.0, %v1158_v15  ;;  %v1233_v37 = vsel %vm300_vm1, %v1219_v33, 0.0  ;;  %v1248_v41 = vsel %vm300_vm1, %v1224_v60, 0.0 }
0x1161   :  { %v1206_v13 = vsub.f32 1.0, %v1197_v28  ;;  %v1212_v12 = vmul.f32 %v1197_v28, %v3748_v58  ;;  %v1223_v58 = vsel %vm521_vm4, %v3715_v16, %v3613_v14  ;;  %v1222_v59 = vsel %vm521_vm4, %v3683_v24, %v3655_v46 }
0x1162   :  { %v3167_v20 = vmov 32.0  }
0x119c   :  { %v1162_v34 = vpop.permute.xlu2 %1161 }
0x119d   :  { %v1164_v44 = vmul.f32 %v1162_v34, %v1158_v15  ;;  %v1199_v52 = vmul.f32 %v1197_v28, %v1162_v34  ;;  %v1245_v34 = vsel %vm300_vm1, %v1223_v58, 0.0 }
0x119f   :  { %1201 = vrot.lane.b32.xlu0 %v1199_v52, %s3164_s16  ;;  %1166 = vrot.lane.b32.xlu1 %v1164_v44, %s3164_s16  ;;  %v1242_v44 = vsel %vm300_vm1, %v1222_v59, 0.0 }
0x1211   :  { %v1202_v21 = vpop.permute.xlu0 %1201  ;;  %v1167_v22 = vpop.permute.xlu1 %1166 }
0x1212   :  { %v1204_v43 = vadd.f32 %v1202_v21, %v3491_v48  ;;  %v1169_v61 = vadd.f32 %v1167_v22, %v3515_v11  ;;  %v1177_v11 = vmul.f32 %v1158_v15, %v3746_v55  ;;  %v1220_v55 = vsel %vm521_vm4, %v3611_v5, %v3717_v49 }
0x1213   :  { %v1236_v15 = vsel %vm300_vm1, %v1220_v55, 0.0  ;;  %v1221_v5 = vsel %vm521_vm4, %v3653_v36, %v3681_v1 }
0x1214   :  { %3012 = vtanh.f32 %v1204_v43  ;;  %v1239_v49 = vsel %vm300_vm1, %v1221_v5, 0.0 }
0x1215   :  { %3014 = vtanh.f32 %v1169_v61 }
0x1216   :  { %3016 = vrcp.f32 %v3167_v20 }
0x121a   :  { %v3013_v26 = vpop.eup %3012 }
0x121b   :  { %v3015_v0 = vpop.eup %3014  ;;  %1208 = vrot.lane.b32.xlu2 %v3013_v26, %s3165_s17 }
0x121c   :  { %1173 = vrot.lane.b32.xlu1 %v3015_v0, %s3165_s17 }
0x1275   :  { %v1209_v32 = vpop.permute.xlu2 %1208 }
0x1276   :  { %v1211_v62 = vmul.f32 %v1209_v32, %v1206_v13 }
0x1278   :  { %v1213_v53 = vadd.f32 %v1212_v12, %v1211_v62 }
0x127a   :  { %1215 = vrot.lane.b32.xlu0 %v1213_v53, %s3166_s5 }
0x128e   :  { %v1174_v48 = vpop.permute.xlu1 %1173 }
0x128f   :  { %v1176_v50 = vmul.f32 %v1174_v48, %v1171_v56 }
0x1291   :  { %v1178_v45 = vadd.f32 %v1177_v11, %v1176_v50 }
0x1293   :  { %1226 = vrot.lane.b32.xlu1 %v1178_v45, %s3165_s17 }
0x12a4   :  { %1234 = vadd.xlane.f32.xlu0 %v1233_v37 }
0x12ac   :  { %1246 = vadd.xlane.f32.xlu0 %v1245_v34 }
0x12bd   :  { %1237 = vadd.xlane.f32.xlu1 %v1236_v15 }
0x12c5   :  { %1249 = vadd.xlane.f32.xlu1 %v1248_v41 }
0x12ec   :  { %v1216_v28 = vpop.permute.xlu0 %1215 }
0x12ed   :  { %v1218_v14 = vsel %vm521_vm4, %v3533_v2, %v1216_v28  ;;  %v3017_v2 = vpop.eup %3016 }
0x12ee   :  { %v1230_v16 = vsel %vm300_vm1, %v1218_v14, 0.0  ;;  %v1255_v52 = vmul.f32 32.0, %v3017_v2  ;;  %vm1259_vm5 = vweird.f32 %v3017_v2 }
0x12ef   :  { %1231 = vadd.xlane.f32.xlu2 %v1230_v16 }
0x12f0   :  { %v1256_v21 = vsub.f32 1.0, %v1255_v52 }
0x12f2   :  { %v1257_v22 = vmul.f32 %v3017_v2, %v1256_v21 }
0x12f4   :  { %v1258_v43 = vadd.f32 %v3017_v2, %v1257_v22 }
0x12f6   :  { %v3803_v61 = vsel %vm1259_vm5, %v3017_v2, %v1258_v43 }
0x12f7   :  { %1240 = vadd.xlane.f32.xlu2 %v1239_v49 }
0x12ff   :  { %1243 = vadd.xlane.f32.xlu2 %v1242_v44 }
0x1305   :  { %v1227_v0 = vpop.permute.xlu1 %1226 }
0x1306   :  { %v1229_v20 = vsel %vm521_vm4, %v1227_v0, %v3535_v4 }
0x1307   :  { %v1251_v52 = vsel %vm300_vm1, %v1229_v20, 0.0 }
0x1317   :  { %v1235_v36 = vpop.xlane.xlu0 %1234 }
0x1318   :  { %v1262_v1 = vmul.f32 %v3803_v61, %v1235_v36 }
0x131a   :  { %v3806_v26 = vsub.f32 %v1219_v33, %v1262_v1 }
0x131c   :  { %v1278_v46 = vmul.f32 %v3806_v26, %v3806_v26 }
0x131e   :  { %v1288_v24 = vsel %vm300_vm1, %v1278_v46, 0.0 }
0x131f   :  { %1289 = vadd.xlane.f32.xlu0 %v1288_v24  ;;  %v1247_v13 = vpop.xlane.xlu0 %1246 }
0x1320   :  { %v1266_v62 = vmul.f32 %v3803_v61, %v1247_v13 }
0x1322   :  { %v3817_v48 = vsub.f32 %v1223_v58, %v1266_v62 }
0x1324   :  { %v1282_v50 = vmul.f32 %v3817_v48, %v3817_v48 }
0x1326   :  { %v1300_v45 = vsel %vm300_vm1, %v1282_v50, 0.0 }
0x1330   :  { %v1238_v32 = vpop.xlane.xlu1 %1237 }
0x1331   :  { %v1263_v12 = vmul.f32 %v3803_v61, %v1238_v32 }
0x1333   :  { %v3813_v53 = vsub.f32 %v1220_v55, %v1263_v12 }
0x1335   :  { %v1279_v56 = vmul.f32 %v3813_v53, %v3813_v53 }
0x1337   :  { %v1291_v11 = vsel %vm300_vm1, %v1279_v56, 0.0 }
0x1338   :  { %1292 = vadd.xlane.f32.xlu0 %v1291_v11  ;;  %v1250_v15 = vpop.xlane.xlu1 %1249 }
0x1339   :  { %v1267_v16 = vmul.f32 %v3803_v61, %v1250_v15 }
0x133b   :  { %v3837_v44 = vsub.f32 %v1224_v60, %v1267_v16 }
0x1340   :  { %1301 = vadd.xlane.f32.xlu0 %v1300_v45 }
0x1362   :  { %v1232_v33 = vpop.xlane.xlu2 %1231 }
0x1363   :  { %v1261_v37 = vmul.f32 %v3803_v61, %v1232_v33 }
0x1365   :  { %v3824_v34 = vsub.f32 %v1218_v14, %v1261_v37 }
0x1367   :  { %v1277_v55 = vmul.f32 %v3824_v34, %v3824_v34 }
0x1369   :  { %v1285_v58 = vsel %vm300_vm1, %v1277_v55, 0.0 }
0x136a   :  { %1286 = vadd.xlane.f32.xlu2 %v1285_v58  ;;  %v1241_v41 = vpop.xlane.xlu2 %1240 }
0x136b   :  { %v1264_v28 = vmul.f32 %v3803_v61, %v1241_v41 }
0x136d   :  { %v3831_v49 = vsub.f32 %v1221_v5, %v1264_v28  ;;  %v1283_v5 = vmul.f32 %v3837_v44, %v3837_v44 }
0x136f   :  { %v1280_v14 = vmul.f32 %v3831_v49, %v3831_v49  ;;  %v1303_v36 = vsel %vm300_vm1, %v1283_v5, 0.0 }
0x1371   :  { %v1294_v2 = vsel %vm300_vm1, %v1280_v14, 0.0 }
0x1372   :  { %v1244_v21 = vpop.xlane.xlu2 %1243  ;;  %1295 = vadd.xlane.f32.xlu1 %v1294_v2  ;;  %1252 = vadd.xlane.f32.xlu2 %v1251_v52 }
0x1373   :  { %v1265_v22 = vmul.f32 %v3803_v61, %v1244_v21 }
0x1375   :  { %v3842_v43 = vsub.f32 %v1222_v59, %v1265_v22  ;;  %v105_v59 = vld [vmem:[%s4592_s10] sm:$0x1] }
0x1376   :  { %v1455_v13 = vsel %vm300_vm1, %v105_v59, 0 }
0x1377   :  { %v1281_v4 = vmul.f32 %v3842_v43, %v3842_v43  ;;  %1464 = vmatpush.bf16.xpose.msra.mxu3 %v1455_v13 }
0x1379   :  { %v1297_v60 = vsel %vm300_vm1, %v1281_v4, 0.0 }
0x137a   :  { %1298 = vadd.xlane.f32.xlu2 %v1297_v60  ;;  %1304 = vadd.xlane.f32.xlu1 %v1303_v36 }
0x137f   :  { %1949 = vmatpush.bf16.xpose.msrb.mxu3 %v3312_v23 }
0x1387   :  { %1950 = vmatpush.bf16.xpose.msrb.mxu3 %v3321_v25 }
0x138f   :  { %1951 = vmatpush.bf16.xpose.msrb.mxu3 %v3330_v27 }
0x1392   :  { %v1290_v1 = vpop.xlane.xlu0 %1289 }
0x1393   :  { %v1310_v46 = vmul.f32 %v1290_v1, %v3803_v61 }
0x1395   :  { %v1318_v24 = vadd.f32 1e-05, %v1310_v46 }
0x1397   :  { %3018 = vrsqrt.f32 %v1318_v24  ;;  %vm1341_vm7 = vweird.f32 %v1318_v24  ;;  %1952 = vmatpush.bf16.xpose.msrb.mxu3 %v3339_v31 }
0x139d   :  { %v3019_v32 = vpop.eup %3018 }
0x139e   :  { %v1336_v62 = vmul.f32 %v3019_v32, %v1318_v24  ;;  %vm1342_vm6 = vweird.f32 %v3019_v32  ;;  %v3883_v24 = vld [vmem:[%s4590_s8] ss:$0 sm:$0xff] }
0x139f   :  { %vm1343_vm8 = vmor %vm1341_vm7, %vm1342_vm6  ;;  %1953 = vmatpush.bf16.xpose.msrb.mxu3 %v3354_v40 }
0x13a0   :  { %v1337_v11 = vmul.f32 %v3019_v32, %v1336_v62 }
0x13a2   :  { %v1338_v37 = vmul.f32 0.5, %v1337_v11 }
0x13a4   :  { %v1339_v15 = vsub.f32 1.5, %v1338_v37 }
0x13a6   :  { %v1340_v4 = vmul.f32 %v3019_v32, %v1339_v15 }
0x13a7   :  { %1954 = vmatpush.bf16.xpose.msrb.mxu3 %v3364_v42 }
0x13a8   :  { %v1344_v13 = vsel %vm1343_vm8, %v3019_v32, %v1340_v4 }
0x13ab   :  { %v1293_v0 = vpop.xlane.xlu0 %1292 }
0x13ac   :  { %v1311_v12 = vmul.f32 %v1293_v0, %v3803_v61 }
0x13ae   :  { %v3857_v56 = vadd.f32 1e-05, %v1311_v12 }
0x13b0   :  { %3020 = vrsqrt.f32 %v3857_v56  ;;  %vm1351_vm0 = vweird.f32 %v3857_v56 }
0x13b3   :  { %v1302_v55 = vpop.xlane.xlu0 %1301 }
0x13b4   :  { %v1314_v21 = vmul.f32 %v1302_v55, %v3803_v61 }
0x13b6   :  { %v3862_v58 = vpop.eup %3020  ;;  %v3875_v0 = vadd.f32 1e-05, %v1314_v21 }
0x13b7   :  { %v1346_v52 = vmul.f32 %v3862_v58, %v3857_v56  ;;  %vm1352_vm13 = vweird.f32 %v3862_v58 }
0x13b8   :  { %vm1353_vm2 = vmor %vm1351_vm0, %vm1352_vm13  ;;  %vm1381_vm8 = vweird.f32 %v3875_v0 }
0x13b9   :  { %v1347_v46 = vmul.f32 %v3862_v58, %v1346_v52 }
0x13bb   :  { %v1348_v37 = vmul.f32 0.5, %v1347_v46 }
0x13bd   :  { %v1349_v52 = vsub.f32 1.5, %v1348_v37 }
0x13dd   :  { %v1287_v50 = vpop.xlane.xlu2 %1286 }
0x13de   :  { %v1309_v45 = vmul.f32 %v1287_v50, %v3803_v61 }
0x13e0   :  { %v1317_v33 = vadd.f32 1e-05, %v1309_v45  ;;  %v1406_v45 = vmul.f32 %v1344_v13, %v3806_v26 }
0x13e2   :  { %3022 = vrsqrt.f32 %v1317_v33  ;;  %vm1331_vm10 = vweird.f32 %v1317_v33 }
0x13e5   :  { %v1253_v41 = vpop.xlane.xlu2 %1252  ;;  %v1296_v28 = vpop.xlane.xlu1 %1295 }
0x13e6   :  { %v1268_v16 = vmul.f32 %v3803_v61, %v1253_v41  ;;  %v1312_v14 = vmul.f32 %v1296_v28, %v3803_v61 }
0x13e8   :  { %v3023_v2 = vpop.eup %3022  ;;  %v3870_v22 = vsub.f32 %v1229_v20, %v1268_v16  ;;  %v1320_v5 = vadd.f32 1e-05, %v1312_v14  ;;  %v3890_v16 = vld [vmem:[%s4591_s9] ss:$0 sm:$0xff]  ;;  %v1417_v14 = vmul.f32 %v3883_v24, %v1406_v45 }
0x13e9   :  { %v1326_v60 = vmul.f32 %v3023_v2, %v1317_v33  ;;  %vm1332_vm9 = vweird.f32 %v3023_v2 }
0x13ea   :  { %3024 = vrsqrt.f32 %v1320_v5  ;;  %v1284_v36 = vmul.f32 %v3870_v22, %v3870_v22  ;;  %vm1333_vm11 = vmor %vm1331_vm10, %vm1332_vm9  ;;  %vm1361_vm14 = vweird.f32 %v1320_v5 }
0x13eb   :  { %v1327_v1 = vmul.f32 %v3023_v2, %v1326_v60  ;;  %3026 = vrsqrt.f32 %v3875_v0 }
0x13ec   :  { %v1306_v59 = vsel %vm300_vm1, %v1284_v36, 0.0  ;;  %v1428_v36 = vadd.f32 %v3890_v16, %v1417_v14 }
0x13ed   :  { %v1328_v20 = vmul.f32 0.5, %v1327_v1  ;;  %1307 = vadd.xlane.f32.xlu2 %v1306_v59  ;;  %v1299_v12 = vpop.xlane.xlu2 %1298  ;;  %v1350_v1 = vmul.f32 %v3862_v58, %v1349_v52 }
0x13ee   :  { %v1313_v62 = vmul.f32 %v1299_v12, %v3803_v61 }
0x13ef   :  { %v1329_v11 = vsub.f32 1.5, %v1328_v20 }
0x13f0   :  { %v3025_v50 = vpop.eup %3024  ;;  %v1321_v32 = vadd.f32 1e-05, %v1313_v62 }
0x13f1   :  { %v1330_v55 = vmul.f32 %v3023_v2, %v1329_v11  ;;  %v1356_v15 = vmul.f32 %v3025_v50, %v1320_v5  ;;  %v3027_v4 = vpop.eup %3026  ;;  %vm1362_vm12 = vweird.f32 %v3025_v50  ;;  %v1354_v11 = vsel %vm1353_vm2, %v3862_v58, %v1350_v1 }
0x13f2   :  { %3028 = vrsqrt.f32 %v1321_v32  ;;  %v1376_v59 = vmul.f32 %v3027_v4, %v3875_v0  ;;  %vm1363_vm15 = vmor %vm1361_vm14, %vm1362_vm12  ;;  %v1407_v5 = vmul.f32 %v1354_v11, %v3813_v53  ;;  %vm1382_vm5 = vweird.f32 %v3027_v4 }
0x13f3   :  { %v1334_v41 = vsel %vm1333_vm11, %v3023_v2, %v1330_v55  ;;  %v1357_v28 = vmul.f32 %v3025_v50, %v1356_v15  ;;  %vm1371_vm6 = vweird.f32 %v1321_v32  ;;  %vm1383_vm9 = vmor %vm1381_vm8, %vm1382_vm5  ;;  %vm1590_vm2 = vcmask 7168  }
0x13f4   :  { %v1405_v26 = vmul.f32 %v1334_v41, %v3824_v34  ;;  %v1377_v45 = vmul.f32 %v3027_v4, %v1376_v59  ;;  %v1418_v41 = vmul.f32 %v3883_v24, %v1407_v5 }
0x13f5   :  { %v1358_v21 = vmul.f32 0.5, %v1357_v28 }
0x13f6   :  { %v1416_v60 = vmul.f32 %v3883_v24, %v1405_v26  ;;  %v1378_v15 = vmul.f32 0.5, %v1377_v45 }
0x13f7   :  { %v1359_v33 = vsub.f32 1.5, %v1358_v21 }
0x13f8   :  { %v3029_v2 = vpop.eup %3028  ;;  %v1427_v46 = vadd.f32 %v3890_v16, %v1416_v60  ;;  %v1379_v28 = vsub.f32 1.5, %v1378_v15 }
0x13f9   :  { %v1360_v34 = vmul.f32 %v3025_v50, %v1359_v33  ;;  %v1366_v13 = vmul.f32 %v3029_v2, %v1321_v32  ;;  %vm1372_vm3 = vweird.f32 %v3029_v2 }
0x13fa   :  { %v1435_v20 = vpack.c.bf16 %v1428_v36, %v1427_v46  ;;  %v1380_v52 = vmul.f32 %v3027_v4, %v1379_v28  ;;  %vm1373_vm7 = vmor %vm1371_vm6, %vm1372_vm3  ;;  %vm1599_vm3 = vcmask 15360  }
0x13fb   :  { %v1364_v12 = vsel %vm1363_vm15, %v3025_v50, %v1360_v34  ;;  %v1367_v62 = vmul.f32 %v3029_v2, %v1366_v13 }
0x13fc   :  { %2845 = vmatmul.msk.bf16.vlgmr.msra.gmra.mxu3 %vm300_vm1, %v1435_v20  ;;  %v1408_v37 = vmul.f32 %v1364_v12, %v3831_v49  ;;  %v1429_v49 = vadd.f32 %v3890_v16, %v1418_v41  ;;  %v1384_v26 = vsel %vm1383_vm9, %v3027_v4, %v1380_v52 }
0x13fd   :  { %v1368_v55 = vmul.f32 0.5, %v1367_v62  ;;  %2349 = vmatpush.bf16.xpose.msra.mxu3 %v3312_v23  ;;  %v1410_v60 = vmul.f32 %v1384_v26, %v3817_v48  ;;  %v1305_v48 = vpop.xlane.xlu1 %1304 }
0x13fe   :  { %v1419_v56 = vmul.f32 %v3883_v24, %v1408_v37 }
0x13ff   :  { %v1369_v50 = vsub.f32 1.5, %v1368_v55  ;;  %v1421_v33 = vmul.f32 %v3883_v24, %v1410_v60 }
0x1400   :  { %v1430_v14 = vadd.f32 %v3890_v16, %v1419_v56 }
0x1401   :  { %v1370_v58 = vmul.f32 %v3029_v2, %v1369_v50  ;;  %v1432_v36 = vadd.f32 %v3890_v16, %v1421_v33 }
0x1402   :  { %v1436_v23 = vpack.c.bf16 %v1430_v14, %v1429_v49  ;;  %v3937_v14 = vld [vmem:[%s4593_s11] ss:$0 sm:$0xff]  ;;  %s3169_s11 = smov 1  }
0x1403   :  { %v1374_v53 = vsel %vm1373_vm7, %v3029_v2, %v1370_v58  ;;  %v66_v58 = vld [vmem:[%s4594_s2] sm:$0xff] }
0x1404   :  { %v1409_v21 = vmul.f32 %v1374_v53, %v3842_v43 }
0x1405   :  { %2350 = vmatpush.bf16.xpose.msra.mxu3 %v3321_v25 }
0x1406   :  { %v1420_v25 = vmul.f32 %v3883_v24, %v1409_v21 }
0x1408   :  { %v1431_v32 = vadd.f32 %v3890_v16, %v1420_v25 }
0x140a   :  { %v1437_v0 = vpack.c.bf16 %v1432_v36, %v1431_v32  ;;  %v73_v32 = vld [vmem:[%s4594_s2 + $0x38] sm:$0xff] }
0x140c   :  { %2846 = vmatmul.msk.bf16.gmra.mxu3 %vm300_vm1, %v1436_v23 }
0x140d   :  { %2351 = vmatpush.bf16.xpose.msra.mxu3 %v3330_v27  ;;  %v1315_v27 = vmul.f32 %v1305_v48, %v3803_v61 }
0x140f   :  { %v1323_v43 = vadd.f32 1e-05, %v1315_v27  ;;  %v3170_v27 = vmov 1  }
0x1410   :  { %2908 = vset.pattern.permute.xlu1 %v3170_v27  ;;  %2909 = vset.pattern.permute.xlu0 %v3170_v27 }
0x1411   :  { %3030 = vrsqrt.f32 %v1323_v43  ;;  %vm1391_vm11 = vweird.f32 %v1323_v43  ;;  %2910 = vset.pattern.permute.xlu2 %v3170_v27 }
0x1415   :  { %2352 = vmatpush.bf16.xpose.msra.mxu3 %v3339_v31 }
0x1417   :  { %v3031_v4 = vpop.eup %3030 }
0x1418   :  { %v1386_v2 = vmul.f32 %v3031_v4, %v1323_v43  ;;  %vm1392_vm10 = vweird.f32 %v3031_v4 }
0x1419   :  { %vm1393_vm12 = vmor %vm1391_vm11, %vm1392_vm10 }
0x141a   :  { %v1387_v1 = vmul.f32 %v3031_v4, %v1386_v2 }
0x141c   :  { %2847 = vmatmul.msk.bf16.gmra.mxu3 %vm300_vm1, %v1437_v0  ;;  %v1388_v31 = vmul.f32 0.5, %v1387_v1 }
0x141d   :  { %2353 = vmatpush.bf16.xpose.msra.mxu3 %v3354_v40 }
0x141e   :  { %v1389_v13 = vsub.f32 1.5, %v1388_v31  ;;  %v3975_v31 = vld [vmem:[%s4589_s6] ss:$0 sm:$0xff] }
0x1420   :  { %v1390_v12 = vmul.f32 %v3031_v4, %v1389_v13 }
0x1422   :  { %v1394_v62 = vsel %vm1393_vm12, %v3031_v4, %v1390_v12 }
0x1423   :  { %v1411_v37 = vmul.f32 %v1394_v62, %v3837_v44 }
0x1425   :  { %2354 = vmatpush.bf16.xpose.msra.mxu3 %v3364_v42  ;;  %v1422_v56 = vmul.f32 %v3883_v24, %v1411_v37 }
0x1427   :  { %v1433_v41 = vadd.f32 %v3890_v16, %v1422_v56 }
0x1460   :  { %v1308_v46 = vpop.xlane.xlu2 %1307 }
0x1461   :  { %v1316_v59 = vmul.f32 %v1308_v46, %v3803_v61 }
0x1463   :  { %v1324_v34 = vadd.f32 1e-05, %v1316_v59 }
0x1465   :  { %3032 = vrsqrt.f32 %v1324_v34  ;;  %vm1401_vm14 = vweird.f32 %v1324_v34 }
0x146b   :  { %v3033_v20 = vpop.eup %3032 }
0x146c   :  { %v1396_v40 = vmul.f32 %v3033_v20, %v1324_v34  ;;  %vm1402_vm13 = vweird.f32 %v3033_v20 }
0x146d   :  { %vm1403_vm15 = vmor %vm1401_vm14, %vm1402_vm13 }
0x146e   :  { %v1397_v42 = vmul.f32 %v3033_v20, %v1396_v40 }
0x1470   :  { %v1398_v11 = vmul.f32 0.5, %v1397_v42 }
0x1472   :  { %v1399_v45 = vsub.f32 1.5, %v1398_v11 }
0x1474   :  { %v1400_v55 = vmul.f32 %v3033_v20, %v1399_v45 }
0x1476   :  { %v1404_v5 = vsel %vm1403_vm15, %v3033_v20, %v1400_v55 }
0x1477   :  { %v1412_v15 = vmul.f32 %v1404_v5, %v3870_v22 }
0x1479   :  { %v1423_v50 = vmul.f32 %v3883_v24, %v1412_v15 }
0x147b   :  { %v1434_v28 = vadd.f32 %v3890_v16, %v1423_v50 }
0x147d   :  { %v1438_v44 = vpack.c.bf16 %v1434_v28, %v1433_v41 }
0x147f   :  { %v1466_v49 = vpop.f32.mrf.mxu3  ;;  %2848 = vmatmul.msk.bf16.gmra.mxu3 %vm300_vm1, %v1438_v44 }
0x1480   :  { %v1467_v22 = vadd.f32 %v3937_v14, %v1466_v49 }
0x1482   :  { %v1486_v24 = vadd.f32 %v1467_v22, %v66_v58 }
0x1484   :  { %1502 = vrot.lane.b32.xlu0 %v1486_v24, %s3168_s4 }
0x1487   :  { %v3945_v16 = vpop.f32.mrf.mxu3 }
0x148f   :  { %v3947_v52 = vpop.f32.mrf.mxu3 }
0x1497   :  { %v3949_v23 = vpop.f32.mrf.mxu3 }
0x149f   :  { %v3951_v53 = vpop.f32.mrf.mxu3 }
0x14a7   :  { %v3954_v25 = vpop.f32.mrf.mxu3 }
0x14f6   :  { %v1503_v26 = vpop.permute.xlu0 %1502 }
0x14f7   :  { %vm1526_vm0 = vcmp.ge.f32.partialorder %v1486_v24, %v1503_v26 }
0x14f8   :  { %v2849_v21 = vsel %vm1526_vm0, 1.0, %v3161_v35 }
0x14f9   :  { %v1550_v60 = vsub.f32 1.0, %v2849_v21 }
0x14fb   :  { %1566 = vrot.lane.b32.xlu2 %v1550_v60, %s3169_s11 }
0x1502   :  { %v3957_v33 = vpop.f32.mrf.mxu3 }
0x150a   :  { %v1483_v36 = vpop.f32.mrf.mxu3 }
0x150b   :  { %v1484_v0 = vadd.f32 %v3937_v14, %v1483_v36 }
0x150d   :  { %v1493_v48 = vadd.f32 %v1484_v0, %v73_v32 }
0x150f   :  { %1516 = vrot.lane.b32.xlu1 %v1493_v48, %s3168_s4 }
0x1555   :  { %v1567_v43 = vpop.permute.xlu2 %1566 }
0x1556   :  { %v1591_v4 = vsel %vm1590_vm2, %v2849_v21, %v1567_v43 }
0x1557   :  { %1600 = vst.msk [vmem:[%s4595_s14] sm:$0xff] %vm1599_vm3, %v1591_v4  ;;  %1610 = vperm.xlu1 %2908, %v1591_v4  }
0x1581   :  { %v1517_v2 = vpop.permute.xlu1 %1516 }
0x1582   :  { %vm1533_vm5 = vcmp.ge.f32.partialorder %v1493_v48, %v1517_v2 }
0x1583   :  { %v2856_v1 = vsel %vm1533_vm5, 1.0, %v3161_v35 }
0x1584   :  { %v1557_v46 = vsub.f32 1.0, %v2856_v1 }
0x1586   :  { %1580 = vrot.lane.b32.xlu0 %v1557_v46, %s3169_s11 }
0x15c9   :  { %v1611_v59 = vpop.permute.xlu1 %1610 }
0x15ca   :  { %v1648_v34 = vmul.f32 %v1611_v59, %v3487_v47 }
0x15cc   :  { %v3978_v13 = vadd.f32 %v3975_v31, %v1648_v34 }
0x15ce   :  { %v1664_v20 = vadd.f32 %v3978_v13, %v3452_v17 }
0x15d0   :  { %v2857_v12 = vmul.f32 -1.442695, %v1664_v20 }
0x15d2   :  { %3034 = vpow2.f32 %v2857_v12 }
0x15d8   :  { %v3035_v40 = vpop.eup %3034 }
0x15d9   :  { %v1668_v42 = vadd.f32 1.0, %v3035_v40 }
0x15db   :  { %3036 = vrcp.f32 %v1668_v42  ;;  %v1680_v47 = vand.u32 2147483648, %v1668_v42  ;;  %v1678_v55 = vand.u32 2147483647, %v1668_v42  ;;  %vm1674_vm7 = vweird.f32 %v1668_v42 }
0x15dd   :  { %v1681_v15 = vor.u32 1.1754944e-38, %v1680_v47  ;;  %vm1679_vm9 = vcmp.eq.f32.partialorder %v1678_v55, 8.507059e+37 }
0x15e1   :  { %v3037_v62 = vpop.eup %3036 }
0x15e2   :  { %v1670_v11 = vmul.f32 %v3037_v62, %v1668_v42  ;;  %vm1675_vm6 = vweird.f32 %v3037_v62 }
0x15e3   :  { %vm1676_vm8 = vmor %vm1674_vm7, %vm1675_vm6 }
0x15e4   :  { %v1671_v45 = vsub.f32 1.0, %v1670_v11  ;;  %v1482_v11 = vadd.f32 %v3937_v14, %v3957_v33  ;;  %v67_v33 = vld [vmem:[%s4594_s2 + $0x8] sm:$0xff] }
0x15e6   :  { %v1672_v37 = vmul.f32 %v3037_v62, %v1671_v45  ;;  %v72_v45 = vld [vmem:[%s4594_s2 + $0x30] sm:$0xff] }
0x15e7   :  { %v1492_v47 = vadd.f32 %v1482_v11, %v72_v45 }
0x15e8   :  { %v1673_v5 = vadd.f32 %v3037_v62, %v1672_v37 }
0x15ea   :  { %v1677_v56 = vsel %vm1676_vm8, %v3037_v62, %v1673_v5  ;;  %v1469_v5 = vadd.f32 %v3937_v14, %v3945_v16 }
0x15eb   :  { %v1682_v50 = vsel %vm1679_vm9, %v1681_v15, %v1677_v56 }
0x15ec   :  { %v1684_v41 = vmul.f32 %v1682_v50, %v3501_v63  ;;  %v1691_v20 = vsub.f32 1.0, %v1682_v50  ;;  %v1697_v40 = vmul.f32 0.0, %v1682_v50  ;;  %v1487_v15 = vadd.f32 %v1469_v5, %v67_v33 }
0x15ee   :  { %1686 = vrot.lane.b32.xlu2 %v1684_v41, %s3164_s16 }
0x15f8   :  { %v1581_v28 = vpop.permute.xlu0 %1580 }
0x15f9   :  { %v1598_v44 = vsel %vm1590_vm2, %v2856_v1, %v1581_v28 }
0x15fa   :  { %1645 = vperm.xlu0 %2909, %v1598_v44   ;;  %1607 = vst.msk [vmem:[%s4595_s14 + $0x38] sm:$0xff] %vm1599_vm3, %v1598_v44 }
0x1648   :  { %v1687_v58 = vpop.permute.xlu2 %1686 }
0x1649   :  { %v1689_v49 = vadd.f32 %v1687_v58, %v3978_v13 }
0x164b   :  { %3038 = vtanh.f32 %v1689_v49 }
0x1651   :  { %v3039_v22 = vpop.eup %3038 }
0x1652   :  { %1693 = vrot.lane.b32.xlu2 %v3039_v22, %s3165_s17 }
0x166c   :  { %v1646_v24 = vpop.permute.xlu0 %1645 }
0x166d   :  { %v1655_v26 = vmul.f32 %v1646_v24, %v3511_v10 }
0x166f   :  { %v3993_v21 = vadd.f32 %v3975_v31, %v1655_v26 }
0x1671   :  { %v1699_v60 = vadd.f32 %v3993_v21, %v3452_v17 }
0x1673   :  { %v2858_v32 = vmul.f32 -1.442695, %v1699_v60 }
0x1675   :  { %3040 = vpow2.f32 %v2858_v32 }
0x167b   :  { %v3041_v36 = vpop.eup %3040 }
0x167c   :  { %v1703_v0 = vadd.f32 1.0, %v3041_v36 }
0x167e   :  { %3042 = vrcp.f32 %v1703_v0  ;;  %v1715_v4 = vand.u32 2147483648, %v1703_v0  ;;  %v1713_v1 = vand.u32 2147483647, %v1703_v0  ;;  %vm1709_vm11 = vweird.f32 %v1703_v0 }
0x1680   :  { %v1716_v10 = vor.u32 1.1754944e-38, %v1715_v4  ;;  %vm1714_vm13 = vcmp.eq.f32.partialorder %v1713_v1, 8.507059e+37  ;;  %v4046_v1 = vld [vmem:[%s4588_s7] ss:$0 sm:$0xff] }
0x1684   :  { %v3043_v48 = vpop.eup %3042 }
0x1685   :  { %v1705_v27 = vmul.f32 %v3043_v48, %v1703_v0  ;;  %vm1710_vm10 = vweird.f32 %v3043_v48 }
0x1686   :  { %vm1711_vm12 = vmor %vm1709_vm11, %vm1710_vm10 }
0x1687   :  { %v1706_v43 = vsub.f32 1.0, %v1705_v27 }
0x1689   :  { %v1707_v2 = vmul.f32 %v3043_v48, %v1706_v43 }
0x168b   :  { %v1708_v46 = vadd.f32 %v3043_v48, %v1707_v2 }
0x168d   :  { %v1712_v59 = vsel %vm1711_vm12, %v3043_v48, %v1708_v46 }
0x168e   :  { %v1717_v34 = vsel %vm1714_vm13, %v1716_v10, %v1712_v59 }
0x168f   :  { %v1719_v17 = vmul.f32 %v1717_v34, %v3501_v63  ;;  %v1726_v44 = vsub.f32 1.0, %v1717_v34  ;;  %v1732_v49 = vmul.f32 0.0, %v1717_v34 }
0x1691   :  { %1721 = vrot.lane.b32.xlu1 %v1719_v17, %s3164_s16 }
0x16ac   :  { %v1694_v12 = vpop.permute.xlu2 %1693 }
0x16ad   :  { %v1696_v42 = vmul.f32 %v1694_v12, %v1691_v20 }
0x16af   :  { %v3999_v62 = vadd.f32 %v1697_v40, %v1696_v42 }
0x16b1   :  { %1735 = vrot.lane.b32.xlu0 %v3999_v62, %s3165_s17 }
0x16b9   :  { %1514 = vrot.lane.b32.xlu0 %v1492_v47, %s3168_s4 }
0x1703   :  { %v1722_v63 = vpop.permute.xlu1 %1721 }
0x1704   :  { %v1724_v37 = vadd.f32 %v1722_v63, %v3993_v21 }
0x1706   :  { %3044 = vtanh.f32 %v1724_v37 }
0x170c   :  { %v3045_v55 = vpop.eup %3044 }
0x170d   :  { %1728 = vrot.lane.b32.xlu1 %v3045_v55, %s3165_s17 }
0x1715   :  { %1504 = vrot.lane.b32.xlu1 %v1487_v15, %s3168_s4 }
0x1723   :  { %v4017_v56 = vpop.permute.xlu0 %1735 }
0x172b   :  { %v1515_v50 = vpop.permute.xlu0 %1514 }
0x172c   :  { %vm1532_vm14 = vcmp.ge.f32.partialorder %v1492_v47, %v1515_v50 }
0x172d   :  { %v2855_v41 = vsel %vm1532_vm14, 1.0, %v3161_v35 }
0x172e   :  { %v1556_v28 = vsub.f32 1.0, %v2855_v41 }
0x1730   :  { %1578 = vrot.lane.b32.xlu1 %v1556_v28, %s3169_s11 }
0x177f   :  { %v1729_v58 = vpop.permute.xlu1 %1728 }
0x1780   :  { %v1731_v16 = vmul.f32 %v1729_v58, %v1726_v44 }
0x1782   :  { %v4021_v22 = vadd.f32 %v1732_v49, %v1731_v16 }
0x1784   :  { %1739 = vrot.lane.b32.xlu2 %v4021_v22, %s3166_s5 }
0x1787   :  { %v1505_v24 = vpop.permute.xlu1 %1504 }
0x1788   :  { %vm1527_vm15 = vcmp.ge.f32.partialorder %v1487_v15, %v1505_v24 }
0x1789   :  { %v2850_v26 = vsel %vm1527_vm15, 1.0, %v3161_v35 }
0x178a   :  { %v1551_v60 = vsub.f32 1.0, %v2850_v26 }
0x178c   :  { %1568 = vrot.lane.b32.xlu2 %v1551_v60, %s3169_s11 }
0x17a2   :  { %v1579_v32 = vpop.permute.xlu1 %1578 }
0x17a3   :  { %v1597_v36 = vsel %vm1590_vm2, %v2855_v41, %v1579_v32 }
0x17a4   :  { %1640 = vperm.xlu2 %2910, %v1597_v36   ;;  %1606 = vst.msk [vmem:[%s4595_s14 + $0x30] sm:$0xff] %vm1599_vm3, %v1597_v36 }
0x17de   :  { %v4032_v0 = vpop.permute.xlu2 %1739 }
0x17df   :  { %v1742_v48 = vsel %vm521_vm4, %v4017_v56, %v4032_v0 }
0x17e0   :  { %v1743_v27 = vpack.c.bf16 %v1742_v48, %v1742_v48 }
0x17e2   :  { %2859 = vmatmul.msk.bf16.vlgmr.msra.gmra.mxu1 %vm300_vm1, %v1743_v27 }
0x17e6   :  { %v1569_v43 = vpop.permute.xlu2 %1568 }
0x17e7   :  { %v1592_v4 = vsel %vm1590_vm2, %v2850_v26, %v1569_v43 }
0x17e8   :  { %1601 = vst.msk [vmem:[%s4595_s14 + $0x8] sm:$0xff] %vm1599_vm3, %v1592_v4  ;;  %1615 = vperm.xlu0 %2909, %v1592_v4  }
0x17fe   :  { %v1641_v34 = vpop.permute.xlu2 %1640 }
0x17ff   :  { %v1654_v20 = vmul.f32 %v1641_v34, %v3509_v7 }
0x1801   :  { %v4056_v40 = vadd.f32 %v3975_v31, %v1654_v20  ;;  %v1472_v20 = vadd.f32 %v3937_v14, %v3947_v52 }
0x185a   :  { %v1616_v59 = vpop.permute.xlu0 %1615 }
0x185b   :  { %v1649_v17 = vmul.f32 %v1616_v59, %v3495_v51 }
0x185d   :  { %v4053_v12 = vadd.f32 %v3975_v31, %v1649_v17 }
0x185f   :  { %v1756_v2 = vpop.f32.mrf.mxu1 }
0x1860   :  { %v1757_v46 = vadd.f32 %v4046_v1, %v1756_v2 }
0x1862   :  { %1781 = vrot.lane.b32.xlu1 %v1757_v46, %s3163_s28  ;;  %v1760_v42 = vadd.f32 %v1757_v46, %v4053_v12  ;;  %v1799_v11 = vadd.f32 %v1757_v46, %v4056_v40 }
0x1864   :  { %v2860_v45 = vmul.f32 -1.442695, %v1760_v42  ;;  %v2861_v47 = vmul.f32 -1.442695, %v1799_v11  ;;  %v68_v42 = vld [vmem:[%s4594_s2 + $0x10] sm:$0xff] }
0x1865   :  { %v1488_v11 = vadd.f32 %v1472_v20, %v68_v42 }
0x1866   :  { %3046 = vpow2.f32 %v2860_v45 }
0x1867   :  { %v1758_v10 = vpop.f32.mrf.mxu1  ;;  %3048 = vpow2.f32 %v2861_v47 }
0x186c   :  { %v3047_v63 = vpop.eup %3046 }
0x186d   :  { %v3049_v37 = vpop.eup %3048  ;;  %v1764_v55 = vadd.f32 1.0, %v3047_v63 }
0x186e   :  { %v1803_v51 = vadd.f32 1.0, %v3049_v37 }
0x186f   :  { %3050 = vrcp.f32 %v1764_v55  ;;  %vm1770_vm6 = vweird.f32 %v1764_v55  ;;  %v1776_v24 = vand.u32 2147483648, %v1764_v55  ;;  %v1774_v60 = vand.u32 2147483647, %v1764_v55 }
0x1870   :  { %3052 = vrcp.f32 %v1803_v51  ;;  %v1815_v16 = vand.u32 2147483648, %v1803_v51  ;;  %vm1809_vm7 = vweird.f32 %v1803_v51  ;;  %v1813_v26 = vand.u32 2147483647, %v1803_v51 }
0x1871   :  { %v1777_v27 = vor.u32 1.1754944e-38, %v1776_v24  ;;  %vm1775_vm11 = vcmp.eq.f32.partialorder %v1774_v60, 8.507059e+37 }
0x1872   :  { %v1816_v48 = vor.u32 1.1754944e-38, %v1815_v16  ;;  %vm1814_vm10 = vcmp.eq.f32.partialorder %v1813_v26, 8.507059e+37 }
0x1875   :  { %v3051_v7 = vpop.eup %3050 }
0x1876   :  { %v3053_v5 = vpop.eup %3052  ;;  %v1766_v15 = vmul.f32 %v3051_v7, %v1764_v55  ;;  %vm1771_vm0 = vweird.f32 %v3051_v7 }
0x1877   :  { %v1805_v33 = vmul.f32 %v3053_v5, %v1803_v51  ;;  %vm1810_vm5 = vweird.f32 %v3053_v5  ;;  %vm1772_vm8 = vmor %vm1770_vm6, %vm1771_vm0 }
0x1878   :  { %v1767_v41 = vsub.f32 1.0, %v1766_v15  ;;  %vm1811_vm9 = vmor %vm1809_vm7, %vm1810_vm5 }
0x1879   :  { %v1806_v50 = vsub.f32 1.0, %v1805_v33 }
0x187a   :  { %v1768_v44 = vmul.f32 %v3051_v7, %v1767_v41 }
0x187b   :  { %v1807_v28 = vmul.f32 %v3053_v5, %v1806_v50 }
0x187c   :  { %v1769_v49 = vadd.f32 %v3051_v7, %v1768_v44 }
0x187d   :  { %v1808_v58 = vadd.f32 %v3053_v5, %v1807_v28 }
0x187e   :  { %v1773_v36 = vsel %vm1772_vm8, %v3051_v7, %v1769_v49  ;;  %v71_v49 = vld [vmem:[%s4594_s2 + $0x28] sm:$0xff] }
0x187f   :  { %v1812_v32 = vsel %vm1811_vm9, %v3053_v5, %v1808_v58  ;;  %v1778_v2 = vsel %vm1775_vm11, %v1777_v27, %v1773_v36 }
0x1880   :  { %v1817_v43 = vsel %vm1814_vm10, %v1816_v48, %v1812_v32  ;;  %v1791_v50 = vsub.f32 1.0, %v1778_v2  ;;  %v1797_v28 = vmul.f32 %v1778_v2, %v3999_v62 }
0x1881   :  { %v1826_v37 = vsub.f32 1.0, %v1817_v43  ;;  %v1832_v51 = vmul.f32 %v1817_v43, %v4021_v22  ;;  %v1479_v22 = vadd.f32 %v3937_v14, %v3954_v25 }
0x1883   :  { %v1491_v16 = vadd.f32 %v1479_v22, %v71_v49 }
0x18d4   :  { %v1782_v4 = vpop.permute.xlu1 %1781 }
0x18d5   :  { %v1784_v46 = vmul.f32 %v1782_v4, %v1778_v2  ;;  %v1819_v10 = vmul.f32 %v1817_v43, %v1782_v4  ;;  %v4601_v43 = vmov 0  }
0x18d7   :  { %1821 = vrot.lane.b32.xlu2 %v1819_v10, %s3164_s16  ;;  %1786 = vrot.lane.b32.xlu0 %v1784_v46, %s3164_s16 }
0x1931   :  { %v1822_v59 = vpop.permute.xlu2 %1821 }
0x1932   :  { %v1824_v34 = vadd.f32 %v1822_v59, %v4056_v40 }
0x1934   :  { %3054 = vtanh.f32 %v1824_v34 }
0x193a   :  { %v3055_v17 = vpop.eup %3054 }
0x193b   :  { %1828 = vrot.lane.b32.xlu0 %v3055_v17, %s3165_s17 }
0x1943   :  { %1506 = vrot.lane.b32.xlu0 %v1488_v11, %s3168_s4 }
0x1949   :  { %v1787_v45 = vpop.permute.xlu0 %1786 }
0x194a   :  { %v1789_v47 = vadd.f32 %v1787_v45, %v4053_v12 }
0x194c   :  { %3056 = vtanh.f32 %v1789_v47 }
0x1952   :  { %v3057_v63 = vpop.eup %3056 }
0x1953   :  { %1793 = vrot.lane.b32.xlu1 %v3057_v63, %s3165_s17 }
0x19ad   :  { %v1829_v55 = vpop.permute.xlu0 %1828 }
0x19ae   :  { %v1831_v7 = vmul.f32 %v1829_v55, %v1826_v37 }
0x19b0   :  { %v4073_v52 = vadd.f32 %v1832_v51, %v1831_v7 }
0x19b2   :  { %1839 = vrot.lane.b32.xlu1 %v4073_v52, %s3166_s5 }
0x19b5   :  { %v1507_v5 = vpop.permute.xlu0 %1506 }
0x19b6   :  { %vm1528_vm12 = vcmp.ge.f32.partialorder %v1488_v11, %v1507_v5 }
0x19b7   :  { %v2851_v33 = vsel %vm1528_vm12, 1.0, %v3161_v35 }
0x19b8   :  { %v1552_v15 = vsub.f32 1.0, %v2851_v33 }
0x19ba   :  { %1570 = vrot.lane.b32.xlu1 %v1552_v15, %s3169_s11 }
0x19c5   :  { %v1794_v41 = vpop.permute.xlu1 %1793 }
0x19c6   :  { %v1796_v44 = vmul.f32 %v1794_v41, %v1791_v50 }
0x19c8   :  { %v4080_v58 = vadd.f32 %v1797_v28, %v1796_v44 }
0x19ca   :  { %1835 = vrot.lane.b32.xlu2 %v4080_v58, %s3165_s17 }
0x19d2   :  { %1512 = vrot.lane.b32.xlu2 %v1491_v16, %s3168_s4 }
0x1a24   :  { %v4090_v24 = vpop.permute.xlu2 %1835  ;;  %v4092_v26 = vpop.permute.xlu1 %1839 }
0x1a25   :  { %v1842_v62 = vsel %vm521_vm4, %v4090_v24, %v4092_v26 }
0x1a26   :  { %v1843_v60 = vpack.c.bf16 %v1842_v62, %v1842_v62 }
0x1a28   :  { %2862 = vmatmul.msk.bf16.vlgmr.msrb.gmra.mxu0 %vm300_vm1, %v1843_v60 }
0x1a2c   :  { %v1513_v32 = vpop.permute.xlu2 %1512  ;;  %v1571_v25 = vpop.permute.xlu1 %1570 }
0x1a2d   :  { %vm1531_vm13 = vcmp.ge.f32.partialorder %v1491_v16, %v1513_v32  ;;  %v1593_v36 = vsel %vm1590_vm2, %v2851_v33, %v1571_v25 }
0x1a2e   :  { %v2854_v48 = vsel %vm1531_vm13, 1.0, %v3161_v35  ;;  %1620 = vperm.xlu2 %2910, %v1593_v36   ;;  %1602 = vst.msk [vmem:[%s4595_s14 + $0x10] sm:$0xff] %vm1599_vm3, %v1593_v36 }
0x1a2f   :  { %v1555_v27 = vsub.f32 1.0, %v2854_v48 }
0x1a31   :  { %1576 = vrot.lane.b32.xlu0 %v1555_v27, %s3169_s11 }
0x1a36   :  { %2911 = vset.pattern.permute.xlu2 %v4601_v43 }
0x1a88   :  { %v1621_v34 = vpop.permute.xlu2 %1620 }
0x1a89   :  { %v1650_v17 = vmul.f32 %v1621_v34, %v3497_v54 }
0x1a8b   :  { %v4115_v20 = vadd.f32 %v3975_v31, %v1650_v17 }
0x1aa3   :  { %v1577_v4 = vpop.permute.xlu0 %1576 }
0x1aa4   :  { %v1596_v2 = vsel %vm1590_vm2, %v2854_v48, %v1577_v4 }
0x1aa5   :  { %v1856_v46 = vpop.f32.mrf.mxu0  ;;  %1635 = vperm.xlu1 %2908, %v1596_v2   ;;  %1605 = vst.msk [vmem:[%s4595_s14 + $0x28] sm:$0xff] %vm1599_vm3, %v1596_v2 }
0x1aa6   :  { %v1857_v10 = vadd.f32 %v4046_v1, %v1856_v46 }
0x1aa8   :  { %1881 = vrot.lane.b32.xlu0 %v1857_v10, %s3163_s28  ;;  %v1860_v42 = vadd.f32 %v1857_v10, %v4115_v20 }
0x1aaa   :  { %v2863_v11 = vmul.f32 -1.442695, %v1860_v42 }
0x1aac   :  { %3058 = vpow2.f32 %v2863_v11 }
0x1aad   :  { %v1858_v59 = vpop.f32.mrf.mxu0 }
0x1ab2   :  { %v3059_v45 = vpop.eup %3058 }
0x1ab3   :  { %v1864_v47 = vadd.f32 1.0, %v3059_v45 }
0x1ab5   :  { %3060 = vrcp.f32 %v1864_v47  ;;  %v1876_v5 = vand.u32 2147483648, %v1864_v47  ;;  %vm1870_vm15 = vweird.f32 %v1864_v47  ;;  %v1874_v33 = vand.u32 2147483647, %v1864_v47 }
0x1ab7   :  { %v1877_v41 = vor.u32 1.1754944e-38, %v1876_v5  ;;  %vm1875_vm5 = vcmp.eq.f32.partialorder %v1874_v33, 8.507059e+37 }
0x1abb   :  { %v3061_v63 = vpop.eup %3060 }
0x1abc   :  { %v1866_v37 = vmul.f32 %v3061_v63, %v1864_v47  ;;  %vm1871_vm14 = vweird.f32 %v3061_v63 }
0x1abd   :  { %vm1872_vm0 = vmor %vm1870_vm15, %vm1871_vm14 }
0x1abe   :  { %v1867_v55 = vsub.f32 1.0, %v1866_v37  ;;  %v1474_v37 = vadd.f32 %v3937_v14, %v3949_v23  ;;  %v1477_v23 = vadd.f32 %v3937_v14, %v3951_v53 }
0x1ac0   :  { %v1868_v51 = vmul.f32 %v3061_v63, %v1867_v55  ;;  %v69_v55 = vld [vmem:[%s4594_s2 + $0x18] sm:$0xff] }
0x1ac2   :  { %v1869_v7 = vadd.f32 %v3061_v63, %v1868_v51  ;;  %v1489_v51 = vadd.f32 %v1474_v37, %v69_v55 }
0x1ac4   :  { %v1873_v15 = vsel %vm1872_vm0, %v3061_v63, %v1869_v7 }
0x1ac5   :  { %v1878_v44 = vsel %vm1875_vm5, %v1877_v41, %v1873_v15 }
0x1ac6   :  { %v1891_v7 = vsub.f32 1.0, %v1878_v44  ;;  %v1897_v33 = vmul.f32 %v1878_v44, %v4080_v58 }
0x1b17   :  { %v1636_v54 = vpop.permute.xlu1 %1635 }
0x1b18   :  { %v1653_v50 = vmul.f32 %v1636_v54, %v3507_v6 }
0x1b1a   :  { %v4120_v28 = vadd.f32 %v3975_v31, %v1653_v50  ;;  %v1882_v22 = vpop.permute.xlu0 %1881  ;;  %v70_v50 = vld [vmem:[%s4594_s2 + $0x20] sm:$0xff] }
0x1b1b   :  { %v1884_v49 = vmul.f32 %v1882_v22, %v1878_v44  ;;  %v1490_v41 = vadd.f32 %v1477_v23, %v70_v50 }
0x1b1c   :  { %v1899_v16 = vadd.f32 %v1857_v10, %v4120_v28 }
0x1b1d   :  { %1886 = vrot.lane.b32.xlu2 %v1884_v49, %s3164_s16 }
0x1b1e   :  { %v2864_v62 = vmul.f32 -1.442695, %v1899_v16 }
0x1b20   :  { %3062 = vpow2.f32 %v2864_v62 }
0x1b26   :  { %v3063_v60 = vpop.eup %3062 }
0x1b27   :  { %v1903_v32 = vadd.f32 1.0, %v3063_v60 }
0x1b29   :  { %3064 = vrcp.f32 %v1903_v32  ;;  %v1915_v48 = vand.u32 2147483648, %v1903_v32  ;;  %v1913_v4 = vand.u32 2147483647, %v1903_v32  ;;  %vm1909_vm7 = vweird.f32 %v1903_v32 }
0x1b2b   :  { %v1916_v46 = vor.u32 1.1754944e-38, %v1915_v48  ;;  %vm1914_vm9 = vcmp.eq.f32.partialorder %v1913_v4, 8.507059e+37 }
0x1b2f   :  { %v3065_v25 = vpop.eup %3064 }
0x1b30   :  { %v1905_v36 = vmul.f32 %v3065_v25, %v1903_v32  ;;  %vm1910_vm6 = vweird.f32 %v3065_v25 }
0x1b31   :  { %vm1911_vm8 = vmor %vm1909_vm7, %vm1910_vm6 }
0x1b32   :  { %v1906_v6 = vsub.f32 1.0, %v1905_v36 }
0x1b34   :  { %v1907_v27 = vmul.f32 %v3065_v25, %v1906_v6 }
0x1b36   :  { %v1908_v2 = vadd.f32 %v3065_v25, %v1907_v27 }
0x1b38   :  { %v1912_v59 = vsel %vm1911_vm8, %v3065_v25, %v1908_v2 }
0x1b39   :  { %v1917_v10 = vsel %vm1914_vm9, %v1916_v46, %v1912_v59 }
0x1b3a   :  { %v1919_v34 = vmul.f32 %v1917_v10, %v1882_v22  ;;  %v1926_v22 = vsub.f32 1.0, %v1917_v10  ;;  %v1932_v58 = vmul.f32 %v1917_v10, %v4073_v52 }
0x1b3c   :  { %1921 = vrot.lane.b32.xlu1 %v1919_v34, %s3164_s16 }
0x1b77   :  { %v1887_v17 = vpop.permute.xlu2 %1886 }
0x1b78   :  { %v1889_v42 = vadd.f32 %v1887_v17, %v4115_v20 }
0x1b7a   :  { %3066 = vtanh.f32 %v1889_v42 }
0x1b80   :  { %v3067_v11 = vpop.eup %3066 }
0x1b81   :  { %1893 = vrot.lane.b32.xlu0 %v3067_v11, %s3165_s17 }
0x1bae   :  { %v1922_v45 = vpop.permute.xlu1 %1921 }
0x1baf   :  { %v1924_v47 = vadd.f32 %v1922_v45, %v4120_v28 }
0x1bb1   :  { %3068 = vtanh.f32 %v1924_v47 }
0x1bb7   :  { %v3069_v63 = vpop.eup %3068 }
0x1bb8   :  { %1928 = vrot.lane.b32.xlu2 %v3069_v63, %s3165_s17 }
0x1bc0   :  { %1508 = vrot.lane.b32.xlu2 %v1489_v51, %s3168_s4 }
0x1bf3   :  { %v1894_v5 = vpop.permute.xlu0 %1893 }
0x1bf4   :  { %v1896_v54 = vmul.f32 %v1894_v5, %v1891_v7 }
0x1bf6   :  { %v4136_v15 = vadd.f32 %v1897_v33, %v1896_v54 }
0x1bf8   :  { %1935 = vrot.lane.b32.xlu1 %v4136_v15, %s3165_s17 }
0x1c00   :  { %1510 = vrot.lane.b32.xlu1 %v1490_v41, %s3168_s4 }
0x1c12   :  { %v1929_v49 = vpop.permute.xlu2 %1928 }
0x1c13   :  { %v1931_v44 = vmul.f32 %v1929_v49, %v1926_v22 }
0x1c15   :  { %v4147_v16 = vadd.f32 %v1932_v58, %v1931_v44 }
0x1c17   :  { %1939 = vrot.lane.b32.xlu0 %v4147_v16, %s3166_s5 }
0x1c1a   :  { %v1509_v62 = vpop.permute.xlu2 %1508 }
0x1c1b   :  { %vm1529_vm10 = vcmp.ge.f32.partialorder %v1489_v51, %v1509_v62 }
0x1c1c   :  { %v2852_v14 = vsel %vm1529_vm10, 1.0, %v3161_v35 }
0x1c1d   :  { %v1553_v53 = vsub.f32 1.0, %v2852_v14 }
0x1c1f   :  { %1572 = vrot.lane.b32.xlu0 %v1553_v53, %s3169_s11 }
0x1c6a   :  { %v4153_v60 = vpop.permute.xlu1 %1935 }
0x1c72   :  { %v1511_v32 = vpop.permute.xlu1 %1510 }
0x1c73   :  { %vm1530_vm11 = vcmp.ge.f32.partialorder %v1490_v41, %v1511_v32 }
0x1c74   :  { %v2853_v25 = vsel %vm1530_vm11, 1.0, %v3161_v35 }
0x1c75   :  { %v1554_v52 = vsub.f32 1.0, %v2853_v25 }
0x1c77   :  { %1574 = vrot.lane.b32.xlu2 %v1554_v52, %s3169_s11 }
0x1c89   :  { %v4157_v36 = vpop.permute.xlu0 %1939 }
0x1c8a   :  { %v1942_v6 = vsel %vm521_vm4, %v4153_v60, %v4157_v36 }
0x1c8b   :  { %v1943_v48 = vpack.c.bf16 %v1942_v6, %v1942_v6 }
0x1c8d   :  { %2865 = vmatmul.msk.bf16.vlgmr.msrb.gmra.mxu3 %vm300_vm1, %v1943_v48 }
0x1c91   :  { %v1573_v27 = vpop.permute.xlu0 %1572 }
0x1c92   :  { %v1594_v4 = vsel %vm1590_vm2, %v2852_v14, %v1573_v27 }
0x1c93   :  { %1625 = vperm.xlu1 %2908, %v1594_v4   ;;  %1603 = vst.msk [vmem:[%s4595_s14 + $0x18] sm:$0xff] %vm1599_vm3, %v1594_v4 }
0x1c9b   :  { %2912 = vset.pattern.permute.xlu1 %v4601_v43 }
0x1cd1   :  { %v1575_v35 = vpop.permute.xlu2 %1574 }
0x1cd2   :  { %v1595_v2 = vsel %vm1590_vm2, %v2853_v25, %v1575_v35 }
0x1cd3   :  { %1630 = vperm.xlu0 %2909, %v1595_v2   ;;  %1604 = vst.msk [vmem:[%s4595_s14 + $0x20] sm:$0xff] %vm1599_vm3, %v1595_v2 }
0x1cdb   :  { %2913 = vset.pattern.permute.xlu0 %v4601_v43 }
0x1d05   :  { %v1626_v34 = vpop.permute.xlu1 %1625 }
0x1d06   :  { %v1651_v17 = vmul.f32 %v1626_v34, %v3499_v57 }
0x1d08   :  { %v4179_v42 = vadd.f32 %v3975_v31, %v1651_v17 }
0x1d10   :  { %v1956_v46 = vpop.f32.mrf.mxu3 }
0x1d11   :  { %v1957_v59 = vadd.f32 %v4046_v1, %v1956_v46 }
0x1d13   :  { %1981 = vrot.lane.b32.xlu2 %v1957_v59, %s3163_s28  ;;  %v1960_v11 = vadd.f32 %v1957_v59, %v4179_v42 }
0x1d15   :  { %v2866_v45 = vmul.f32 -1.442695, %v1960_v11 }
0x1d17   :  { %3070 = vpow2.f32 %v2866_v45 }
0x1d18   :  { %v1958_v10 = vpop.f32.mrf.mxu3 }
0x1d1d   :  { %v3071_v37 = vpop.eup %3070 }
0x1d1e   :  { %v1964_v7 = vadd.f32 1.0, %v3071_v37 }
0x1d20   :  { %vm1970_vm12 = vweird.f32 %v1964_v7  ;;  %v1976_v62 = vand.u32 2147483648, %v1964_v7  ;;  %v1974_v53 = vand.u32 2147483647, %v1964_v7 }
0x1d22   :  { %v1977_v6 = vor.u32 1.1754944e-38, %v1976_v62  ;;  %vm1975_vm5 = vcmp.eq.f32.partialorder %v1974_v53, 8.507059e+37 }
0x1d45   :  { %v1631_v47 = vpop.permute.xlu0 %1630 }
0x1d46   :  { %v1652_v63 = vmul.f32 %v1631_v47, %v3503_v3 }
0x1d48   :  { %v4184_v43 = vadd.f32 %v3975_v31, %v1652_v63 }
0x1d4a   :  { %v1999_v55 = vadd.f32 %v1957_v59, %v4184_v43 }
0x1d4c   :  { %v2867_v51 = vmul.f32 -1.442695, %v1999_v55 }
0x1d4e   :  { %3072 = vpow2.f32 %v2867_v51 }
0x1d4f   :  { %3074 = vrcp.f32 %v1964_v7 }
0x1d54   :  { %v3073_v57 = vpop.eup %3072 }
0x1d55   :  { %v2003_v5 = vadd.f32 1.0, %v3073_v57  ;;  %v3075_v33 = vpop.eup %3074 }
0x1d56   :  { %v1966_v54 = vmul.f32 %v3075_v33, %v1964_v7  ;;  %vm1971_vm2 = vweird.f32 %v3075_v33 }
0x1d57   :  { %3076 = vrcp.f32 %v2003_v5  ;;  %v2015_v44 = vand.u32 2147483648, %v2003_v5  ;;  %vm2009_vm13 = vweird.f32 %v2003_v5  ;;  %v2013_v14 = vand.u32 2147483647, %v2003_v5  ;;  %vm1972_vm14 = vmor %vm1970_vm12, %vm1971_vm2 }
0x1d58   :  { %v1967_v41 = vsub.f32 1.0, %v1966_v54 }
0x1d59   :  { %v2016_v52 = vor.u32 1.1754944e-38, %v2015_v44  ;;  %vm2014_vm0 = vcmp.eq.f32.partialorder %v2013_v14, 8.507059e+37 }
0x1d5a   :  { %v1968_v49 = vmul.f32 %v3075_v33, %v1967_v41 }
0x1d5c   :  { %v1969_v58 = vadd.f32 %v3075_v33, %v1968_v49 }
0x1d5d   :  { %v3077_v23 = vpop.eup %3076 }
0x1d5e   :  { %v2005_v50 = vmul.f32 %v3077_v23, %v2003_v5  ;;  %vm2010_vm3 = vweird.f32 %v3077_v23  ;;  %v1973_v25 = vsel %vm1972_vm14, %v3075_v33, %v1969_v58 }
0x1d5f   :  { %vm2011_vm15 = vmor %vm2009_vm13, %vm2010_vm3  ;;  %v1978_v4 = vsel %vm1975_vm5, %v1977_v6, %v1973_v25 }
0x1d60   :  { %v2006_v22 = vsub.f32 1.0, %v2005_v50  ;;  %v1991_v45 = vsub.f32 1.0, %v1978_v4  ;;  %v1997_v63 = vmul.f32 %v1978_v4, %v4136_v15 }
0x1d62   :  { %v2007_v3 = vmul.f32 %v3077_v23, %v2006_v22 }
0x1d64   :  { %v2008_v31 = vadd.f32 %v3077_v23, %v2007_v3 }
0x1d66   :  { %v2012_v32 = vsel %vm2011_vm15, %v3077_v23, %v2008_v31 }
0x1d67   :  { %v2017_v48 = vsel %vm2014_vm0, %v2016_v52, %v2012_v32 }
0x1d68   :  { %v2026_v51 = vsub.f32 1.0, %v2017_v48  ;;  %v2032_v57 = vmul.f32 %v2017_v48, %v4147_v16 }
0x1d6d   :  { %v1982_v27 = vpop.permute.xlu2 %1981 }
0x1d6e   :  { %v1984_v35 = vmul.f32 %v1982_v27, %v1978_v4  ;;  %v2019_v2 = vmul.f32 %v2017_v48, %v1982_v27 }
0x1d70   :  { %2021 = vrot.lane.b32.xlu0 %v2019_v2, %s3164_s16  ;;  %1986 = vrot.lane.b32.xlu1 %v1984_v35, %s3164_s16 }
0x1de2   :  { %v2022_v46 = vpop.permute.xlu0 %2021  ;;  %v1987_v59 = vpop.permute.xlu1 %1986 }
0x1de3   :  { %v2024_v10 = vadd.f32 %v2022_v46, %v4184_v43  ;;  %v1989_v34 = vadd.f32 %v1987_v59, %v4179_v42 }
0x1de5   :  { %3078 = vtanh.f32 %v2024_v10 }
0x1de6   :  { %3080 = vtanh.f32 %v1989_v34 }
0x1deb   :  { %v3079_v17 = vpop.eup %3078 }
0x1dec   :  { %v3081_v11 = vpop.eup %3080  ;;  %2028 = vrot.lane.b32.xlu1 %v3079_v17, %s3165_s17 }
0x1ded   :  { %1993 = vrot.lane.b32.xlu2 %v3081_v11, %s3165_s17 }
0x1e47   :  { %v1994_v47 = vpop.permute.xlu2 %1993 }
0x1e48   :  { %v1996_v37 = vmul.f32 %v1994_v47, %v1991_v45 }
0x1e4a   :  { %v4194_v55 = vadd.f32 %v1997_v63, %v1996_v37 }
0x1e4c   :  { %2035 = vrot.lane.b32.xlu0 %v4194_v55, %s3165_s17 }
0x1e5e   :  { %v2029_v7 = vpop.permute.xlu1 %2028 }
0x1e5f   :  { %v2031_v5 = vmul.f32 %v2029_v7, %v2026_v51 }
0x1e61   :  { %v4199_v33 = vadd.f32 %v2032_v57, %v2031_v5 }
0x1e63   :  { %2039 = vrot.lane.b32.xlu2 %v4199_v33, %s3166_s5 }
0x1ebd   :  { %v4203_v54 = vpop.permute.xlu2 %2039 }
0x1ebe   :  { %v4205_v23 = vpop.permute.xlu0 %2035 }
0x1ebf   :  { %v2042_v15 = vsel %vm521_vm4, %v4205_v23, %v4203_v54 }
0x1ec0   :  { %v2043_v50 = vpack.c.bf16 %v2042_v15, %v2042_v15 }
0x1ec2   :  { %2868 = vmatmul.msk.bf16.vlgmr.msrb.gmra.mxu2 %vm300_vm1, %v2043_v50 }
0x1f45   :  { %v2056_v41 = vpop.f32.mrf.mxu2 }
0x1f46   :  { %v2057_v16 = vadd.f32 %v4046_v1, %v2056_v41 }
0x1f48   :  { %2081 = vrot.lane.b32.xlu1 %v2057_v16, %s3163_s28  ;;  %v2060_v3 = vadd.f32 %v2057_v16, %v4184_v43  ;;  %v2099_v49 = vadd.f32 %v2057_v16, %v4179_v42 }
0x1f4a   :  { %v2869_v31 = vmul.f32 -1.442695, %v2060_v3  ;;  %v2870_v58 = vmul.f32 -1.442695, %v2099_v49 }
0x1f4c   :  { %3082 = vpow2.f32 %v2869_v31 }
0x1f4d   :  { %v2058_v22 = vpop.f32.mrf.mxu2  ;;  %3084 = vpow2.f32 %v2870_v58 }
0x1f52   :  { %v3083_v44 = vpop.eup %3082 }
0x1f53   :  { %v3085_v62 = vpop.eup %3084  ;;  %v2064_v14 = vadd.f32 1.0, %v3083_v44 }
0x1f54   :  { %v2103_v53 = vadd.f32 1.0, %v3085_v62 }
0x1f55   :  { %3086 = vrcp.f32 %v2064_v14  ;;  %vm2070_vm8 = vweird.f32 %v2064_v14  ;;  %v2076_v59 = vand.u32 2147483648, %v2064_v14  ;;  %v2074_v34 = vand.u32 2147483647, %v2064_v14 }
0x1f56   :  { %3088 = vrcp.f32 %v2103_v53  ;;  %v2115_v10 = vand.u32 2147483648, %v2103_v53  ;;  %vm2109_vm10 = vweird.f32 %v2103_v53  ;;  %v2113_v17 = vand.u32 2147483647, %v2103_v53 }
0x1f57   :  { %v2077_v47 = vor.u32 1.1754944e-38, %v2076_v59  ;;  %vm2075_vm2 = vcmp.eq.f32.partialorder %v2074_v34, 8.507059e+37 }
0x1f58   :  { %v2116_v63 = vor.u32 1.1754944e-38, %v2115_v10  ;;  %vm2114_vm3 = vcmp.eq.f32.partialorder %v2113_v17, 8.507059e+37 }
0x1f5b   :  { %v3087_v32 = vpop.eup %3086 }
0x1f5c   :  { %v3089_v25 = vpop.eup %3088  ;;  %v2066_v52 = vmul.f32 %v3087_v32, %v2064_v14  ;;  %vm2071_vm6 = vweird.f32 %v3087_v32 }
0x1f5d   :  { %v2105_v6 = vmul.f32 %v3089_v25, %v2103_v53  ;;  %vm2110_vm7 = vweird.f32 %v3089_v25  ;;  %vm2072_vm9 = vmor %vm2070_vm8, %vm2071_vm6 }
0x1f5e   :  { %v2067_v48 = vsub.f32 1.0, %v2066_v52  ;;  %vm2111_vm11 = vmor %vm2109_vm10, %vm2110_vm7 }
0x1f5f   :  { %v2106_v27 = vsub.f32 1.0, %v2105_v6 }
0x1f60   :  { %v2068_v4 = vmul.f32 %v3087_v32, %v2067_v48 }
0x1f61   :  { %v2107_v35 = vmul.f32 %v3089_v25, %v2106_v27 }
0x1f62   :  { %v2069_v2 = vadd.f32 %v3087_v32, %v2068_v4 }
0x1f63   :  { %v2108_v46 = vadd.f32 %v3089_v25, %v2107_v35 }
0x1f64   :  { %v2073_v11 = vsel %vm2072_vm9, %v3087_v32, %v2069_v2 }
0x1f65   :  { %v2112_v45 = vsel %vm2111_vm11, %v3089_v25, %v2108_v46  ;;  %v2078_v51 = vsel %vm2075_vm2, %v2077_v47, %v2073_v11 }
0x1f66   :  { %v2117_v7 = vsel %vm2114_vm3, %v2116_v63, %v2112_v45  ;;  %v2097_v53 = vmul.f32 %v2078_v51, %v4194_v55 }
0x1f67   :  { %v2126_v49 = vsub.f32 1.0, %v2117_v7  ;;  %v2132_v58 = vmul.f32 %v2117_v7, %v4199_v33 }
0x1fba   :  { %v2082_v37 = vpop.permute.xlu1 %2081 }
0x1fbb   :  { %v2084_v57 = vmul.f32 %v2082_v37, %v2078_v51  ;;  %v2119_v5 = vmul.f32 %v2117_v7, %v2082_v37 }
0x1fbd   :  { %2121 = vrot.lane.b32.xlu2 %v2119_v5, %s3164_s16  ;;  %2086 = vrot.lane.b32.xlu0 %v2084_v57, %s3164_s16 }
0x2017   :  { %v2122_v15 = vpop.permute.xlu2 %2121 }
0x2018   :  { %v2124_v50 = vadd.f32 %v2122_v15, %v4179_v42  ;;  %v2091_v42 = vsub.f32 1.0, %v2078_v51 }
0x201a   :  { %3090 = vtanh.f32 %v2124_v50 }
0x2020   :  { %v3091_v41 = vpop.eup %3090 }
0x2021   :  { %2128 = vrot.lane.b32.xlu0 %v3091_v41, %s3165_s17 }
0x202f   :  { %v2087_v16 = vpop.permute.xlu0 %2086 }
0x2030   :  { %v2089_v22 = vadd.f32 %v2087_v16, %v4184_v43 }
0x2032   :  { %3092 = vtanh.f32 %v2089_v22 }
0x2038   :  { %v3093_v3 = vpop.eup %3092 }
0x2039   :  { %2093 = vrot.lane.b32.xlu1 %v3093_v3, %s3165_s17 }
0x2093   :  { %v2129_v31 = vpop.permute.xlu0 %2128 }
0x2094   :  { %v2131_v44 = vmul.f32 %v2129_v31, %v2126_v49 }
0x2096   :  { %v4222_v62 = vadd.f32 %v2132_v58, %v2131_v44 }
0x2098   :  { %2139 = vrot.lane.b32.xlu1 %v4222_v62, %s3166_s5 }
0x20ab   :  { %v2094_v14 = vpop.permute.xlu1 %2093 }
0x20ac   :  { %v2096_v32 = vmul.f32 %v2094_v14, %v2091_v42 }
0x20ae   :  { %v4227_v43 = vadd.f32 %v2097_v53, %v2096_v32 }
0x20b0   :  { %2135 = vrot.lane.b32.xlu2 %v4227_v43, %s3165_s17 }
0x210a   :  { %v4231_v25 = vpop.permute.xlu2 %2135  ;;  %v4233_v52 = vpop.permute.xlu1 %2139 }
0x210b   :  { %v2142_v33 = vsel %vm521_vm4, %v4231_v25, %v4233_v52 }
0x210c   :  { %v2143_v6 = vpack.c.bf16 %v2142_v33, %v2142_v33 }
0x210e   :  { %2871 = vmatmul.msk.bf16.vlgmr.msrb.gmra.mxu1 %vm300_vm1, %v2143_v6 }
0x218b   :  { %v2156_v48 = vpop.f32.mrf.mxu1 }
0x218c   :  { %v2157_v55 = vadd.f32 %v4046_v1, %v2156_v48 }
0x218e   :  { %2181 = vrot.lane.b32.xlu0 %v2157_v55, %s3163_s28  ;;  %v2160_v4 = vadd.f32 %v2157_v55, %v4120_v28  ;;  %v2199_v35 = vadd.f32 %v2157_v55, %v4115_v20 }
0x2190   :  { %v2872_v2 = vmul.f32 -1.442695, %v2160_v4  ;;  %v2873_v46 = vmul.f32 -1.442695, %v2199_v35 }
0x2192   :  { %3094 = vpow2.f32 %v2872_v2 }
0x2193   :  { %v2158_v27 = vpop.f32.mrf.mxu1  ;;  %3096 = vpow2.f32 %v2873_v46 }
0x2198   :  { %v3095_v59 = vpop.eup %3094 }
0x2199   :  { %v3097_v10 = vpop.eup %3096  ;;  %v2164_v34 = vadd.f32 1.0, %v3095_v59 }
0x219a   :  { %v2203_v17 = vadd.f32 1.0, %v3097_v10 }
0x219b   :  { %3098 = vrcp.f32 %v2164_v34  ;;  %vm2170_vm14 = vweird.f32 %v2164_v34  ;;  %v2176_v50 = vand.u32 2147483648, %v2164_v34  ;;  %v2174_v16 = vand.u32 2147483647, %v2164_v34 }
0x219c   :  { %3100 = vrcp.f32 %v2203_v17  ;;  %v2215_v41 = vand.u32 2147483648, %v2203_v17  ;;  %vm2209_vm0 = vweird.f32 %v2203_v17  ;;  %v2213_v22 = vand.u32 2147483647, %v2203_v17 }
0x219d   :  { %v2177_v31 = vor.u32 1.1754944e-38, %v2176_v50  ;;  %vm2175_vm6 = vcmp.eq.f32.partialorder %v2174_v16, 8.507059e+37 }
0x219e   :  { %v2216_v58 = vor.u32 1.1754944e-38, %v2215_v41  ;;  %vm2214_vm7 = vcmp.eq.f32.partialorder %v2213_v22, 8.507059e+37 }
0x21a1   :  { %v3099_v11 = vpop.eup %3098 }
0x21a2   :  { %v3101_v45 = vpop.eup %3100  ;;  %v2166_v47 = vmul.f32 %v3099_v11, %v2164_v34  ;;  %vm2171_vm12 = vweird.f32 %v3099_v11 }
0x21a3   :  { %v2205_v63 = vmul.f32 %v3101_v45, %v2203_v17  ;;  %vm2210_vm13 = vweird.f32 %v3101_v45  ;;  %vm2172_vm15 = vmor %vm2170_vm14, %vm2171_vm12 }
0x21a4   :  { %v2167_v37 = vsub.f32 1.0, %v2166_v47  ;;  %vm2211_vm5 = vmor %vm2209_vm0, %vm2210_vm13 }
0x21a5   :  { %v2206_v51 = vsub.f32 1.0, %v2205_v63 }
0x21a6   :  { %v2168_v7 = vmul.f32 %v3099_v11, %v2167_v37 }
0x21a7   :  { %v2207_v57 = vmul.f32 %v3101_v45, %v2206_v51 }
0x21a8   :  { %v2169_v5 = vadd.f32 %v3099_v11, %v2168_v7 }
0x21a9   :  { %v2208_v15 = vadd.f32 %v3101_v45, %v2207_v57 }
0x21aa   :  { %v2173_v3 = vsel %vm2172_vm15, %v3099_v11, %v2169_v5 }
0x21ab   :  { %v2212_v49 = vsel %vm2211_vm5, %v3101_v45, %v2208_v15  ;;  %v2178_v42 = vsel %vm2175_vm6, %v2177_v31, %v2173_v3 }
0x21ac   :  { %v2217_v14 = vsel %vm2214_vm7, %v2216_v58, %v2212_v49  ;;  %v2191_v35 = vsub.f32 1.0, %v2178_v42  ;;  %v2197_v10 = vmul.f32 %v2178_v42, %v4227_v43 }
0x21ad   :  { %v2226_v2 = vsub.f32 1.0, %v2217_v14 }
0x2200   :  { %v2182_v44 = vpop.permute.xlu0 %2181 }
0x2201   :  { %v2184_v53 = vmul.f32 %v2182_v44, %v2178_v42  ;;  %v2219_v32 = vmul.f32 %v2217_v14, %v2182_v44 }
0x2203   :  { %2221 = vrot.lane.b32.xlu1 %v2219_v32, %s3164_s16  ;;  %2186 = vrot.lane.b32.xlu2 %v2184_v53, %s3164_s16 }
0x225d   :  { %v2187_v33 = vpop.permute.xlu2 %2186 }
0x225e   :  { %v2189_v6 = vadd.f32 %v2187_v33, %v4120_v28  ;;  %v2232_v28 = vmul.f32 %v2217_v14, %v4222_v62 }
0x2260   :  { %3102 = vtanh.f32 %v2189_v6 }
0x2266   :  { %v3103_v48 = vpop.eup %3102 }
0x2267   :  { %2193 = vrot.lane.b32.xlu0 %v3103_v48, %s3165_s17 }
0x2275   :  { %v2222_v55 = vpop.permute.xlu1 %2221 }
0x2276   :  { %v2224_v27 = vadd.f32 %v2222_v55, %v4115_v20 }
0x2278   :  { %3104 = vtanh.f32 %v2224_v27 }
0x227e   :  { %v3105_v4 = vpop.eup %3104 }
0x227f   :  { %2228 = vrot.lane.b32.xlu2 %v3105_v4, %s3165_s17 }
0x22d9   :  { %v2194_v46 = vpop.permute.xlu0 %2193  ;;  %v2229_v59 = vpop.permute.xlu2 %2228 }
0x22da   :  { %v2196_v34 = vmul.f32 %v2194_v46, %v2191_v35  ;;  %v2231_v17 = vmul.f32 %v2229_v59, %v2226_v2 }
0x22dc   :  { %v4251_v11 = vadd.f32 %v2197_v10, %v2196_v34  ;;  %v4253_v45 = vadd.f32 %v2232_v28, %v2231_v17 }
0x22de   :  { %2235 = vrot.lane.b32.xlu1 %v4251_v11, %s3165_s17  ;;  %2239 = vrot.lane.b32.xlu0 %v4253_v45, %s3166_s5 }
0x2350   :  { %v4259_v20 = vpop.permute.xlu1 %2235  ;;  %v4261_v47 = vpop.permute.xlu0 %2239 }
0x2351   :  { %v2242_v43 = vsel %vm521_vm4, %v4259_v20, %v4261_v47 }
0x2352   :  { %v2243_v62 = vpack.c.bf16 %v2242_v43, %v2242_v43 }
0x2354   :  { %2874 = vmatmul.msk.bf16.vlgmr.msra.gmra.mxu0 %vm300_vm1, %v2243_v62 }
0x23d1   :  { %v2256_v63 = vpop.f32.mrf.mxu0 }
0x23d2   :  { %v2257_v37 = vadd.f32 %v4046_v1, %v2256_v63 }
0x23d4   :  { %2281 = vrot.lane.b32.xlu2 %v2257_v37, %s3163_s28  ;;  %v2260_v7 = vadd.f32 %v2257_v37, %v4056_v40  ;;  %v2299_v57 = vadd.f32 %v2257_v37, %v4053_v12 }
0x23d6   :  { %v2875_v5 = vmul.f32 -1.442695, %v2260_v7  ;;  %v2876_v15 = vmul.f32 -1.442695, %v2299_v57 }
0x23d8   :  { %3106 = vpow2.f32 %v2875_v5 }
0x23d9   :  { %v2258_v51 = vpop.f32.mrf.mxu0  ;;  %3108 = vpow2.f32 %v2876_v15 }
0x23de   :  { %v3107_v50 = vpop.eup %3106 }
0x23df   :  { %v3109_v41 = vpop.eup %3108  ;;  %v2264_v16 = vadd.f32 1.0, %v3107_v50 }
0x23e0   :  { %v2303_v22 = vadd.f32 1.0, %v3109_v41 }
0x23e1   :  { %3110 = vrcp.f32 %v2264_v16  ;;  %vm2270_vm10 = vweird.f32 %v2264_v16  ;;  %v2276_v33 = vand.u32 2147483648, %v2264_v16  ;;  %v2274_v48 = vand.u32 2147483647, %v2264_v16 }
0x23e2   :  { %3112 = vrcp.f32 %v2303_v22  ;;  %v2315_v6 = vand.u32 2147483648, %v2303_v22  ;;  %vm2309_vm2 = vweird.f32 %v2303_v22  ;;  %v2313_v55 = vand.u32 2147483647, %v2303_v22 }
0x23e3   :  { %v2277_v35 = vor.u32 1.1754944e-38, %v2276_v33  ;;  %vm2275_vm12 = vcmp.eq.f32.partialorder %v2274_v48, 8.507059e+37 }
0x23e4   :  { %v2316_v2 = vor.u32 1.1754944e-38, %v2315_v6  ;;  %vm2314_vm13 = vcmp.eq.f32.partialorder %v2313_v55, 8.507059e+37 }
0x23e7   :  { %v3111_v3 = vpop.eup %3110 }
0x23e8   :  { %v3113_v49 = vpop.eup %3112  ;;  %v2266_v1 = vmul.f32 %v3111_v3, %v2264_v16  ;;  %vm2271_vm8 = vweird.f32 %v3111_v3 }
0x23e9   :  { %v2305_v31 = vmul.f32 %v3113_v49, %v2303_v22  ;;  %vm2310_vm9 = vweird.f32 %v3113_v49  ;;  %vm2272_vm11 = vmor %vm2270_vm10, %vm2271_vm8 }
0x23ea   :  { %v2267_v58 = vsub.f32 1.0, %v2266_v1  ;;  %vm2311_vm3 = vmor %vm2309_vm2, %vm2310_vm9 }
0x23eb   :  { %v2306_v44 = vsub.f32 1.0, %v2305_v31 }
0x23ec   :  { %v2268_v42 = vmul.f32 %v3111_v3, %v2267_v58 }
0x23ed   :  { %v2307_v14 = vmul.f32 %v3113_v49, %v2306_v44 }
0x23ee   :  { %v2269_v53 = vadd.f32 %v3111_v3, %v2268_v42 }
0x23ef   :  { %v2308_v32 = vadd.f32 %v3113_v49, %v2307_v14 }
0x23f0   :  { %v2273_v27 = vsel %vm2272_vm11, %v3111_v3, %v2269_v53 }
0x23f1   :  { %v2312_v4 = vsel %vm2311_vm3, %v3113_v49, %v2308_v32  ;;  %v2278_v59 = vsel %vm2275_vm12, %v2277_v35, %v2273_v27 }
0x23f2   :  { %v2317_v10 = vsel %vm2314_vm13, %v2316_v2, %v2312_v4  ;;  %v2291_v7 = vsub.f32 1.0, %v2278_v59  ;;  %v2297_v5 = vmul.f32 %v2278_v59, %v4251_v11 }
0x23f3   :  { %v2332_v41 = vmul.f32 %v2317_v10, %v4253_v45  ;;  %v3149_v45 = vld [vmem:[%s4588_s7] ss:$0 sm:$0xff] }
0x242e   :  { %v2282_v46 = vpop.permute.xlu2 %2281 }
0x242f   :  { %v2284_v34 = vmul.f32 %v2282_v46, %v2278_v59  ;;  %v2319_v28 = vmul.f32 %v2317_v10, %v2282_v46 }
0x2431   :  { %2321 = vrot.lane.b32.xlu0 %v2319_v28, %s3164_s16  ;;  %2286 = vrot.lane.b32.xlu1 %v2284_v34, %s3164_s16 }
0x24a3   :  { %v2322_v17 = vpop.permute.xlu0 %2321  ;;  %v2287_v43 = vpop.permute.xlu1 %2286 }
0x24a4   :  { %v2324_v62 = vadd.f32 %v2322_v17, %v4053_v12  ;;  %v2289_v63 = vadd.f32 %v2287_v43, %v4056_v40  ;;  %v2326_v12 = vsub.f32 1.0, %v2317_v10 }
0x24a6   :  { %3114 = vtanh.f32 %v2324_v62 }
0x24a7   :  { %3116 = vtanh.f32 %v2289_v63 }
0x24ac   :  { %v3115_v37 = vpop.eup %3114 }
0x24ad   :  { %v3117_v51 = vpop.eup %3116  ;;  %2328 = vrot.lane.b32.xlu1 %v3115_v37, %s3165_s17 }
0x24ae   :  { %2293 = vrot.lane.b32.xlu2 %v3117_v51, %s3165_s17 }
0x2508   :  { %v2294_v57 = vpop.permute.xlu2 %2293 }
0x2509   :  { %v2296_v15 = vmul.f32 %v2294_v57, %v2291_v7 }
0x250b   :  { %v4278_v50 = vadd.f32 %v2297_v5, %v2296_v15 }
0x250d   :  { %2335 = vrot.lane.b32.xlu0 %v4278_v50, %s3165_s17 }
0x251f   :  { %v2329_v40 = vpop.permute.xlu1 %2328 }
0x2520   :  { %v2331_v16 = vmul.f32 %v2329_v40, %v2326_v12 }
0x2522   :  { %v4283_v22 = vadd.f32 %v2332_v41, %v2331_v16 }
0x2524   :  { %2339 = vrot.lane.b32.xlu2 %v4283_v22, %s3166_s5 }
0x257e   :  { %v4287_v3 = vpop.permute.xlu2 %2339 }
0x257f   :  { %v4289_v49 = vpop.permute.xlu0 %2335 }
0x2580   :  { %v2342_v11 = vsel %vm521_vm4, %v4289_v49, %v4287_v3 }
0x2581   :  { %v2343_v1 = vpack.c.bf16 %v2342_v11, %v2342_v11 }
0x2583   :  { %2877 = vmatmul.msk.bf16.vlgmr.msra.gmra.mxu3 %vm300_vm1, %v2343_v1 }
0x2606   :  { %v2356_v31 = vpop.f32.mrf.mxu3 }
0x2607   :  { %v2357_v58 = vadd.f32 %v3149_v45, %v2356_v31 }
0x2609   :  { %2381 = vrot.lane.b32.xlu1 %v2357_v58, %s3163_s28  ;;  %v2360_v42 = vadd.f32 %v2357_v58, %v3993_v21  ;;  %v2399_v14 = vadd.f32 %v2357_v58, %v3978_v13 }
0x260b   :  { %v2878_v53 = vmul.f32 -1.442695, %v2360_v42  ;;  %v2879_v32 = vmul.f32 -1.442695, %v2399_v14  ;;  %v2441_v42 = vsel %vm521_vm4, %v4205_v23, %v4233_v52 }
0x260c   :  { %v2459_v14 = vsel %vm300_vm1, %v2441_v42, 0.0 }
0x260d   :  { %3118 = vpow2.f32 %v2878_v53 }
0x260e   :  { %v2358_v44 = vpop.f32.mrf.mxu3  ;;  %3120 = vpow2.f32 %v2879_v32 }
0x2613   :  { %v3119_v33 = vpop.eup %3118 }
0x2614   :  { %v3121_v6 = vpop.eup %3120  ;;  %v2364_v48 = vadd.f32 1.0, %v3119_v33 }
0x2615   :  { %v2403_v55 = vadd.f32 1.0, %v3121_v6 }
0x2616   :  { %3122 = vrcp.f32 %v2364_v48  ;;  %vm2370_vm0 = vweird.f32 %v2364_v48  ;;  %v2376_v43 = vand.u32 2147483648, %v2364_v48  ;;  %v2374_v63 = vand.u32 2147483647, %v2364_v48 }
0x2617   :  { %3124 = vrcp.f32 %v2403_v55  ;;  %v2415_v62 = vand.u32 2147483648, %v2403_v55  ;;  %vm2409_vm6 = vweird.f32 %v2403_v55  ;;  %v2413_v37 = vand.u32 2147483647, %v2403_v55 }
0x2618   :  { %v2377_v57 = vor.u32 1.1754944e-38, %v2376_v43  ;;  %vm2375_vm8 = vcmp.eq.f32.partialorder %v2374_v63, 8.507059e+37 }
0x2619   :  { %v2416_v5 = vor.u32 1.1754944e-38, %v2415_v62  ;;  %vm2414_vm9 = vcmp.eq.f32.partialorder %v2413_v37, 8.507059e+37 }
0x261c   :  { %v3123_v27 = vpop.eup %3122 }
0x261d   :  { %v3125_v4 = vpop.eup %3124  ;;  %v2366_v35 = vmul.f32 %v3123_v27, %v2364_v48  ;;  %vm2371_vm14 = vweird.f32 %v3123_v27 }
0x261e   :  { %v2405_v2 = vmul.f32 %v3125_v4, %v2403_v55  ;;  %vm2410_vm15 = vweird.f32 %v3125_v4  ;;  %vm2372_vm5 = vmor %vm2370_vm0, %vm2371_vm14 }
0x261f   :  { %v2367_v46 = vsub.f32 1.0, %v2366_v35  ;;  %vm2411_vm7 = vmor %vm2409_vm6, %vm2410_vm15 }
0x2620   :  { %v2406_v59 = vsub.f32 1.0, %v2405_v2 }
0x2621   :  { %v2368_v10 = vmul.f32 %v3123_v27, %v2367_v46 }
0x2622   :  { %v2407_v34 = vmul.f32 %v3125_v4, %v2406_v59 }
0x2623   :  { %v2369_v28 = vadd.f32 %v3123_v27, %v2368_v10 }
0x2624   :  { %v2408_v17 = vadd.f32 %v3125_v4, %v2407_v34 }
0x2625   :  { %v2373_v51 = vsel %vm2372_vm5, %v3123_v27, %v2369_v28 }
0x2626   :  { %v2412_v7 = vsel %vm2411_vm7, %v3125_v4, %v2408_v17  ;;  %v2378_v12 = vsel %vm2375_vm8, %v2377_v57, %v2373_v51 }
0x2627   :  { %v2417_v40 = vsel %vm2414_vm9, %v2416_v5, %v2412_v7  ;;  %v2391_v55 = vsub.f32 1.0, %v2378_v12 }
0x2628   :  { %v2426_v33 = vsub.f32 1.0, %v2417_v40  ;;  %v2432_v23 = vmul.f32 %v2417_v40, %v4283_v22  ;;  %v2442_v22 = vsel %vm521_vm4, %v4231_v25, %v4203_v54  ;;  %v2444_v25 = vsel %vm521_vm4, %v4289_v49, %v4092_v26 }
0x2629   :  { %v2462_v35 = vsel %vm300_vm1, %v2442_v22, 0.0  ;;  %v2468_v34 = vsel %vm300_vm1, %v2444_v25, 0.0 }
0x267b   :  { %v2382_v15 = vpop.permute.xlu1 %2381 }
0x267c   :  { %v2384_v41 = vmul.f32 %v2382_v15, %v2378_v12  ;;  %v2419_v16 = vmul.f32 %v2417_v40, %v2382_v15 }
0x267e   :  { %2421 = vrot.lane.b32.xlu2 %v2419_v16, %s3164_s16  ;;  %2386 = vrot.lane.b32.xlu0 %v2384_v41, %s3164_s16 }
0x26d8   :  { %v2422_v11 = vpop.permute.xlu2 %2421 }
0x26d9   :  { %v2424_v1 = vadd.f32 %v2422_v11, %v3978_v13  ;;  %v2440_v13 = vsel %vm521_vm4, %v4153_v60, %v4261_v47  ;;  %v2397_v47 = vmul.f32 %v2378_v12, %v4278_v50 }
0x26da   :  { %v2456_v53 = vsel %vm300_vm1, %v2440_v13, 0.0 }
0x26db   :  { %3126 = vtanh.f32 %v2424_v1 }
0x26e1   :  { %v3127_v31 = vpop.eup %3126 }
0x26e2   :  { %2428 = vrot.lane.b32.xlu0 %v3127_v31, %s3165_s17 }
0x26f0   :  { %v2387_v45 = vpop.permute.xlu0 %2386 }
0x26f1   :  { %v2389_v58 = vadd.f32 %v2387_v45, %v3993_v21  ;;  %v2443_v21 = vsel %vm521_vm4, %v4259_v20, %v4157_v36  ;;  %v2439_v36 = vsel %vm521_vm4, %v4090_v24, %v4287_v3 }
0x26f2   :  { %v2465_v32 = vsel %vm300_vm1, %v2443_v21, 0.0  ;;  %v2453_v20 = vsel %vm300_vm1, %v2439_v36, 0.0 }
0x26f3   :  { %3128 = vtanh.f32 %v2389_v58  ;;  %v3150_v58 = vld [vmem:[%s4584_s1] sm:$0xff] }
0x26f9   :  { %v3129_v44 = vpop.eup %3128 }
0x26fa   :  { %2393 = vrot.lane.b32.xlu1 %v3129_v44, %s3165_s17  ;;  %v2650_v44 = vsub.f32 1.0, %v3150_v58 }
0x270c   :  { %2460 = vadd.xlane.f32.xlu0 %v2459_v14  ;;  %v3151_v14 = vld [vmem:[%s4584_s1 + $0x18] sm:$0xff] }
0x2724   :  { %2457 = vadd.xlane.f32.xlu1 %v2456_v53 }
0x272c   :  { %2466 = vadd.xlane.f32.xlu1 %v2465_v32 }
0x2754   :  { %v2429_v6 = vpop.permute.xlu0 %2428 }
0x2755   :  { %v2431_v52 = vmul.f32 %v2429_v6, %v2426_v33  ;;  %v3153_v6 = vld [vmem:[%s4584_s1 + $0x38] sm:$0xff] }
0x2757   :  { %v2433_v48 = vadd.f32 %v2432_v23, %v2431_v52  ;;  %v2657_v23 = vsub.f32 1.0, %v3153_v6 }
0x2759   :  { %2435 = vrot.lane.b32.xlu2 %v2433_v48, %s3166_s5  ;;  %v2665_v52 = vmul.f32 -1000000.0, %v2657_v23 }
0x276c   :  { %v2394_v60 = vpop.permute.xlu1 %2393 }
0x276d   :  { %v2396_v27 = vmul.f32 %v2394_v60, %v2391_v55 }
0x276f   :  { %v2398_v4 = vadd.f32 %v2397_v47, %v2396_v27 }
0x2771   :  { %2446 = vrot.lane.b32.xlu1 %v2398_v4, %s3165_s17 }
0x277f   :  { %v2461_v2 = vpop.xlane.xlu0 %2460 }
0x2780   :  { %v2477_v50 = vmul.f32 %v2461_v2, %v3803_v61 }
0x2782   :  { %2454 = vadd.xlane.f32.xlu2 %v2453_v20  ;;  %v4332_v46 = vsub.f32 %v2441_v42, %v2477_v50  ;;  %v2658_v42 = vmul.f32 -1000000.0, %v2650_v44 }
0x2784   :  { %v2493_v59 = vmul.f32 %v4332_v46, %v4332_v46 }
0x2786   :  { %v2507_v24 = vsel %vm300_vm1, %v2493_v59, 0.0 }
0x278a   :  { %2463 = vadd.xlane.f32.xlu2 %v2462_v35 }
0x2797   :  { %v2458_v28 = vpop.xlane.xlu1 %2457 }
0x2798   :  { %v2476_v43 = vmul.f32 %v2458_v28, %v3803_v61 }
0x279a   :  { %v4350_v63 = vsub.f32 %v2440_v13, %v2476_v43  ;;  %v2653_v13 = vsub.f32 1.0, %v3151_v14 }
0x279b   :  { %2508 = vadd.xlane.f32.xlu1 %v2507_v24 }
0x279c   :  { %v2492_v26 = vmul.f32 %v4350_v63, %v4350_v63  ;;  %v2661_v53 = vmul.f32 -1000000.0, %v2653_v13 }
0x279e   :  { %v2504_v7 = vsel %vm300_vm1, %v2492_v26, 0.0 }
0x279f   :  { %v2467_v17 = vpop.xlane.xlu1 %2466 }
0x27a0   :  { %v2479_v51 = vmul.f32 %v2467_v17, %v3803_v61 }
0x27a2   :  { %v4356_v49 = vsub.f32 %v2443_v21, %v2479_v51  ;;  %v3152_v21 = vld [vmem:[%s4584_s1 + $0x28] sm:$0xff]  ;;  %v3157_v51 = vld [vmem:[%s4584_s1 + $0x30] sm:$0xff] }
0x27a3   :  { %v2655_v32 = vsub.f32 1.0, %v3152_v21  ;;  %v2656_v26 = vsub.f32 1.0, %v3157_v51 }
0x27a4   :  { %v2495_v57 = vmul.f32 %v4356_v49, %v4356_v49 }
0x27a5   :  { %v2663_v33 = vmul.f32 -1000000.0, %v2655_v32 }
0x27b3   :  { %v2436_v3 = vpop.permute.xlu2 %2435 }
0x27b4   :  { %v4339_v10 = vsel %vm521_vm4, %v4017_v56, %v2436_v3  ;;  %v3155_v3 = vld [vmem:[%s4584_s1 + $0x10] sm:$0xff] }
0x27b5   :  { %v2450_v54 = vsel %vm300_vm1, %v4339_v10, 0.0 }
0x27b6   :  { %2451 = vadd.xlane.f32.xlu0 %v2450_v54  ;;  %v2652_v54 = vsub.f32 1.0, %v3155_v3  ;;  %v107_v3 = vld [vmem:[%s4597_s12] sm:$0x3] }
0x27be   :  { %2469 = vadd.xlane.f32.xlu0 %v2468_v34  ;;  %v2660_v34 = vmul.f32 -1000000.0, %v2652_v54 }
0x27e3   :  { %v2447_v62 = vpop.permute.xlu1 %2446 }
0x27e4   :  { %v2449_v56 = vsel %vm521_vm4, %v2447_v62, %v4032_v0  ;;  %v2513_v0 = vsel %vm300_vm1, %v2495_v57, 0.0  ;;  %v3156_v62 = vld [vmem:[%s4584_s1 + $0x20] sm:$0xff] }
0x27e5   :  { %v2471_v37 = vsel %vm300_vm1, %v2449_v56, 0.0 }
0x27e6   :  { %2472 = vadd.xlane.f32.xlu2 %v2471_v37 }
0x27ee   :  { %2505 = vadd.xlane.f32.xlu2 %v2504_v7 }
0x27f5   :  { %v2455_v5 = vpop.xlane.xlu2 %2454 }
0x27f6   :  { %v2475_v15 = vmul.f32 %v2455_v5, %v3803_v61  ;;  %2514 = vadd.xlane.f32.xlu2 %v2513_v0 }
0x27f8   :  { %v4363_v12 = vsub.f32 %v2439_v36, %v2475_v15  ;;  %v3154_v36 = vld [vmem:[%s4584_s1 + $0x8] sm:$0xff] }
0x27f9   :  { %v2651_v20 = vsub.f32 1.0, %v3154_v36 }
0x27fa   :  { %v2491_v40 = vmul.f32 %v4363_v12, %v4363_v12 }
0x27fc   :  { %v2501_v41 = vsel %vm300_vm1, %v2491_v40, 0.0 }
0x27fd   :  { %2502 = vadd.xlane.f32.xlu0 %v2501_v41  ;;  %v2464_v16 = vpop.xlane.xlu2 %2463 }
0x27fe   :  { %v2478_v11 = vmul.f32 %v2464_v16, %v3803_v61 }
0x2800   :  { %v4369_v1 = vsub.f32 %v2442_v22, %v2478_v11  ;;  %v2659_v22 = vmul.f32 -1000000.0, %v2651_v20 }
0x2802   :  { %v2494_v31 = vmul.f32 %v4369_v1, %v4369_v1 }
0x2804   :  { %v2510_v45 = vsel %vm300_vm1, %v2494_v31, 0.0 }
0x2805   :  { %2511 = vadd.xlane.f32.xlu0 %v2510_v45 }
0x280e   :  { %2668 = vperm.xlu2 %2911, %v2658_v42   ;;  %v2509_v0 = vpop.xlane.xlu1 %2508 }
0x280f   :  { %v2525_v42 = vmul.f32 %v2509_v0, %v3803_v61 }
0x2816   :  { %2683 = vperm.xlu2 %2911, %v2661_v53  }
0x281e   :  { %2693 = vperm.xlu2 %2911, %v2663_v33   ;;  %v4435_v33 = vadd.f32 1e-05, %v2525_v42 }
0x2826   :  { %2703 = vperm.xlu2 %2911, %v2665_v52  }
0x2829   :  { %v2452_v48 = vpop.xlane.xlu0 %2451 }
0x2831   :  { %v2470_v55 = vpop.xlane.xlu0 %2469 }
0x2832   :  { %v2480_v60 = vmul.f32 %v2470_v55, %v3803_v61 }
0x2834   :  { %v4387_v47 = vsub.f32 %v2444_v25, %v2480_v60  ;;  %v2474_v25 = vmul.f32 %v2452_v48, %v3803_v61 }
0x2836   :  { %v2496_v27 = vmul.f32 %v4387_v47, %v4387_v47  ;;  %v4406_v28 = vsub.f32 %v4339_v10, %v2474_v25  ;;  %v2664_v10 = vmul.f32 -1000000.0, %v2656_v26  ;;  %v2729_v25 = vsel %vm300_vm1, %v107_v3, 0 }
0x2837   :  { %2738 = vmatpush.bf16.xpose.msra.mxu2 %v2729_v25 }
0x2838   :  { %v2516_v4 = vsel %vm300_vm1, %v2496_v27, 0.0  ;;  %v2490_v17 = vmul.f32 %v4406_v28, %v4406_v28 }
0x2839   :  { %2517 = vadd.xlane.f32.xlu1 %v2516_v4 }
0x283a   :  { %v2498_v43 = vsel %vm300_vm1, %v2490_v17, 0.0 }
0x2852   :  { %2673 = vperm.xlu1 %2912, %v2659_v22  }
0x2859   :  { %v2473_v35 = vpop.xlane.xlu2 %2472 }
0x285a   :  { %v2481_v2 = vmul.f32 %v2473_v35, %v3803_v61 }
0x285c   :  { %v4396_v50 = vsub.f32 %v2449_v56, %v2481_v2  ;;  %v2654_v56 = vsub.f32 1.0, %v3156_v62 }
0x285e   :  { %v2497_v59 = vmul.f32 %v4396_v50, %v4396_v50  ;;  %v2662_v37 = vmul.f32 -1000000.0, %v2654_v56 }
0x2860   :  { %v2519_v24 = vsel %vm300_vm1, %v2497_v59, 0.0 }
0x2861   :  { %2520 = vadd.xlane.f32.xlu0 %v2519_v24  ;;  %v2506_v57 = vpop.xlane.xlu2 %2505 }
0x2862   :  { %v2524_v40 = vmul.f32 %v2506_v57, %v3803_v61 }
0x2864   :  { %v4421_v58 = vadd.f32 1e-05, %v2524_v40 }
0x2866   :  { %3130 = vrsqrt.f32 %v4421_v58  ;;  %vm2564_vm11 = vweird.f32 %v4421_v58 }
0x2869   :  { %v2515_v15 = vpop.xlane.xlu2 %2514 }
0x286a   :  { %v2527_v41 = vmul.f32 %v2515_v15, %v3803_v61 }
0x286c   :  { %v4425_v14 = vadd.f32 1e-05, %v2527_v41  ;;  %v4444_v23 = vpop.eup %3130 }
0x286d   :  { %v2559_v20 = vmul.f32 %v4444_v23, %v4421_v58  ;;  %vm2565_vm4 = vweird.f32 %v4444_v23 }
0x286e   :  { %3132 = vrsqrt.f32 %v4425_v14  ;;  %vm2594_vm2 = vweird.f32 %v4425_v14  ;;  %vm4498_vm12 = vmor %vm2564_vm11, %vm2565_vm4 }
0x2870   :  { %v2503_v7 = vpop.xlane.xlu0 %2502 }
0x2871   :  { %v2523_v11 = vmul.f32 %v2503_v7, %v3803_v61 }
0x2873   :  { %v4427_v13 = vadd.f32 1e-05, %v2523_v11 }
0x2874   :  { %v4447_v52 = vpop.eup %3132 }
0x2875   :  { %2678 = vperm.xlu0 %2913, %v2660_v34   ;;  %3134 = vrsqrt.f32 %v4427_v13  ;;  %v2589_v22 = vmul.f32 %v4447_v52, %v4425_v14  ;;  %v2560_v34 = vmul.f32 %v4444_v23, %v2559_v20  ;;  %vm2595_vm10 = vweird.f32 %v4447_v52 }
0x2876   :  { %vm4505_vm14 = vmor %vm2594_vm2, %vm2595_vm10  ;;  %vm2554_vm15 = vweird.f32 %v4427_v13  ;;  %vm2574_vm10 = vweird.f32 %v4435_v33 }
0x2877   :  { %v2590_v17 = vmul.f32 %v4447_v52, %v2589_v22 }
0x2878   :  { %v2512_v5 = vpop.xlane.xlu0 %2511 }
0x2879   :  { %v2526_v31 = vmul.f32 %v2512_v5, %v3803_v61  ;;  %v2591_v7 = vmul.f32 0.5, %v2590_v17 }
0x287b   :  { %v4430_v21 = vadd.f32 1e-05, %v2526_v31  ;;  %v4449_v48 = vpop.eup %3134 }
0x287c   :  { %2499 = vadd.xlane.f32.xlu1 %v2498_v43  ;;  %v2549_v35 = vmul.f32 %v4449_v48, %v4427_v13  ;;  %vm2555_vm3 = vweird.f32 %v4449_v48 }
0x287d   :  { %3136 = vrsqrt.f32 %v4430_v21  ;;  %vm4517_vm6 = vmor %vm2554_vm15, %vm2555_vm3  ;;  %vm2584_vm7 = vweird.f32 %v4430_v21 }
0x287e   :  { %v2550_v43 = vmul.f32 %v4449_v48, %v2549_v35 }
0x2880   :  { %v2551_v57 = vmul.f32 0.5, %v2550_v43 }
0x2883   :  { %v4451_v55 = vpop.eup %3136 }
0x2884   :  { %v2579_v2 = vmul.f32 %v4451_v55, %v4430_v21  ;;  %vm2585_vm13 = vweird.f32 %v4451_v55 }
0x2885   :  { %vm4522_vm8 = vmor %vm2584_vm7, %vm2585_vm13 }
0x2886   :  { %v2580_v62 = vmul.f32 %v4451_v55, %v2579_v2 }
0x2888   :  { %v2581_v0 = vmul.f32 0.5, %v2580_v62 }
0x288a   :  { %v2582_v42 = vsub.f32 1.5, %v2581_v0 }
0x288c   :  { %v2583_v58 = vmul.f32 %v4451_v55, %v2582_v42 }
0x2895   :  { %2688 = vperm.xlu1 %2912, %v2662_v37  }
0x289d   :  { %2698 = vperm.xlu1 %2912, %v2664_v10   ;;  %v2561_v10 = vmul.f32 0.5, %v2560_v34 }
0x289f   :  { %v2562_v31 = vsub.f32 1.5, %v2561_v10 }
0x28a1   :  { %v2563_v22 = vmul.f32 %v4444_v23, %v2562_v31 }
0x28a3   :  { %v2567_v43 = vsel %vm4498_vm12, %v4444_v23, %v2563_v22 }
0x28ac   :  { %v2518_v45 = vpop.xlane.xlu1 %2517 }
0x28ad   :  { %v2528_v53 = vmul.f32 %v2518_v45, %v3803_v61  ;;  %v2592_v45 = vsub.f32 1.5, %v2591_v7 }
0x28af   :  { %v4439_v6 = vadd.f32 1e-05, %v2528_v53  ;;  %v2593_v2 = vmul.f32 %v4447_v52, %v2592_v45 }
0x28b1   :  { %v2597_v21 = vsel %vm4505_vm14, %v4447_v52, %v2593_v2  ;;  %vm2604_vm3 = vweird.f32 %v4439_v6 }
0x28c4   :  { %v4457_v4 = vpop.permute.xlu1 %2673 }
0x28d4   :  { %v2521_v16 = vpop.xlane.xlu0 %2520 }
0x28d5   :  { %v2529_v44 = vmul.f32 %v2521_v16, %v3803_v61  ;;  %v4489_v16 = vpop.permute.xlu2 %2668 }
0x28d7   :  { %v4433_v32 = vadd.f32 1e-05, %v2529_v44  ;;  %v2552_v44 = vsub.f32 1.5, %v2551_v57 }
0x28d9   :  { %3138 = vrsqrt.f32 %v4433_v32  ;;  %vm2614_vm4 = vweird.f32 %v4433_v32 }
0x28da   :  { %3140 = vrsqrt.f32 %v4435_v33 }
0x28db   :  { %3142 = vrsqrt.f32 %v4439_v6 }
0x28df   :  { %v4453_v60 = vpop.eup %3138 }
0x28e0   :  { %v4455_v27 = vpop.eup %3140  ;;  %v2609_v59 = vmul.f32 %v4453_v60, %v4433_v32  ;;  %vm2615_vm0 = vweird.f32 %v4453_v60  ;;  %v2587_v32 = vsel %vm4522_vm8, %v4451_v55, %v2583_v58  ;;  %v2623_v55 = vmul.f32 %v2597_v21, %v4356_v49 }
0x28e1   :  { %v4459_v36 = vpop.eup %3142  ;;  %v2569_v24 = vmul.f32 %v4455_v27, %v4435_v33  ;;  %vm2575_vm5 = vweird.f32 %v4455_v27  ;;  %vm2616_vm11 = vmor %vm2614_vm4, %vm2615_vm0  ;;  %v2684_v33 = vpop.permute.xlu2 %2683  ;;  %vm2744_vm0 = vcmask 31744  }
0x28e2   :  { %v2599_v54 = vmul.f32 %v4459_v36, %v4439_v6  ;;  %v2610_v56 = vmul.f32 %v4453_v60, %v2609_v59  ;;  %v2553_v59 = vmul.f32 %v4449_v48, %v2552_v44  ;;  %vm2605_vm9 = vweird.f32 %v4459_v36  ;;  %vm2576_vm2 = vmor %vm2574_vm10, %vm2575_vm5 }
0x28e3   :  { %v2570_v37 = vmul.f32 %v4455_v27, %v2569_v24  ;;  %vm2606_vm12 = vmor %vm2604_vm3, %vm2605_vm9  ;;  %v2622_v6 = vmul.f32 %v2587_v32, %v4369_v1 }
0x28e4   :  { %v2600_v51 = vmul.f32 %v4459_v36, %v2599_v54  ;;  %v2611_v15 = vmul.f32 0.5, %v2610_v56  ;;  %v2557_v62 = vsel %vm4517_vm6, %v4449_v48, %v2553_v59 }
0x28e5   :  { %v2571_v40 = vmul.f32 0.5, %v2570_v37  ;;  %v2619_v37 = vmul.f32 %v2557_v62, %v4363_v12 }
0x28e6   :  { %v2601_v11 = vmul.f32 0.5, %v2600_v51  ;;  %v2612_v53 = vsub.f32 1.5, %v2611_v15  ;;  %v2620_v51 = vmul.f32 %v2567_v43, %v4350_v63 }
0x28e7   :  { %v2572_v20 = vsub.f32 1.5, %v2571_v40 }
0x28e8   :  { %v2613_v14 = vmul.f32 %v4453_v60, %v2612_v53 }
0x28e9   :  { %v2573_v54 = vmul.f32 %v4455_v27, %v2572_v20  ;;  %v2694_v0 = vpop.permute.xlu2 %2693 }
0x28ea   :  { %v2617_v23 = vsel %vm2616_vm11, %v4453_v60, %v2613_v14 }
0x28eb   :  { %v2577_v52 = vsel %vm2576_vm2, %v4455_v27, %v2573_v54  ;;  %v2625_v10 = vmul.f32 %v2617_v23, %v4396_v50 }
0x28ec   :  { %v2621_v60 = vmul.f32 %v2577_v52, %v4332_v46 }
0x28ef   :  { %v2500_v26 = vpop.xlane.xlu1 %2499 }
0x28f0   :  { %v2522_v5 = vmul.f32 %v2500_v26, %v3803_v61  ;;  %v2602_v61 = vsub.f32 1.5, %v2601_v11 }
0x28f1   :  { %v2704_v25 = vpop.permute.xlu2 %2703 }
0x28f2   :  { %v4487_v41 = vadd.f32 1e-05, %v2522_v5  ;;  %v2603_v34 = vmul.f32 %v4459_v36, %v2602_v61 }
0x28f4   :  { %3144 = vrsqrt.f32 %v4487_v41  ;;  %v2607_v48 = vsel %vm2606_vm12, %v4459_v36, %v2603_v34  ;;  %v3158_v36 = vld [vmem:[%s4590_s8] ss:$0 sm:$0xff]  ;;  %vm2544_vm14 = vweird.f32 %v4487_v41 }
0x28f5   :  { %v2624_v27 = vmul.f32 %v2607_v48, %v4387_v47  ;;  %v2627_v12 = vmul.f32 %v3158_v36, %v2619_v37  ;;  %v2628_v57 = vmul.f32 %v3158_v36, %v2620_v51  ;;  %v2631_v49 = vmul.f32 %v3158_v36, %v2623_v55  ;;  %v3159_v47 = vld [vmem:[%s4591_s9] ss:$0 sm:$0xff] }
0x28f6   :  { %v2633_v50 = vmul.f32 %v3158_v36, %v2625_v10  ;;  %v2630_v5 = vmul.f32 %v3158_v36, %v2622_v6  ;;  %v2629_v1 = vmul.f32 %v3158_v36, %v2621_v60 }
0x28f7   :  { %v2632_v40 = vmul.f32 %v3158_v36, %v2624_v27  ;;  %v2635_v11 = vadd.f32 %v3159_v47, %v2627_v12  ;;  %v2636_v31 = vadd.f32 %v3159_v47, %v2628_v57  ;;  %v2639_v44 = vadd.f32 %v3159_v47, %v2631_v49 }
0x28f8   :  { %v2638_v53 = vadd.f32 %v3159_v47, %v2630_v5  ;;  %v2637_v20 = vadd.f32 %v3159_v47, %v2629_v1 }
0x28f9   :  { %v2640_v22 = vadd.f32 %v3159_v47, %v2632_v40  ;;  %v2643_v35 = vmul.f32 %v2635_v11, %v3439_v9  ;;  %v2644_v2 = vmul.f32 %v2636_v31, %v3457_v19  ;;  %v2647_v59 = vmul.f32 %v2639_v44, %v3465_v29 }
0x28fa   :  { %v3145_v3 = vpop.eup %3144  ;;  %v2646_v58 = vmul.f32 %v2638_v53, %v3468_v30 }
0x28fb   :  { %v2539_v17 = vmul.f32 %v3145_v3, %v4487_v41  ;;  %vm2545_vm13 = vweird.f32 %v3145_v3  ;;  %v2641_v41 = vadd.f32 %v3159_v47, %v2633_v50  ;;  %v2707_v54 = vadd.f32 %v4457_v4, %v2643_v35 }
0x28fc   :  { %vm2546_vm15 = vmor %vm2544_vm14, %vm2545_vm13  ;;  %v2648_v9 = vmul.f32 %v2640_v22, %v3474_v38  ;;  %v2711_v29 = vadd.f32 %v2694_v0, %v2647_v59  ;;  %v2919_v38 = vld [vmem:[%s4596_s13] ss:$0 sm:$0xff] }
0x28fd   :  { %v2540_v56 = vmul.f32 %v3145_v3, %v2539_v17  ;;  %v2649_v24 = vmul.f32 %v2641_v41, %v3477_v39 }
0x28ff   :  { %v2541_v26 = vmul.f32 0.5, %v2540_v56  ;;  %v2713_v21 = vadd.f32 %v2704_v25, %v2649_v24 }
0x2901   :  { %v2542_v7 = vsub.f32 1.5, %v2541_v26 }
0x2903   :  { %v2543_v63 = vmul.f32 %v3145_v3, %v2542_v7 }
0x2905   :  { %v2547_v46 = vsel %vm2546_vm15, %v3145_v3, %v2543_v63  ;;  %v2645_v3 = vmul.f32 %v2637_v20, %v3454_v18 }
0x2906   :  { %v2618_v15 = vmul.f32 %v2547_v46, %v4406_v28  ;;  %v2679_v28 = vpop.permute.xlu0 %2678 }
0x2907   :  { %v2689_v45 = vpop.permute.xlu1 %2688  ;;  %v2708_v13 = vadd.f32 %v2679_v28, %v2644_v2  ;;  %v2709_v17 = vadd.f32 %v2684_v33, %v2645_v3 }
0x2908   :  { %v2626_v42 = vmul.f32 %v3158_v36, %v2618_v15  ;;  %v2710_v34 = vadd.f32 %v2689_v45, %v2646_v58 }
0x2909   :  { %v2715_v30 = vmax.f32 %v2708_v13, %v2709_v17 }
0x290a   :  { %v2634_v61 = vadd.f32 %v3159_v47, %v2626_v42  ;;  %v2716_v32 = vmax.f32 %v2710_v34, %v2711_v29 }
0x290c   :  { %v2642_v14 = vmul.f32 %v2634_v61, %v3437_v8 }
0x290e   :  { %v2706_v19 = vadd.f32 %v4489_v16, %v2642_v14 }
0x290f   :  { %v2699_v43 = vpop.permute.xlu1 %2698 }
0x2910   :  { %v2712_v39 = vadd.f32 %v2699_v43, %v2648_v9  ;;  %v2714_v62 = vmax.f32 %v2706_v19, %v2707_v54 }
0x2912   :  { %v2717_v8 = vmax.f32 %v2712_v39, %v2713_v21  ;;  %v2718_v23 = vmax.f32 %v2714_v62, %v2715_v30 }
0x2914   :  { %v2719_v18 = vmax.f32 %v2716_v32, %v2717_v8 }
0x2916   :  { %v2720_v56 = vmax.f32 %v2718_v23, %v2719_v18 }
0x2918   :  { %v2721_v4 = vpack.c.bf16 %v2720_v56, %v2720_v56 }
0x291a   :  { %2880 = vmatmul.msk.bf16.vlgmr.msra.gmra.mxu2 %vm300_vm1, %v2721_v4 }
0x299d   :  { %v2740_v16 = vpop.f32.mrf.mxu2 }
0x299e   :  { %v2741_v33 = vadd.f32 %v2919_v38, %v2740_v16 }
0x29a0   :  { %2745 = vst.msk [vmem:[%s4598_s15] sm:$0xff] %vm2744_vm0, %v2741_v33 }
0x29a5   :  { %v2742_v52 = vpop.f32.mrf.mxu2 }

</bundles_post_ra>
